<compile_context>
chip_gen: v5e
topology: v5e:2x2
jax: 0.10.0
libtpu: 0.0.40
codegen_flags: <defaults>
</compile_context>

<pallas_src>
import numpy as np
import jax
import jax.numpy as jnp
from jax import lax
from jax.experimental import pallas as pl
from jax.experimental.pallas import tpu as pltpu

KERNEL_SIZE = 5
_LANE = 128
_SUBLANE = 8


def calc_output(input_size, padding, kernel_size):
    for kernel in kernel_size:
        output = []
        for n in input_size:
            output.append(n + 2 * padding - (kernel - 1))
        input_size = output
    return (output, int(np.prod(output)))


def _round_up(x, m):
    return ((x + m - 1) // m) * m


# ---------------------------------------------------------------------------
# Weight preprocessing: lower a VALID stride-1 conv to a dense, lane-padded matmul.
# ---------------------------------------------------------------------------
def _lower_conv_to_matmul(w, b, in_hw, in_rows_padded):
    """conv(x, w) + b  ==  x_flat_padded @ T_pad + cb_pad (PyTorch NCHW flatten order).

    T is padded with zero rows up to `in_rows_padded` (the padded width of the
    previous activation) and with zero columns up to a multiple of 128.  Padded
    activation lanes are relu(0 + 0) = 0, so the padding is numerically exact.
    """
    cout, cin, kh, kw = w.shape
    h, wd = in_hw
    ho, wo = h - kh + 1, wd - kw + 1
    # sel_h[a, ih, oh] = 1 iff ih == oh + a ; sel_w[b, iw, ow] = 1 iff iw == ow + b
    sel_h = (np.arange(h)[None, :, None] ==
             (np.arange(kh)[:, None, None] + np.arange(ho)[None, None, :]))
    sel_w = (np.arange(wd)[None, :, None] ==
             (np.arange(kw)[:, None, None] + np.arange(wo)[None, None, :]))
    t = jnp.einsum(
        'ocab,ahp,bwq->chwopq',
        w.astype(jnp.float32),
        jnp.asarray(sel_h, jnp.float32),
        jnp.asarray(sel_w, jnp.float32),
        precision=lax.Precision.HIGHEST,   # exact copy of weight taps into T
    )
    d_in = cin * h * wd
    d_out = cout * ho * wo
    d_out_pad = _round_up(d_out, _LANE)
    t = t.reshape(d_in, d_out)
    t = jnp.pad(t, ((0, in_rows_padded - d_in), (0, d_out_pad - d_out)))
    cb = jnp.broadcast_to(b.astype(jnp.float32)[:, None],
                          (cout, ho * wo)).reshape(1, d_out)
    cb = jnp.pad(cb, ((0, 0), (0, d_out_pad - d_out)))
    return t, cb, (ho, wo), d_out, d_out_pad


# ---------------------------------------------------------------------------
# Fused kernel: 3x (MXU matmul + bias + ReLU)  +  final (lane-padded) FC matmul.
# ---------------------------------------------------------------------------
def cnn_relu_kernel(x_ref, t1_ref, c1_ref, t2_ref, c2_ref, t3_ref, c3_ref,
                    fwt_ref, fb_ref, out_ref):
    h = x_ref[...]                                                    # (Nt, d0p)
    h = jnp.maximum(
        jnp.dot(h, t1_ref[...], preferred_element_type=jnp.float32) + c1_ref[...], 0.0)
    h = jnp.maximum(
        jnp.dot(h, t2_ref[...], preferred_element_type=jnp.float32) + c2_ref[...], 0.0)
    h = jnp.maximum(
        jnp.dot(h, t3_ref[...], preferred_element_type=jnp.float32) + c3_ref[...], 0.0)
    # FC weight is zero-padded to a full (d3p, 128) tile, so this store is one
    # unmasked lane-dense vst; real columns are sliced outside the kernel.
    out_ref[...] = (jnp.dot(h, fwt_ref[...], preferred_element_type=jnp.float32)
                    + fb_ref[...]).astype(out_ref.dtype)


def _full_spec(shape):
    # Whole array resident in VMEM; grid-invariant index map -> DMA'd once.
    return pl.BlockSpec(shape, lambda i, _n=len(shape): (0,) * _n)


def _pick_batch_tile(n):
    """Fixed lane-friendly batch tile (fills the MXU M dim), capped so the batch
    grid has >= 2 steps whenever n >= 16 (so the 'parallel' axis really shards
    across v7x's two TensorCores and the input DMA pipelines with compute)."""
    target = 256 if n >= 512 else 128
    if n >= 16:
        return min(target, _round_up((n + 1) // 2, _SUBLANE))
    return _round_up(max(n, 1), _SUBLANE)


def cnn_relu_forward(x, params):
    w1, b1, w2, b2, w3, b3, fw, fb = params
    n, cin, h, w = x.shape
    assert cin == w1.shape[1] == 1

    d0 = cin * h * w
    d0p = _round_up(d0, _LANE)

    # Lower the three convs to dense, 128-lane-padded matmuls (preprocessing only).
    t1, c1, (h1, w1d), d1, d1p = _lower_conv_to_matmul(w1, b1, (h, w), d0p)
    t2, c2, (h2, w2d), d2, d2p = _lower_conv_to_matmul(w2, b2, (h1, w1d), d1p)
    t3, c3, (h3, w3d), d3, d3p = _lower_conv_to_matmul(w3, b3, (h2, w2d), d2p)

    out_features = fw.shape[0]
    assert fw.shape[1] == d3, "fc1 in_features must match flattened conv3 output"
    op = _round_up(out_features, _LANE)
    fwt = jnp.pad(fw.T.astype(jnp.float32),
                  ((0, d3p - d3), (0, op - out_features)))         # (d3p, 128)
    fbr = jnp.pad(fb.astype(jnp.float32).reshape(1, out_features),
                  ((0, 0), (0, op - out_features)))                 # (1, 128)

    nt = _pick_batch_tile(n)
    n_grid = pl.cdiv(n, nt)
    n_pad = nt * n_grid

    x_flat = x.reshape(n, d0).astype(jnp.float32)
    x_flat = jnp.pad(x_flat, ((0, n_pad - n), (0, d0p - d0)))       # zero rows/cols

    # Explicit VMEM budget: double-buffered weights + double-buffered I/O tiles
    # + per-layer intermediates (v5e default scoped limit is only ~16 MiB).
    w_bytes = 4 * (d0p * d1p + d1p * d2p + d2p * d3p + d3p * op
                   + d1p + d2p + d3p + op)
    io_bytes = 4 * nt * 2 * (d0p + op)
    inter_bytes = 4 * nt * (d1p + d2p + d3p)
    need_bytes = 2 * w_bytes + io_bytes + 2 * inter_bytes
    vmem_limit = int(min(max(need_bytes + (4 << 20), 16 << 20), 64 << 20))
    # Size guard: T2 grows ~(H*W)^2; the dense lowering must also fit v7x's 64 MiB VMEM.
    assert need_bytes < (56 << 20), (
        "dense conv->matmul lowering too large for VMEM at this spatial size; "
        "use the im2col-GEMM path instead")  # TODO(synk): im2col path for large H*W.

    out = pl.pallas_call(
        cnn_relu_kernel,
        out_shape=jax.ShapeDtypeStruct((n_pad, op), jnp.float32),
        grid_spec=pltpu.PrefetchScalarGridSpec(
            num_scalar_prefetch=0,
            grid=(n_grid,),
            in_specs=[
                pl.BlockSpec((nt, d0p), lambda i: (i, 0)),          # batch-tiled input
                _full_spec(t1.shape), _full_spec(c1.shape),
                _full_spec(t2.shape), _full_spec(c2.shape),
                _full_spec(t3.shape), _full_spec(c3.shape),
                _full_spec(fwt.shape), _full_spec(fbr.shape),
            ],
            out_specs=pl.BlockSpec((nt, op), lambda i: (i, 0)),
        ),
        compiler_params=pltpu.CompilerParams(
            dimension_semantics=("parallel",),   # >=2 steps -> shards across TCs on v7x
            vmem_limit_bytes=vmem_limit,
        ),
    )(x_flat, t1, c1, t2, c2, t3, c3, fwt, fbr)
    return out[:n, :out_features]


def reference_forward(x, params):
    """Pure-JAX reference matching PyTorch CNN_relu.forward."""
    w1, b1, w2, b2, w3, b3, fw, fb = params

    def conv_relu(y, w, b):
        y = lax.conv_general_dilated(
            y, w, window_strides=(1, 1), padding='VALID',
            dimension_numbers=('NCHW', 'OIHW', 'NCHW'),
            precision=lax.Precision.HIGHEST)
        return jax.nn.relu(y + b[None, :, None, None])

    y = conv_relu(x, w1, b1)
    y = conv_relu(y, w2, b2)
    y = conv_relu(y, w3, b3)
    y = y.reshape(x.shape[0], -1)
    return y @ fw.T + fb


if __name__ == "__main__":
    key = jax.random.PRNGKey(0)
    ks = jax.random.split(key, 9)

    # batch=16, tile=8 -> grid=(2,): exercises the multi-step pipeline and the
    # two-TensorCore 'parallel' sharding path.
    # 20x20 input -> conv outputs 16x16 (3ch), 12x12 (5ch), 8x8 (1ch); dense_input=64.
    N, H, W = 16, 20, 20
    x = jax.random.normal(ks[0], (N, 1, H, W), jnp.float32)

    def unif(k, shape, fan_in):
        bound = 1.0 / float(np.sqrt(fan_in))
        return jax.random.uniform(k, shape, jnp.float32, -bound, bound)

    _, dense_input = calc_output([H, W], 0, [KERNEL_SIZE] * 3)

    w1 = unif(ks[1], (3, 1, 5, 5), 1 * 25); b1 = unif(ks[2], (3,), 1 * 25)
    w2 = unif(ks[3], (5, 3, 5, 5), 3 * 25); b2 = unif(ks[4], (5,), 3 * 25)
    w3 = unif(ks[5], (1, 5, 5, 5), 5 * 25); b3 = unif(ks[6], (1,), 5 * 25)
    fw = unif(ks[7], (2, dense_input), dense_input)
    fb = unif(ks[8], (2,), dense_input)
    params = (w1, b1, w2, b2, w3, b3, fw, fb)

    out = jax.block_until_ready(jax.jit(cnn_relu_forward)(x, params))

    ref = reference_forward(x, params)
    np.testing.assert_allclose(np.asarray(out), np.asarray(ref), rtol=1e-4, atol=1e-4)

    print("KERNEL_OK")
</pallas_src>

<mosaic_0001>
module attributes {stable_mosaic.version = 11 : i64} {
  func.func @cnn_relu_kernel(%arg0: i32, %arg1: memref<8x512xf32, #tpu.memory_space<vmem>>, %arg2: memref<512x768xf32, #tpu.memory_space<vmem>>, %arg3: memref<1x768xf32, #tpu.memory_space<vmem>>, %arg4: memref<768x768xf32, #tpu.memory_space<vmem>>, %arg5: memref<1x768xf32, #tpu.memory_space<vmem>>, %arg6: memref<768x128xf32, #tpu.memory_space<vmem>>, %arg7: memref<1x128xf32, #tpu.memory_space<vmem>>, %arg8: memref<128x128xf32, #tpu.memory_space<vmem>>, %arg9: memref<1x128xf32, #tpu.memory_space<vmem>>, %arg10: memref<8x128xf32, #tpu.memory_space<vmem>>) attributes {dimension_semantics = [#tpu.dimension_semantics<parallel>], iteration_bounds = array<i64: 2>, scalar_prefetch = 0 : i64, scratch_operands = 0 : i64, tpu.core_type = #tpu.core_type<tc>, window_params = [{transform_indices = @transform_0, window_bounds = array<i64: 8, 512>}, {pipeline_mode = #tpu.pipeline_mode<synchronous>, transform_indices = @transform_1, window_bounds = array<i64: 512, 768>}, {pipeline_mode = #tpu.pipeline_mode<synchronous>, transform_indices = @transform_2, window_bounds = array<i64: 1, 768>}, {pipeline_mode = #tpu.pipeline_mode<synchronous>, transform_indices = @transform_3, window_bounds = array<i64: 768, 768>}, {pipeline_mode = #tpu.pipeline_mode<synchronous>, transform_indices = @transform_4, window_bounds = array<i64: 1, 768>}, {pipeline_mode = #tpu.pipeline_mode<synchronous>, transform_indices = @transform_5, window_bounds = array<i64: 768, 128>}, {pipeline_mode = #tpu.pipeline_mode<synchronous>, transform_indices = @transform_6, window_bounds = array<i64: 1, 128>}, {pipeline_mode = #tpu.pipeline_mode<synchronous>, transform_indices = @transform_7, window_bounds = array<i64: 128, 128>}, {pipeline_mode = #tpu.pipeline_mode<synchronous>, transform_indices = @transform_8, window_bounds = array<i64: 1, 128>}, {transform_indices = @transform_9, window_bounds = array<i64: 8, 128>}]} {
    %c0 = arith.constant 0 : index
    %c0_0 = arith.constant 0 : index
    %0 = vector.load %arg1[%c0, %c0_0] : memref<8x512xf32, #tpu.memory_space<vmem>>, vector<8x512xf32>
    %c0_1 = arith.constant 0 : index
    %c0_2 = arith.constant 0 : index
    %1 = vector.load %arg2[%c0_1, %c0_2] : memref<512x768xf32, #tpu.memory_space<vmem>>, vector<512x768xf32>
    %cst = arith.constant dense<0.000000e+00> : vector<8x768xf32>
    %2 = tpu.matmul %0, %1, %cst {dimension_numbers = #tpu.dot_dimension_numbers<[1], [0], [0], [1], [0, 0, 1, 1], [], []>} : vector<8x512xf32>, vector<512x768xf32>, vector<8x768xf32> -> vector<8x768xf32>
    %c0_3 = arith.constant 0 : index
    %c0_4 = arith.constant 0 : index
    %3 = vector.load %arg3[%c0_3, %c0_4] : memref<1x768xf32, #tpu.memory_space<vmem>>, vector<1x768xf32>
    %4 = vector.broadcast %3 : vector<1x768xf32> to vector<8x768xf32>
    %5 = arith.addf %2, %4 : vector<8x768xf32>
    %cst_5 = arith.constant 0.000000e+00 : f32
    %6 = vector.broadcast %cst_5 : f32 to vector<8x768xf32>
    %7 = arith.maximumf %5, %6 : vector<8x768xf32>
    %c0_6 = arith.constant 0 : index
    %c0_7 = arith.constant 0 : index
    %8 = vector.load %arg4[%c0_6, %c0_7] : memref<768x768xf32, #tpu.memory_space<vmem>>, vector<768x768xf32>
    %cst_8 = arith.constant dense<0.000000e+00> : vector<8x768xf32>
    %9 = tpu.matmul %7, %8, %cst_8 {dimension_numbers = #tpu.dot_dimension_numbers<[1], [0], [0], [1], [0, 0, 1, 1], [], []>} : vector<8x768xf32>, vector<768x768xf32>, vector<8x768xf32> -> vector<8x768xf32>
    %c0_9 = arith.constant 0 : index
    %c0_10 = arith.constant 0 : index
    %10 = vector.load %arg5[%c0_9, %c0_10] : memref<1x768xf32, #tpu.memory_space<vmem>>, vector<1x768xf32>
    %11 = vector.broadcast %10 : vector<1x768xf32> to vector<8x768xf32>
    %12 = arith.addf %9, %11 : vector<8x768xf32>
    %cst_11 = arith.constant 0.000000e+00 : f32
    %13 = vector.broadcast %cst_11 : f32 to vector<8x768xf32>
    %14 = arith.maximumf %12, %13 : vector<8x768xf32>
    %c0_12 = arith.constant 0 : index
    %c0_13 = arith.constant 0 : index
    %15 = vector.load %arg6[%c0_12, %c0_13] : memref<768x128xf32, #tpu.memory_space<vmem>>, vector<768x128xf32>
    %cst_14 = arith.constant dense<0.000000e+00> : vector<8x128xf32>
    %16 = tpu.matmul %14, %15, %cst_14 {dimension_numbers = #tpu.dot_dimension_numbers<[1], [0], [0], [1], [0, 0, 1, 1], [], []>} : vector<8x768xf32>, vector<768x128xf32>, vector<8x128xf32> -> vector<8x128xf32>
    %c0_15 = arith.constant 0 : index
    %c0_16 = arith.constant 0 : index
    %17 = vector.load %arg7[%c0_15, %c0_16] : memref<1x128xf32, #tpu.memory_space<vmem>>, vector<1x128xf32>
    %18 = vector.broadcast %17 : vector<1x128xf32> to vector<8x128xf32>
    %19 = arith.addf %16, %18 : vector<8x128xf32>
    %cst_17 = arith.constant 0.000000e+00 : f32
    %20 = vector.broadcast %cst_17 : f32 to vector<8x128xf32>
    %21 = arith.maximumf %19, %20 : vector<8x128xf32>
    %c0_18 = arith.constant 0 : index
    %c0_19 = arith.constant 0 : index
    %22 = vector.load %arg8[%c0_18, %c0_19] : memref<128x128xf32, #tpu.memory_space<vmem>>, vector<128x128xf32>
    %cst_20 = arith.constant dense<0.000000e+00> : vector<8x128xf32>
    %23 = tpu.matmul %21, %22, %cst_20 {dimension_numbers = #tpu.dot_dimension_numbers<[1], [0], [0], [1], [0, 0, 1, 1], [], []>} : vector<8x128xf32>, vector<128x128xf32>, vector<8x128xf32> -> vector<8x128xf32>
    %c0_21 = arith.constant 0 : index
    %c0_22 = arith.constant 0 : index
    %24 = vector.load %arg9[%c0_21, %c0_22] : memref<1x128xf32, #tpu.memory_space<vmem>>, vector<1x128xf32>
    %25 = vector.broadcast %24 : vector<1x128xf32> to vector<8x128xf32>
    %26 = arith.addf %23, %25 : vector<8x128xf32>
    %c0_23 = arith.constant 0 : index
    %c0_24 = arith.constant 0 : index
    %27 = vector.load %arg10[%c0_23, %c0_24] : memref<8x128xf32, #tpu.memory_space<vmem>>, vector<8x128xf32>
    tpu.vector_store %arg10[%c0_23, %c0_24], %26 {strides = array<i32>} : memref<8x128xf32, #tpu.memory_space<vmem>>, vector<8x128xf32>,
    return
  }
  func.func @transform_0(%arg0: i32) -> (i32, i32) {
    %c0_i32 = arith.constant 0 : i32
    %c0_i32_0 = arith.constant 0 : i32
    return %arg0, %c0_i32 : i32, i32
  }
  func.func @transform_1(%arg0: i32) -> (i32, i32) {
    %c0_i32 = arith.constant 0 : i32
    %c0_i32_0 = arith.constant 0 : i32
    %c0_i32_1 = arith.constant 0 : i32
    return %c0_i32, %c0_i32_0 : i32, i32
  }
  func.func @transform_2(%arg0: i32) -> (i32, i32) {
    %c0_i32 = arith.constant 0 : i32
    %c0_i32_0 = arith.constant 0 : i32
    %c0_i32_1 = arith.constant 0 : i32
    return %c0_i32, %c0_i32_0 : i32, i32
  }
  func.func @transform_3(%arg0: i32) -> (i32, i32) {
    %c0_i32 = arith.constant 0 : i32
    %c0_i32_0 = arith.constant 0 : i32
    %c0_i32_1 = arith.constant 0 : i32
    return %c0_i32, %c0_i32_0 : i32, i32
  }
  func.func @transform_4(%arg0: i32) -> (i32, i32) {
    %c0_i32 = arith.constant 0 : i32
    %c0_i32_0 = arith.constant 0 : i32
    %c0_i32_1 = arith.constant 0 : i32
    return %c0_i32, %c0_i32_0 : i32, i32
  }
  func.func @transform_5(%arg0: i32) -> (i32, i32) {
    %c0_i32 = arith.constant 0 : i32
    %c0_i32_0 = arith.constant 0 : i32
    %c0_i32_1 = arith.constant 0 : i32
    return %c0_i32, %c0_i32_0 : i32, i32
  }
  func.func @transform_6(%arg0: i32) -> (i32, i32) {
    %c0_i32 = arith.constant 0 : i32
    %c0_i32_0 = arith.constant 0 : i32
    %c0_i32_1 = arith.constant 0 : i32
    return %c0_i32, %c0_i32_0 : i32, i32
  }
  func.func @transform_7(%arg0: i32) -> (i32, i32) {
    %c0_i32 = arith.constant 0 : i32
    %c0_i32_0 = arith.constant 0 : i32
    %c0_i32_1 = arith.constant 0 : i32
    return %c0_i32, %c0_i32_0 : i32, i32
  }
  func.func @transform_8(%arg0: i32) -> (i32, i32) {
    %c0_i32 = arith.constant 0 : i32
    %c0_i32_0 = arith.constant 0 : i32
    %c0_i32_1 = arith.constant 0 : i32
    return %c0_i32, %c0_i32_0 : i32, i32
  }
  func.func @transform_9(%arg0: i32) -> (i32, i32) {
    %c0_i32 = arith.constant 0 : i32
    %c0_i32_0 = arith.constant 0 : i32
    return %arg0, %c0_i32 : i32, i32
  }
}

</mosaic_0001>

<bundles_post_ra>
// kernel: cnn_relu_forward.1
= control target key start
LH: loop header
LB: loop body
LE: loop exit
PB: predicated region body
PF: predicated region fallthrough
CT: control target
= control target key end

     0   :  { %s2933_s30 = smov 0   ;;  %s6330_s0 = inlined_call_operand.vmem [shape: f32[16,512], index: 0, kind: input, shape index: {}]   ;;  %s6331_s1 = inlined_call_operand.vmem [shape: f32[512,768], index: 1, kind: input, shape index: {}]   ;;  %s6332_s2 = inlined_call_operand.vmem [shape: f32[1,768], index: 2, kind: input, shape index: {}]   ;;  %s6333_s3 = inlined_call_operand.vmem [shape: f32[768,768], index: 3, kind: input, shape index: {}]   ;;  %s6334_s4 = inlined_call_operand.vmem [shape: f32[1,768], index: 4, kind: input, shape index: {}]   ;;  %s6335_s5 = inlined_call_operand.vmem [shape: f32[768,128], index: 5, kind: input, shape index: {}]   ;;  %s6336_s6 = inlined_call_operand.vmem [shape: f32[1,128], index: 6, kind: input, shape index: {}]   ;;  %s6337_s7 = inlined_call_operand.vmem [shape: f32[128,128], index: 7, kind: input, shape index: {}]   ;;  %s6338_s8 = inlined_call_operand.vmem [shape: f32[1,128], index: 8, kind: input, shape index: {}]   ;;  %s6339_s9 = inlined_call_operand.vmem [shape: f32[16,128], index: 9, kind: output, shape index: {}]  }
   0x1 LB: > { %s2850_s10 = sadd.s32 4294967295, %s2881_s30   ;;  %p2854_p0 = scmp.ge.s32.totalorder %s2881_s30, 1  ;;  %s2881_s30 = sphi %s2933_s30, %s19_s30  }
   0x2   : > { %p287_p1 = scmp.lt.s32.totalorder %s2881_s30, 3 }
   0x4   : > { %p288_p2 = pnand %p2854_p0, %p287_p1 }
   0x5   : > { %p3243_p3 = scmp.lt.s32.totalorder (!%p288_p2), %s2850_s10, 1 }
   0x6   : > { %291 = sbr.rel (%p288_p2) target bundleno = 955 (0x3bb), region = 56 }
   0xb   : > { %v425_v0 = vld [vmem:[%s6331_s1 + $0x2d0] sm:$0xff]  ;;  %v419_v2 = vld [vmem:[%s6331_s1 + $0x2a0] sm:$0xff]  ;;  %v426_v62 = vld [vmem:[%s6331_s1 + $0x2d8] sm:$0xff]  ;;  %s6342_s10 = smov (!%p3243_p3, %s2850_s10), 1 }
   0xc   : > { %v617_v1 = vld [vmem:[%s6331_s1 + $0x8d0] sm:$0xff]  ;;  %733 = vmatpush.msra.mxu0 %v425_v0  ;;  %v611_v4 = vld [vmem:[%s6331_s1 + $0x8a0] sm:$0xff]  ;;  %v618_v63 = vld [vmem:[%s6331_s1 + $0x8d8] sm:$0xff]  ;;  %s2860_s16 = sshll.u32 %s6342_s10, 5  ;;  %s2857_s29 = sshll.u32 %s6342_s10, 3 }
   0xd   : > { %773 = vmatpush.msra.mxu2 %v617_v1  ;;  %v521_v3 = vld [vmem:[%s6331_s1 + $0x5d0] sm:$0xff]  ;;  %v515_v7 = vld [vmem:[%s6331_s1 + $0x5a0] sm:$0xff]  ;;  %s3323_s12 = scalar_lea.vmem %s6330_s0, %s2860_s16  ;;  %s330_s17 = scalar_lea.vmem %s6339_s9, %s2857_s29 }
   0xe   : > { %v713_v5 = vld [vmem:[%s6331_s1 + $0xbd0] sm:$0xff]  ;;  %753 = vmatpush.msra.mxu1 %v521_v3  ;;  %734 = vmatpush.msra.mxu0 %v419_v2  ;;  %v707_v9 = vld [vmem:[%s6331_s1 + $0xba0] sm:$0xff]  ;;  %v420_v2 = vld [vmem:[%s6331_s1 + $0x2a8] sm:$0xff] }
   0xf   : > { %793 = vmatpush.msra.mxu3 %v713_v5  ;;  %v413_v6 = vld [vmem:[%s6331_s1 + $0x270] sm:$0xff]  ;;  %774 = vmatpush.msra.mxu2 %v611_v4  ;;  %v407_v11 = vld [vmem:[%s6331_s1 + $0x240] sm:$0xff]  ;;  %v522_v3 = vld [vmem:[%s6331_s1 + $0x5d8] sm:$0xff] }
  0x10   : > { %v605_v8 = vld [vmem:[%s6331_s1 + $0x870] sm:$0xff]  ;;  %754 = vmatpush.msra.mxu1 %v515_v7  ;;  %v599_v12 = vld [vmem:[%s6331_s1 + $0x840] sm:$0xff]  ;;  %735 = vmatpush.msra.mxu0 %v413_v6  ;;  %v612_v4 = vld [vmem:[%s6331_s1 + $0x8a8] sm:$0xff] }
  0x11   : > { %v509_v10 = vld [vmem:[%s6331_s1 + $0x570] sm:$0xff]  ;;  %794 = vmatpush.msra.mxu3 %v707_v9  ;;  %775 = vmatpush.msra.mxu2 %v605_v8  ;;  %v503_v14 = vld [vmem:[%s6331_s1 + $0x540] sm:$0xff]  ;;  %v714_v5 = vld [vmem:[%s6331_s1 + $0xbd8] sm:$0xff] }
  0x12   : > { %v701_v13 = vld [vmem:[%s6331_s1 + $0xb70] sm:$0xff]  ;;  %v695_v15 = vld [vmem:[%s6331_s1 + $0xb40] sm:$0xff]  ;;  %755 = vmatpush.msra.mxu1 %v509_v10  ;;  %736 = vmatpush.msra.mxu0 %v407_v11  ;;  %v414_v6 = vld [vmem:[%s6331_s1 + $0x278] sm:$0xff] }
  0x13   : > { %795 = vmatpush.msra.mxu3 %v701_v13  ;;  %v401_v16 = vld [vmem:[%s6331_s1 + $0x210] sm:$0xff]  ;;  %776 = vmatpush.msra.mxu2 %v599_v12  ;;  %v395_v20 = vld [vmem:[%s6331_s1 + $0x1e0] sm:$0xff]  ;;  %v516_v7 = vld [vmem:[%s6331_s1 + $0x5a8] sm:$0xff] }
  0x14   : > { %v593_v17 = vld [vmem:[%s6331_s1 + $0x810] sm:$0xff]  ;;  %756 = vmatpush.msra.mxu1 %v503_v14  ;;  %v587_v21 = vld [vmem:[%s6331_s1 + $0x7e0] sm:$0xff]  ;;  %737 = vmatpush.msra.mxu0 %v401_v16  ;;  %v606_v8 = vld [vmem:[%s6331_s1 + $0x878] sm:$0xff] }
  0x15   : > { %v497_v18 = vld [vmem:[%s6331_s1 + $0x510] sm:$0xff]  ;;  %796 = vmatpush.msra.mxu3 %v695_v15  ;;  %777 = vmatpush.msra.mxu2 %v593_v17  ;;  %v491_v22 = vld [vmem:[%s6331_s1 + $0x4e0] sm:$0xff]  ;;  %v708_v9 = vld [vmem:[%s6331_s1 + $0xba8] sm:$0xff] }
  0x16   : > { %v689_v19 = vld [vmem:[%s6331_s1 + $0xb10] sm:$0xff]  ;;  %v683_v23 = vld [vmem:[%s6331_s1 + $0xae0] sm:$0xff]  ;;  %757 = vmatpush.msra.mxu1 %v497_v18  ;;  %738 = vmatpush.msra.mxu0 %v395_v20  ;;  %v408_v10 = vld [vmem:[%s6331_s1 + $0x248] sm:$0xff] }
  0x17   : > { %797 = vmatpush.msra.mxu3 %v689_v19  ;;  %v389_v24 = vld [vmem:[%s6331_s1 + $0x1b0] sm:$0xff]  ;;  %778 = vmatpush.msra.mxu2 %v587_v21  ;;  %v383_v28 = vld [vmem:[%s6331_s1 + $0x180] sm:$0xff]  ;;  %v510_v11 = vld [vmem:[%s6331_s1 + $0x578] sm:$0xff] }
  0x18   : > { %v581_v25 = vld [vmem:[%s6331_s1 + $0x7b0] sm:$0xff]  ;;  %758 = vmatpush.msra.mxu1 %v491_v22  ;;  %v575_v29 = vld [vmem:[%s6331_s1 + $0x780] sm:$0xff]  ;;  %739 = vmatpush.msra.mxu0 %v389_v24  ;;  %v600_v12 = vld [vmem:[%s6331_s1 + $0x848] sm:$0xff] }
  0x19   : > { %v485_v26 = vld [vmem:[%s6331_s1 + $0x4b0] sm:$0xff]  ;;  %798 = vmatpush.msra.mxu3 %v683_v23  ;;  %779 = vmatpush.msra.mxu2 %v581_v25  ;;  %v479_v30 = vld [vmem:[%s6331_s1 + $0x480] sm:$0xff]  ;;  %v702_v13 = vld [vmem:[%s6331_s1 + $0xb78] sm:$0xff] }
  0x1a   : > { %v677_v27 = vld [vmem:[%s6331_s1 + $0xab0] sm:$0xff]  ;;  %v671_v31 = vld [vmem:[%s6331_s1 + $0xa80] sm:$0xff]  ;;  %759 = vmatpush.msra.mxu1 %v485_v26  ;;  %740 = vmatpush.msra.mxu0 %v383_v28  ;;  %v402_v14 = vld [vmem:[%s6331_s1 + $0x218] sm:$0xff] }
  0x1b   : > { %799 = vmatpush.msra.mxu3 %v677_v27  ;;  %v377_v32 = vld [vmem:[%s6331_s1 + $0x150] sm:$0xff]  ;;  %780 = vmatpush.msra.mxu2 %v575_v29  ;;  %v371_v36 = vld [vmem:[%s6331_s1 + $0x120] sm:$0xff]  ;;  %v504_v15 = vld [vmem:[%s6331_s1 + $0x548] sm:$0xff] }
  0x1c   : > { %v569_v33 = vld [vmem:[%s6331_s1 + $0x750] sm:$0xff]  ;;  %760 = vmatpush.msra.mxu1 %v479_v30  ;;  %v563_v37 = vld [vmem:[%s6331_s1 + $0x720] sm:$0xff]  ;;  %741 = vmatpush.msra.mxu0 %v377_v32  ;;  %v594_v16 = vld [vmem:[%s6331_s1 + $0x818] sm:$0xff] }
  0x1d   : > { %v473_v34 = vld [vmem:[%s6331_s1 + $0x450] sm:$0xff]  ;;  %800 = vmatpush.msra.mxu3 %v671_v31  ;;  %781 = vmatpush.msra.mxu2 %v569_v33  ;;  %v467_v38 = vld [vmem:[%s6331_s1 + $0x420] sm:$0xff]  ;;  %v696_v17 = vld [vmem:[%s6331_s1 + $0xb48] sm:$0xff] }
  0x1e   : > { %v665_v35 = vld [vmem:[%s6331_s1 + $0xa50] sm:$0xff]  ;;  %v659_v39 = vld [vmem:[%s6331_s1 + $0xa20] sm:$0xff]  ;;  %761 = vmatpush.msra.mxu1 %v473_v34  ;;  %742 = vmatpush.msra.mxu0 %v371_v36  ;;  %v396_v18 = vld [vmem:[%s6331_s1 + $0x1e8] sm:$0xff] }
  0x1f   : > { %801 = vmatpush.msra.mxu3 %v665_v35  ;;  %v365_v40 = vld [vmem:[%s6331_s1 + $0xf0] sm:$0xff]  ;;  %782 = vmatpush.msra.mxu2 %v563_v37  ;;  %v359_v44 = vld [vmem:[%s6331_s1 + $0xc0] sm:$0xff]  ;;  %v498_v19 = vld [vmem:[%s6331_s1 + $0x518] sm:$0xff] }
  0x20   : > { %v557_v41 = vld [vmem:[%s6331_s1 + $0x6f0] sm:$0xff]  ;;  %762 = vmatpush.msra.mxu1 %v467_v38  ;;  %v551_v45 = vld [vmem:[%s6331_s1 + $0x6c0] sm:$0xff]  ;;  %743 = vmatpush.msra.mxu0 %v365_v40  ;;  %v588_v20 = vld [vmem:[%s6331_s1 + $0x7e8] sm:$0xff] }
  0x21   : > { %v461_v42 = vld [vmem:[%s6331_s1 + $0x3f0] sm:$0xff]  ;;  %802 = vmatpush.msra.mxu3 %v659_v39  ;;  %783 = vmatpush.msra.mxu2 %v557_v41  ;;  %v455_v46 = vld [vmem:[%s6331_s1 + $0x3c0] sm:$0xff]  ;;  %v690_v21 = vld [vmem:[%s6331_s1 + $0xb18] sm:$0xff] }
  0x22   : > { %v653_v43 = vld [vmem:[%s6331_s1 + $0x9f0] sm:$0xff]  ;;  %v647_v47 = vld [vmem:[%s6331_s1 + $0x9c0] sm:$0xff]  ;;  %763 = vmatpush.msra.mxu1 %v461_v42  ;;  %744 = vmatpush.msra.mxu0 %v359_v44  ;;  %v390_v22 = vld [vmem:[%s6331_s1 + $0x1b8] sm:$0xff] }
  0x23   : > { %803 = vmatpush.msra.mxu3 %v653_v43  ;;  %v353_v48 = vld [vmem:[%s6331_s1 + $0x90] sm:$0xff]  ;;  %784 = vmatpush.msra.mxu2 %v551_v45  ;;  %v347_v52 = vld [vmem:[%s6331_s1 + $0x60] sm:$0xff]  ;;  %v492_v23 = vld [vmem:[%s6331_s1 + $0x4e8] sm:$0xff] }
  0x24   : > { %v545_v49 = vld [vmem:[%s6331_s1 + $0x690] sm:$0xff]  ;;  %764 = vmatpush.msra.mxu1 %v455_v46  ;;  %v539_v53 = vld [vmem:[%s6331_s1 + $0x660] sm:$0xff]  ;;  %745 = vmatpush.msra.mxu0 %v353_v48  ;;  %v582_v24 = vld [vmem:[%s6331_s1 + $0x7b8] sm:$0xff] }
  0x25   : > { %v449_v50 = vld [vmem:[%s6331_s1 + $0x390] sm:$0xff]  ;;  %804 = vmatpush.msra.mxu3 %v647_v47  ;;  %785 = vmatpush.msra.mxu2 %v545_v49  ;;  %v443_v54 = vld [vmem:[%s6331_s1 + $0x360] sm:$0xff]  ;;  %v684_v25 = vld [vmem:[%s6331_s1 + $0xae8] sm:$0xff] }
  0x26   : > { %v641_v51 = vld [vmem:[%s6331_s1 + $0x990] sm:$0xff]  ;;  %v635_v55 = vld [vmem:[%s6331_s1 + $0x960] sm:$0xff]  ;;  %765 = vmatpush.msra.mxu1 %v449_v50  ;;  %746 = vmatpush.msra.mxu0 %v347_v52  ;;  %v384_v26 = vld [vmem:[%s6331_s1 + $0x188] sm:$0xff] }
  0x27   : > { %805 = vmatpush.msra.mxu3 %v641_v51  ;;  %v341_v56 = vld [vmem:[%s6331_s1 + $0x30] sm:$0xff]  ;;  %786 = vmatpush.msra.mxu2 %v539_v53  ;;  %v335_v60 = vld [vmem:[%s6331_s1] sm:$0xff]  ;;  %v486_v27 = vld [vmem:[%s6331_s1 + $0x4b8] sm:$0xff] }
  0x28   : > { %v533_v57 = vld [vmem:[%s6331_s1 + $0x630] sm:$0xff]  ;;  %766 = vmatpush.msra.mxu1 %v443_v54  ;;  %v527_v61 = vld [vmem:[%s6331_s1 + $0x600] sm:$0xff]  ;;  %747 = vmatpush.msra.mxu0 %v341_v56  ;;  %v576_v28 = vld [vmem:[%s6331_s1 + $0x788] sm:$0xff] }
  0x29   : > { %v437_v58 = vld [vmem:[%s6331_s1 + $0x330] sm:$0xff]  ;;  %806 = vmatpush.msra.mxu3 %v635_v55  ;;  %787 = vmatpush.msra.mxu2 %v533_v57  ;;  %v431_v0 = vld [vmem:[%s6331_s1 + $0x300] sm:$0xff]  ;;  %v678_v29 = vld [vmem:[%s6331_s1 + $0xab8] sm:$0xff] }
  0x2a   : > { %v629_v59 = vld [vmem:[%s6331_s1 + $0x930] sm:$0xff]  ;;  %767 = vmatpush.msra.mxu1 %v437_v58  ;;  %v623_v1 = vld [vmem:[%s6331_s1 + $0x900] sm:$0xff]  ;;  %748 = vmatpush.msra.mxu0 %v335_v60  ;;  %v378_v30 = vld [vmem:[%s6331_s1 + $0x158] sm:$0xff] }
  0x2b   : > { %807 = vmatpush.msra.mxu3 %v629_v59  ;;  %788 = vmatpush.msra.mxu2 %v527_v61  ;;  %v480_v31 = vld [vmem:[%s6331_s1 + $0x488] sm:$0xff]  ;;  %v570_v32 = vld [vmem:[%s6331_s1 + $0x758] sm:$0xff] }
  0x2c   : > { %813 = vmatpush.msrb.mxu0 %v426_v62  ;;  %768 = vmatpush.msra.mxu1 %v431_v0  ;;  %v672_v33 = vld [vmem:[%s6331_s1 + $0xa88] sm:$0xff]  ;;  %v474_v35 = vld [vmem:[%s6331_s1 + $0x458] sm:$0xff]  ;;  %v3338_v62 = vld [vmem:[%s3323_s12] sm:$0xff] }
  0x2d   : > { %853 = vmatpush.msrb.mxu2 %v618_v63  ;;  %808 = vmatpush.msra.mxu3 %v623_v1  ;;  %v372_v34 = vld [vmem:[%s6331_s1 + $0x128] sm:$0xff]  ;;  %v666_v37 = vld [vmem:[%s6331_s1 + $0xa58] sm:$0xff]  ;;  %v3341_v63 = vld [vmem:[%s3323_s12 + $0x10] sm:$0xff] }
  0x2e   : > { %814 = vmatpush.msrb.mxu0 %v420_v2  ;;  %833 = vmatpush.msrb.mxu1 %v522_v3  ;;  %v564_v36 = vld [vmem:[%s6331_s1 + $0x728] sm:$0xff]  ;;  %v366_v38 = vld [vmem:[%s6331_s1 + $0xf8] sm:$0xff]  ;;  %v427_v0 = vld [vmem:[%s6331_s1 + $0x2e0] sm:$0xff] }
  0x2f   : > { %854 = vmatpush.msrb.mxu2 %v612_v4  ;;  %873 = vmatpush.msrb.mxu3 %v714_v5  ;;  %v468_v39 = vld [vmem:[%s6331_s1 + $0x428] sm:$0xff]  ;;  %v558_v40 = vld [vmem:[%s6331_s1 + $0x6f8] sm:$0xff]  ;;  %v619_v1 = vld [vmem:[%s6331_s1 + $0x8e0] sm:$0xff] }
  0x30   : > { %815 = vmatpush.msrb.mxu0 %v414_v6  ;;  %834 = vmatpush.msrb.mxu1 %v516_v7  ;;  %v660_v41 = vld [vmem:[%s6331_s1 + $0xa28] sm:$0xff]  ;;  %v462_v43 = vld [vmem:[%s6331_s1 + $0x3f8] sm:$0xff]  ;;  %v421_v6 = vld [vmem:[%s6331_s1 + $0x2b0] sm:$0xff] }
  0x31   : > { %855 = vmatpush.msrb.mxu2 %v606_v8  ;;  %874 = vmatpush.msrb.mxu3 %v708_v9  ;;  %v360_v42 = vld [vmem:[%s6331_s1 + $0xc8] sm:$0xff]  ;;  %v654_v45 = vld [vmem:[%s6331_s1 + $0x9f8] sm:$0xff]  ;;  %v523_v7 = vld [vmem:[%s6331_s1 + $0x5e0] sm:$0xff] }
  0x32   : > { %816 = vmatpush.msrb.mxu0 %v408_v10  ;;  %835 = vmatpush.msrb.mxu1 %v510_v11  ;;  %v552_v44 = vld [vmem:[%s6331_s1 + $0x6c8] sm:$0xff]  ;;  %v354_v46 = vld [vmem:[%s6331_s1 + $0x98] sm:$0xff]  ;;  %v613_v8 = vld [vmem:[%s6331_s1 + $0x8b0] sm:$0xff] }
  0x33   : > { %856 = vmatpush.msrb.mxu2 %v600_v12  ;;  %875 = vmatpush.msrb.mxu3 %v702_v13  ;;  %v456_v47 = vld [vmem:[%s6331_s1 + $0x3c8] sm:$0xff]  ;;  %v546_v48 = vld [vmem:[%s6331_s1 + $0x698] sm:$0xff]  ;;  %v715_v9 = vld [vmem:[%s6331_s1 + $0xbe0] sm:$0xff] }
  0x34   : > { %817 = vmatpush.msrb.mxu0 %v402_v14  ;;  %836 = vmatpush.msrb.mxu1 %v504_v15  ;;  %v648_v49 = vld [vmem:[%s6331_s1 + $0x9c8] sm:$0xff]  ;;  %v450_v51 = vld [vmem:[%s6331_s1 + $0x398] sm:$0xff]  ;;  %v415_v10 = vld [vmem:[%s6331_s1 + $0x280] sm:$0xff] }
  0x35   : > { %857 = vmatpush.msrb.mxu2 %v594_v16  ;;  %876 = vmatpush.msrb.mxu3 %v696_v17  ;;  %v348_v50 = vld [vmem:[%s6331_s1 + $0x68] sm:$0xff]  ;;  %v642_v53 = vld [vmem:[%s6331_s1 + $0x998] sm:$0xff]  ;;  %v517_v11 = vld [vmem:[%s6331_s1 + $0x5b0] sm:$0xff] }
  0x36   : > { %818 = vmatpush.msrb.mxu0 %v396_v18  ;;  %837 = vmatpush.msrb.mxu1 %v498_v19  ;;  %v540_v52 = vld [vmem:[%s6331_s1 + $0x668] sm:$0xff]  ;;  %v342_v54 = vld [vmem:[%s6331_s1 + $0x38] sm:$0xff]  ;;  %v607_v12 = vld [vmem:[%s6331_s1 + $0x880] sm:$0xff] }
  0x37   : > { %858 = vmatpush.msrb.mxu2 %v588_v20  ;;  %877 = vmatpush.msrb.mxu3 %v690_v21  ;;  %v444_v55 = vld [vmem:[%s6331_s1 + $0x368] sm:$0xff]  ;;  %v534_v56 = vld [vmem:[%s6331_s1 + $0x638] sm:$0xff]  ;;  %v709_v13 = vld [vmem:[%s6331_s1 + $0xbb0] sm:$0xff] }
  0x38   : > { %819 = vmatpush.msrb.mxu0 %v390_v22  ;;  %838 = vmatpush.msrb.mxu1 %v492_v23  ;;  %v636_v57 = vld [vmem:[%s6331_s1 + $0x968] sm:$0xff]  ;;  %v438_v59 = vld [vmem:[%s6331_s1 + $0x338] sm:$0xff]  ;;  %v409_v14 = vld [vmem:[%s6331_s1 + $0x250] sm:$0xff] }
  0x39   : > { %859 = vmatpush.msrb.mxu2 %v582_v24  ;;  %878 = vmatpush.msrb.mxu3 %v684_v25  ;;  %v336_v58 = vld [vmem:[%s6331_s1 + $0x8] sm:$0xff]  ;;  %v630_v61 = vld [vmem:[%s6331_s1 + $0x938] sm:$0xff]  ;;  %v511_v15 = vld [vmem:[%s6331_s1 + $0x580] sm:$0xff] }
  0x3a   : > { %820 = vmatpush.msrb.mxu0 %v384_v26  ;;  %839 = vmatpush.msrb.mxu1 %v486_v27  ;;  %v528_v60 = vld [vmem:[%s6331_s1 + $0x608] sm:$0xff]  ;;  %v3361_v5 = vld [vmem:[%s3323_s12 + $0x18] sm:$0xff]  ;;  %v601_v16 = vld [vmem:[%s6331_s1 + $0x850] sm:$0xff] }
  0x3b   : > { %860 = vmatpush.msrb.mxu2 %v576_v28  ;;  %879 = vmatpush.msrb.mxu3 %v678_v29  ;;  %v432_v2 = vld [vmem:[%s6331_s1 + $0x308] sm:$0xff]  ;;  %v703_v17 = vld [vmem:[%s6331_s1 + $0xb80] sm:$0xff]  ;;  %v505_v19 = vld [vmem:[%s6331_s1 + $0x550] sm:$0xff] }
  0x3c   : > { %821 = vmatpush.msrb.mxu0 %v378_v30  ;;  %840 = vmatpush.msrb.mxu1 %v480_v31  ;;  %v624_v3 = vld [vmem:[%s6331_s1 + $0x908] sm:$0xff]  ;;  %v403_v18 = vld [vmem:[%s6331_s1 + $0x220] sm:$0xff]  ;;  %v697_v21 = vld [vmem:[%s6331_s1 + $0xb50] sm:$0xff] }
  0x3d   : > { %861 = vmatpush.msrb.mxu2 %v570_v32  ;;  %880 = vmatpush.msrb.mxu3 %v672_v33  ;;  %v3358_v4 = vld [vmem:[%s3323_s12 + $0x8] sm:$0xff]  ;;  %v595_v20 = vld [vmem:[%s6331_s1 + $0x820] sm:$0xff]  ;;  %v397_v22 = vld [vmem:[%s6331_s1 + $0x1f0] sm:$0xff] }
  0x3e   : > { %822 = vmatpush.msrb.mxu0 %v372_v34  ;;  %841 = vmatpush.msrb.mxu1 %v474_v35  ;;  %v499_v23 = vld [vmem:[%s6331_s1 + $0x520] sm:$0xff]  ;;  %v589_v24 = vld [vmem:[%s6331_s1 + $0x7f0] sm:$0xff] }
  0x3f   : > { %862 = vmatpush.msrb.mxu2 %v564_v36  ;;  %881 = vmatpush.msrb.mxu3 %v666_v37  ;;  %v691_v25 = vld [vmem:[%s6331_s1 + $0xb20] sm:$0xff]  ;;  %v493_v27 = vld [vmem:[%s6331_s1 + $0x4f0] sm:$0xff] }
  0x40   : > { %823 = vmatpush.msrb.mxu0 %v366_v38  ;;  %842 = vmatpush.msrb.mxu1 %v468_v39  ;;  %v391_v26 = vld [vmem:[%s6331_s1 + $0x1c0] sm:$0xff]  ;;  %v685_v29 = vld [vmem:[%s6331_s1 + $0xaf0] sm:$0xff] }
  0x41   : > { %863 = vmatpush.msrb.mxu2 %v558_v40  ;;  %882 = vmatpush.msrb.mxu3 %v660_v41  ;;  %v583_v28 = vld [vmem:[%s6331_s1 + $0x7c0] sm:$0xff]  ;;  %v385_v30 = vld [vmem:[%s6331_s1 + $0x190] sm:$0xff] }
  0x42   : > { %824 = vmatpush.msrb.mxu0 %v360_v42  ;;  %843 = vmatpush.msrb.mxu1 %v462_v43  ;;  %v487_v31 = vld [vmem:[%s6331_s1 + $0x4c0] sm:$0xff]  ;;  %v577_v32 = vld [vmem:[%s6331_s1 + $0x790] sm:$0xff] }
  0x43   : > { %864 = vmatpush.msrb.mxu2 %v552_v44  ;;  %883 = vmatpush.msrb.mxu3 %v654_v45  ;;  %v679_v33 = vld [vmem:[%s6331_s1 + $0xac0] sm:$0xff]  ;;  %v481_v35 = vld [vmem:[%s6331_s1 + $0x490] sm:$0xff] }
  0x44   : > { %825 = vmatpush.msrb.mxu0 %v354_v46  ;;  %844 = vmatpush.msrb.mxu1 %v456_v47  ;;  %v379_v34 = vld [vmem:[%s6331_s1 + $0x160] sm:$0xff]  ;;  %v673_v37 = vld [vmem:[%s6331_s1 + $0xa90] sm:$0xff] }
  0x45   : > { %865 = vmatpush.msrb.mxu2 %v546_v48  ;;  %884 = vmatpush.msrb.mxu3 %v648_v49  ;;  %v571_v36 = vld [vmem:[%s6331_s1 + $0x760] sm:$0xff]  ;;  %v373_v38 = vld [vmem:[%s6331_s1 + $0x130] sm:$0xff] }
  0x46   : > { %826 = vmatpush.msrb.mxu0 %v348_v50  ;;  %845 = vmatpush.msrb.mxu1 %v450_v51  ;;  %v475_v39 = vld [vmem:[%s6331_s1 + $0x460] sm:$0xff]  ;;  %v565_v40 = vld [vmem:[%s6331_s1 + $0x730] sm:$0xff] }
  0x47   : > { %866 = vmatpush.msrb.mxu2 %v540_v52  ;;  %885 = vmatpush.msrb.mxu3 %v642_v53  ;;  %v667_v41 = vld [vmem:[%s6331_s1 + $0xa60] sm:$0xff]  ;;  %v469_v43 = vld [vmem:[%s6331_s1 + $0x430] sm:$0xff] }
  0x48   : > { %827 = vmatpush.msrb.mxu0 %v342_v54  ;;  %846 = vmatpush.msrb.mxu1 %v444_v55  ;;  %v367_v42 = vld [vmem:[%s6331_s1 + $0x100] sm:$0xff]  ;;  %v661_v45 = vld [vmem:[%s6331_s1 + $0xa30] sm:$0xff] }
  0x49   : > { %867 = vmatpush.msrb.mxu2 %v534_v56  ;;  %886 = vmatpush.msrb.mxu3 %v636_v57  ;;  %v559_v44 = vld [vmem:[%s6331_s1 + $0x700] sm:$0xff]  ;;  %v361_v46 = vld [vmem:[%s6331_s1 + $0xd0] sm:$0xff] }
  0x4a   : > { %828 = vmatpush.msrb.mxu0 %v336_v58  ;;  %847 = vmatpush.msrb.mxu1 %v438_v59  ;;  %v463_v47 = vld [vmem:[%s6331_s1 + $0x400] sm:$0xff]  ;;  %v553_v48 = vld [vmem:[%s6331_s1 + $0x6d0] sm:$0xff] }
  0x4b   : > { %868 = vmatpush.msrb.mxu2 %v528_v60  ;;  %887 = vmatpush.msrb.mxu3 %v630_v61  ;;  %v655_v49 = vld [vmem:[%s6331_s1 + $0xa00] sm:$0xff]  ;;  %v457_v51 = vld [vmem:[%s6331_s1 + $0x3d0] sm:$0xff] }
  0x4c   : > { %749 = vmatmul.f32.vlgmr.msra.gmra.mxu0 %v3338_v62  ;;  %789 = vmatmul.f32.vlgmr.msra.gmra.mxu2 %v3341_v63  ;;  %v355_v50 = vld [vmem:[%s6331_s1 + $0xa0] sm:$0xff]  ;;  %v649_v53 = vld [vmem:[%s6331_s1 + $0x9d0] sm:$0xff] }
  0x4d   : > { %893 = vmatpush.msra.mxu0 %v427_v0  ;;  %933 = vmatpush.msra.mxu2 %v619_v1  ;;  %v547_v52 = vld [vmem:[%s6331_s1 + $0x6a0] sm:$0xff]  ;;  %v349_v54 = vld [vmem:[%s6331_s1 + $0x70] sm:$0xff] }
  0x4e   : > { %848 = vmatpush.msrb.mxu1 %v432_v2  ;;  %888 = vmatpush.msrb.mxu3 %v624_v3  ;;  %v451_v55 = vld [vmem:[%s6331_s1 + $0x3a0] sm:$0xff]  ;;  %v541_v56 = vld [vmem:[%s6331_s1 + $0x670] sm:$0xff] }
  0x4f   : > { %769 = vmatmul.f32.vlgmr.msra.gmra.mxu1 %v3358_v4  ;;  %809 = vmatmul.f32.vlgmr.msra.gmra.mxu3 %v3361_v5  ;;  %v643_v57 = vld [vmem:[%s6331_s1 + $0x9a0] sm:$0xff]  ;;  %v445_v59 = vld [vmem:[%s6331_s1 + $0x370] sm:$0xff] }
  0x50   : > { %894 = vmatpush.msra.mxu0 %v421_v6  ;;  %913 = vmatpush.msra.mxu1 %v523_v7  ;;  %v343_v58 = vld [vmem:[%s6331_s1 + $0x40] sm:$0xff]  ;;  %v637_v61 = vld [vmem:[%s6331_s1 + $0x970] sm:$0xff]  ;;  %v428_v6 = vld [vmem:[%s6331_s1 + $0x2e8] sm:$0xff] }
  0x51   : > { %934 = vmatpush.msra.mxu2 %v613_v8  ;;  %953 = vmatpush.msra.mxu3 %v715_v9  ;;  %v535_v60 = vld [vmem:[%s6331_s1 + $0x640] sm:$0xff]  ;;  %v337_v0 = vld [vmem:[%s6331_s1 + $0x10] sm:$0xff]  ;;  %v620_v7 = vld [vmem:[%s6331_s1 + $0x8e8] sm:$0xff] }
  0x52   : > { %895 = vmatpush.msra.mxu0 %v415_v10  ;;  %914 = vmatpush.msra.mxu1 %v517_v11  ;;  %v439_v1 = vld [vmem:[%s6331_s1 + $0x340] sm:$0xff]  ;;  %v529_v2 = vld [vmem:[%s6331_s1 + $0x610] sm:$0xff]  ;;  %v422_v10 = vld [vmem:[%s6331_s1 + $0x2b8] sm:$0xff] }
  0x53   : > { %935 = vmatpush.msra.mxu2 %v607_v12  ;;  %954 = vmatpush.msra.mxu3 %v709_v13  ;;  %v631_v3 = vld [vmem:[%s6331_s1 + $0x940] sm:$0xff]  ;;  %v433_v8 = vld [vmem:[%s6331_s1 + $0x310] sm:$0xff]  ;;  %v524_v11 = vld [vmem:[%s6331_s1 + $0x5e8] sm:$0xff] }
  0x54   : > { %896 = vmatpush.msra.mxu0 %v409_v14  ;;  %915 = vmatpush.msra.mxu1 %v511_v15  ;;  %v625_v9 = vld [vmem:[%s6331_s1 + $0x910] sm:$0xff]  ;;  %v614_v12 = vld [vmem:[%s6331_s1 + $0x8b8] sm:$0xff]  ;;  %v716_v13 = vld [vmem:[%s6331_s1 + $0xbe8] sm:$0xff] }
  0x55   : > { %936 = vmatpush.msra.mxu2 %v601_v16  ;;  %955 = vmatpush.msra.mxu3 %v703_v17  ;;  %v416_v14 = vld [vmem:[%s6331_s1 + $0x288] sm:$0xff]  ;;  %v518_v15 = vld [vmem:[%s6331_s1 + $0x5b8] sm:$0xff] }
  0x56   : > { %897 = vmatpush.msra.mxu0 %v403_v18  ;;  %916 = vmatpush.msra.mxu1 %v505_v19  ;;  %v608_v16 = vld [vmem:[%s6331_s1 + $0x888] sm:$0xff]  ;;  %v710_v17 = vld [vmem:[%s6331_s1 + $0xbb8] sm:$0xff] }
  0x57   : > { %937 = vmatpush.msra.mxu2 %v595_v20  ;;  %956 = vmatpush.msra.mxu3 %v697_v21  ;;  %v410_v18 = vld [vmem:[%s6331_s1 + $0x258] sm:$0xff]  ;;  %v512_v19 = vld [vmem:[%s6331_s1 + $0x588] sm:$0xff] }
  0x58   : > { %898 = vmatpush.msra.mxu0 %v397_v22  ;;  %917 = vmatpush.msra.mxu1 %v499_v23  ;;  %v602_v20 = vld [vmem:[%s6331_s1 + $0x858] sm:$0xff]  ;;  %v704_v21 = vld [vmem:[%s6331_s1 + $0xb88] sm:$0xff] }
  0x59   : > { %938 = vmatpush.msra.mxu2 %v589_v24  ;;  %957 = vmatpush.msra.mxu3 %v691_v25  ;;  %v404_v22 = vld [vmem:[%s6331_s1 + $0x228] sm:$0xff]  ;;  %v506_v23 = vld [vmem:[%s6331_s1 + $0x558] sm:$0xff] }
  0x5a   : > { %899 = vmatpush.msra.mxu0 %v391_v26  ;;  %918 = vmatpush.msra.mxu1 %v493_v27  ;;  %v596_v24 = vld [vmem:[%s6331_s1 + $0x828] sm:$0xff]  ;;  %v698_v25 = vld [vmem:[%s6331_s1 + $0xb58] sm:$0xff] }
  0x5b   : > { %939 = vmatpush.msra.mxu2 %v583_v28  ;;  %958 = vmatpush.msra.mxu3 %v685_v29  ;;  %v398_v26 = vld [vmem:[%s6331_s1 + $0x1f8] sm:$0xff]  ;;  %v500_v27 = vld [vmem:[%s6331_s1 + $0x528] sm:$0xff] }
  0x5c   : > { %900 = vmatpush.msra.mxu0 %v385_v30  ;;  %919 = vmatpush.msra.mxu1 %v487_v31  ;;  %v590_v28 = vld [vmem:[%s6331_s1 + $0x7f8] sm:$0xff]  ;;  %v692_v29 = vld [vmem:[%s6331_s1 + $0xb28] sm:$0xff] }
  0x5d   : > { %940 = vmatpush.msra.mxu2 %v577_v32  ;;  %959 = vmatpush.msra.mxu3 %v679_v33  ;;  %v392_v30 = vld [vmem:[%s6331_s1 + $0x1c8] sm:$0xff]  ;;  %v494_v31 = vld [vmem:[%s6331_s1 + $0x4f8] sm:$0xff] }
  0x5e   : > { %901 = vmatpush.msra.mxu0 %v379_v34  ;;  %920 = vmatpush.msra.mxu1 %v481_v35  ;;  %v584_v32 = vld [vmem:[%s6331_s1 + $0x7c8] sm:$0xff]  ;;  %v686_v33 = vld [vmem:[%s6331_s1 + $0xaf8] sm:$0xff] }
  0x5f   : > { %941 = vmatpush.msra.mxu2 %v571_v36  ;;  %960 = vmatpush.msra.mxu3 %v673_v37  ;;  %v386_v34 = vld [vmem:[%s6331_s1 + $0x198] sm:$0xff]  ;;  %v488_v35 = vld [vmem:[%s6331_s1 + $0x4c8] sm:$0xff] }
  0x60   : > { %902 = vmatpush.msra.mxu0 %v373_v38  ;;  %921 = vmatpush.msra.mxu1 %v475_v39  ;;  %v578_v36 = vld [vmem:[%s6331_s1 + $0x798] sm:$0xff]  ;;  %v680_v37 = vld [vmem:[%s6331_s1 + $0xac8] sm:$0xff] }
  0x61   : > { %942 = vmatpush.msra.mxu2 %v565_v40  ;;  %961 = vmatpush.msra.mxu3 %v667_v41  ;;  %v380_v38 = vld [vmem:[%s6331_s1 + $0x168] sm:$0xff]  ;;  %v482_v39 = vld [vmem:[%s6331_s1 + $0x498] sm:$0xff] }
  0x62   : > { %869 = vmatmul.f32.vlgmr.msrb.gmra.mxu2 %v3341_v63  ;;  %903 = vmatpush.msra.mxu0 %v367_v42  ;;  %v572_v40 = vld [vmem:[%s6331_s1 + $0x768] sm:$0xff]  ;;  %v674_v41 = vld [vmem:[%s6331_s1 + $0xa98] sm:$0xff] }
  0x63   : > { %922 = vmatpush.msra.mxu1 %v469_v43  ;;  %943 = vmatpush.msra.mxu2 %v559_v44  ;;  %v374_v42 = vld [vmem:[%s6331_s1 + $0x138] sm:$0xff]  ;;  %v476_v43 = vld [vmem:[%s6331_s1 + $0x468] sm:$0xff] }
  0x64   : > { %962 = vmatpush.msra.mxu3 %v661_v45  ;;  %829 = vmatmul.f32.vlgmr.msrb.gmra.mxu0 %v3338_v62  ;;  %v566_v44 = vld [vmem:[%s6331_s1 + $0x738] sm:$0xff]  ;;  %v668_v45 = vld [vmem:[%s6331_s1 + $0xa68] sm:$0xff] }
  0x65   : > { %889 = vmatmul.f32.vlgmr.msrb.gmra.mxu3 %v3361_v5  ;;  %904 = vmatpush.msra.mxu0 %v361_v46  ;;  %v368_v46 = vld [vmem:[%s6331_s1 + $0x108] sm:$0xff] }
  0x66   : > { %923 = vmatpush.msra.mxu1 %v463_v47  ;;  %944 = vmatpush.msra.mxu2 %v553_v48  ;;  %v470_v47 = vld [vmem:[%s6331_s1 + $0x438] sm:$0xff]  ;;  %v560_v48 = vld [vmem:[%s6331_s1 + $0x708] sm:$0xff] }
  0x67   : > { %963 = vmatpush.msra.mxu3 %v655_v49  ;;  %849 = vmatmul.f32.vlgmr.msrb.gmra.mxu1 %v3358_v4  ;;  %v662_v49 = vld [vmem:[%s6331_s1 + $0xa38] sm:$0xff] }
  0x68   : > { %905 = vmatpush.msra.mxu0 %v355_v50  ;;  %924 = vmatpush.msra.mxu1 %v457_v51  ;;  %v362_v50 = vld [vmem:[%s6331_s1 + $0xd8] sm:$0xff]  ;;  %v464_v51 = vld [vmem:[%s6331_s1 + $0x408] sm:$0xff] }
  0x69   : > { %945 = vmatpush.msra.mxu2 %v547_v52  ;;  %964 = vmatpush.msra.mxu3 %v649_v53  ;;  %v554_v52 = vld [vmem:[%s6331_s1 + $0x6d8] sm:$0xff]  ;;  %v656_v53 = vld [vmem:[%s6331_s1 + $0xa08] sm:$0xff] }
  0x6a   : > { %906 = vmatpush.msra.mxu0 %v349_v54  ;;  %925 = vmatpush.msra.mxu1 %v451_v55  ;;  %v356_v54 = vld [vmem:[%s6331_s1 + $0xa8] sm:$0xff]  ;;  %v458_v55 = vld [vmem:[%s6331_s1 + $0x3d8] sm:$0xff] }
  0x6b   : > { %946 = vmatpush.msra.mxu2 %v541_v56  ;;  %965 = vmatpush.msra.mxu3 %v643_v57  ;;  %v548_v56 = vld [vmem:[%s6331_s1 + $0x6a8] sm:$0xff]  ;;  %v650_v57 = vld [vmem:[%s6331_s1 + $0x9d8] sm:$0xff] }
  0x6c   : > { %907 = vmatpush.msra.mxu0 %v343_v58  ;;  %926 = vmatpush.msra.mxu1 %v445_v59  ;;  %v350_v58 = vld [vmem:[%s6331_s1 + $0x78] sm:$0xff]  ;;  %v452_v59 = vld [vmem:[%s6331_s1 + $0x3a8] sm:$0xff] }
  0x6d   : > { %947 = vmatpush.msra.mxu2 %v535_v60  ;;  %966 = vmatpush.msra.mxu3 %v637_v61  ;;  %v542_v60 = vld [vmem:[%s6331_s1 + $0x678] sm:$0xff]  ;;  %v644_v61 = vld [vmem:[%s6331_s1 + $0x9a8] sm:$0xff] }
  0x6e   : > { %908 = vmatpush.msra.mxu0 %v337_v0  ;;  %927 = vmatpush.msra.mxu1 %v439_v1  ;;  %v344_v0 = vld [vmem:[%s6331_s1 + $0x48] sm:$0xff]  ;;  %v446_v1 = vld [vmem:[%s6331_s1 + $0x378] sm:$0xff] }
  0x6f   : > { %948 = vmatpush.msra.mxu2 %v529_v2  ;;  %967 = vmatpush.msra.mxu3 %v631_v3  ;;  %v536_v2 = vld [vmem:[%s6331_s1 + $0x648] sm:$0xff]  ;;  %v638_v3 = vld [vmem:[%s6331_s1 + $0x978] sm:$0xff] }
  0x70   : > { %949 = vmatmul.f32.vlgmr.msra.gmra.mxu2 %v3341_v63  ;;  %973 = vmatpush.msrb.mxu0 %v428_v6  ;;  %v338_v6 = vld [vmem:[%s6331_s1 + $0x18] sm:$0xff] }
  0x71   : > { %1013 = vmatpush.msrb.mxu2 %v620_v7  ;;  %928 = vmatpush.msra.mxu1 %v433_v8  ;;  %v440_v7 = vld [vmem:[%s6331_s1 + $0x348] sm:$0xff]  ;;  %v530_v8 = vld [vmem:[%s6331_s1 + $0x618] sm:$0xff] }
  0x72   : > { %968 = vmatpush.msra.mxu3 %v625_v9  ;;  %909 = vmatmul.f32.vlgmr.msra.gmra.mxu0 %v3338_v62  ;;  %v632_v9 = vld [vmem:[%s6331_s1 + $0x948] sm:$0xff] }
  0x73   : > { %969 = vmatmul.f32.vlgmr.msra.gmra.mxu3 %v3361_v5  ;;  %974 = vmatpush.msrb.mxu0 %v422_v10  ;;  %v429_v10 = vld [vmem:[%s6331_s1 + $0x2f0] sm:$0xff] }
  0x74   : > { %993 = vmatpush.msrb.mxu1 %v524_v11  ;;  %1014 = vmatpush.msrb.mxu2 %v614_v12  ;;  %v621_v11 = vld [vmem:[%s6331_s1 + $0x8f0] sm:$0xff]  ;;  %v434_v12 = vld [vmem:[%s6331_s1 + $0x318] sm:$0xff] }
  0x75   : > { %1033 = vmatpush.msrb.mxu3 %v716_v13  ;;  %929 = vmatmul.f32.vlgmr.msra.gmra.mxu1 %v3358_v4  ;;  %v626_v13 = vld [vmem:[%s6331_s1 + $0x918] sm:$0xff] }
  0x76   : > { %975 = vmatpush.msrb.mxu0 %v416_v14  ;;  %994 = vmatpush.msrb.mxu1 %v518_v15  ;;  %v423_v14 = vld [vmem:[%s6331_s1 + $0x2c0] sm:$0xff]  ;;  %v525_v15 = vld [vmem:[%s6331_s1 + $0x5f0] sm:$0xff] }
  0x77   : > { %1015 = vmatpush.msrb.mxu2 %v608_v16  ;;  %1034 = vmatpush.msrb.mxu3 %v710_v17  ;;  %v615_v16 = vld [vmem:[%s6331_s1 + $0x8c0] sm:$0xff]  ;;  %v717_v17 = vld [vmem:[%s6331_s1 + $0xbf0] sm:$0xff] }
  0x78   : > { %976 = vmatpush.msrb.mxu0 %v410_v18  ;;  %995 = vmatpush.msrb.mxu1 %v512_v19  ;;  %v417_v18 = vld [vmem:[%s6331_s1 + $0x290] sm:$0xff]  ;;  %v519_v19 = vld [vmem:[%s6331_s1 + $0x5c0] sm:$0xff] }
  0x79   : > { %1016 = vmatpush.msrb.mxu2 %v602_v20  ;;  %1035 = vmatpush.msrb.mxu3 %v704_v21  ;;  %v609_v20 = vld [vmem:[%s6331_s1 + $0x890] sm:$0xff]  ;;  %v711_v21 = vld [vmem:[%s6331_s1 + $0xbc0] sm:$0xff] }
  0x7a   : > { %977 = vmatpush.msrb.mxu0 %v404_v22  ;;  %996 = vmatpush.msrb.mxu1 %v506_v23  ;;  %v411_v22 = vld [vmem:[%s6331_s1 + $0x260] sm:$0xff]  ;;  %v513_v23 = vld [vmem:[%s6331_s1 + $0x590] sm:$0xff] }
  0x7b   : > { %1017 = vmatpush.msrb.mxu2 %v596_v24  ;;  %1036 = vmatpush.msrb.mxu3 %v698_v25  ;;  %v603_v24 = vld [vmem:[%s6331_s1 + $0x860] sm:$0xff]  ;;  %v705_v25 = vld [vmem:[%s6331_s1 + $0xb90] sm:$0xff] }
  0x7c   : > { %978 = vmatpush.msrb.mxu0 %v398_v26  ;;  %997 = vmatpush.msrb.mxu1 %v500_v27  ;;  %v405_v26 = vld [vmem:[%s6331_s1 + $0x230] sm:$0xff]  ;;  %v507_v27 = vld [vmem:[%s6331_s1 + $0x560] sm:$0xff] }
  0x7d   : > { %1018 = vmatpush.msrb.mxu2 %v590_v28  ;;  %1037 = vmatpush.msrb.mxu3 %v692_v29  ;;  %v597_v28 = vld [vmem:[%s6331_s1 + $0x830] sm:$0xff]  ;;  %v699_v29 = vld [vmem:[%s6331_s1 + $0xb60] sm:$0xff] }
  0x7e   : > { %979 = vmatpush.msrb.mxu0 %v392_v30  ;;  %998 = vmatpush.msrb.mxu1 %v494_v31  ;;  %v399_v30 = vld [vmem:[%s6331_s1 + $0x200] sm:$0xff]  ;;  %v501_v31 = vld [vmem:[%s6331_s1 + $0x530] sm:$0xff] }
  0x7f   : > { %1019 = vmatpush.msrb.mxu2 %v584_v32  ;;  %1038 = vmatpush.msrb.mxu3 %v686_v33  ;;  %v591_v32 = vld [vmem:[%s6331_s1 + $0x800] sm:$0xff]  ;;  %v693_v33 = vld [vmem:[%s6331_s1 + $0xb30] sm:$0xff] }
  0x80   : > { %980 = vmatpush.msrb.mxu0 %v386_v34  ;;  %999 = vmatpush.msrb.mxu1 %v488_v35  ;;  %v393_v34 = vld [vmem:[%s6331_s1 + $0x1d0] sm:$0xff]  ;;  %v495_v35 = vld [vmem:[%s6331_s1 + $0x500] sm:$0xff] }
  0x81   : > { %1020 = vmatpush.msrb.mxu2 %v578_v36  ;;  %1039 = vmatpush.msrb.mxu3 %v680_v37  ;;  %v585_v36 = vld [vmem:[%s6331_s1 + $0x7d0] sm:$0xff]  ;;  %v687_v37 = vld [vmem:[%s6331_s1 + $0xb00] sm:$0xff] }
  0x82   : > { %981 = vmatpush.msrb.mxu0 %v380_v38  ;;  %1000 = vmatpush.msrb.mxu1 %v482_v39  ;;  %v387_v38 = vld [vmem:[%s6331_s1 + $0x1a0] sm:$0xff]  ;;  %v489_v39 = vld [vmem:[%s6331_s1 + $0x4d0] sm:$0xff] }
  0x83   : > { %1021 = vmatpush.msrb.mxu2 %v572_v40  ;;  %1040 = vmatpush.msrb.mxu3 %v674_v41  ;;  %v579_v40 = vld [vmem:[%s6331_s1 + $0x7a0] sm:$0xff]  ;;  %v681_v41 = vld [vmem:[%s6331_s1 + $0xad0] sm:$0xff] }
  0x84   : > { %982 = vmatpush.msrb.mxu0 %v374_v42  ;;  %1001 = vmatpush.msrb.mxu1 %v476_v43  ;;  %v381_v42 = vld [vmem:[%s6331_s1 + $0x170] sm:$0xff]  ;;  %v483_v43 = vld [vmem:[%s6331_s1 + $0x4a0] sm:$0xff] }
  0x85   : > { %1022 = vmatpush.msrb.mxu2 %v566_v44  ;;  %1041 = vmatpush.msrb.mxu3 %v668_v45  ;;  %v573_v44 = vld [vmem:[%s6331_s1 + $0x770] sm:$0xff]  ;;  %v675_v45 = vld [vmem:[%s6331_s1 + $0xaa0] sm:$0xff] }
  0x86   : > { %983 = vmatpush.msrb.mxu0 %v368_v46  ;;  %1002 = vmatpush.msrb.mxu1 %v470_v47  ;;  %v375_v46 = vld [vmem:[%s6331_s1 + $0x140] sm:$0xff]  ;;  %v477_v47 = vld [vmem:[%s6331_s1 + $0x470] sm:$0xff] }
  0x87   : > { %1023 = vmatpush.msrb.mxu2 %v560_v48  ;;  %1042 = vmatpush.msrb.mxu3 %v662_v49  ;;  %v567_v48 = vld [vmem:[%s6331_s1 + $0x740] sm:$0xff]  ;;  %v669_v49 = vld [vmem:[%s6331_s1 + $0xa70] sm:$0xff] }
  0x88   : > { %984 = vmatpush.msrb.mxu0 %v362_v50  ;;  %1003 = vmatpush.msrb.mxu1 %v464_v51  ;;  %v369_v50 = vld [vmem:[%s6331_s1 + $0x110] sm:$0xff]  ;;  %v471_v51 = vld [vmem:[%s6331_s1 + $0x440] sm:$0xff] }
  0x89   : > { %1024 = vmatpush.msrb.mxu2 %v554_v52  ;;  %1043 = vmatpush.msrb.mxu3 %v656_v53  ;;  %v561_v52 = vld [vmem:[%s6331_s1 + $0x710] sm:$0xff]  ;;  %v663_v53 = vld [vmem:[%s6331_s1 + $0xa40] sm:$0xff] }
  0x8a   : > { %985 = vmatpush.msrb.mxu0 %v356_v54  ;;  %1004 = vmatpush.msrb.mxu1 %v458_v55  ;;  %v363_v54 = vld [vmem:[%s6331_s1 + $0xe0] sm:$0xff]  ;;  %v465_v55 = vld [vmem:[%s6331_s1 + $0x410] sm:$0xff] }
  0x8b   : > { %1025 = vmatpush.msrb.mxu2 %v548_v56  ;;  %1044 = vmatpush.msrb.mxu3 %v650_v57  ;;  %v555_v56 = vld [vmem:[%s6331_s1 + $0x6e0] sm:$0xff]  ;;  %v657_v57 = vld [vmem:[%s6331_s1 + $0xa10] sm:$0xff] }
  0x8c   : > { %986 = vmatpush.msrb.mxu0 %v350_v58  ;;  %1005 = vmatpush.msrb.mxu1 %v452_v59  ;;  %v357_v58 = vld [vmem:[%s6331_s1 + $0xb0] sm:$0xff]  ;;  %v459_v59 = vld [vmem:[%s6331_s1 + $0x3e0] sm:$0xff] }
  0x8d   : > { %1026 = vmatpush.msrb.mxu2 %v542_v60  ;;  %1045 = vmatpush.msrb.mxu3 %v644_v61  ;;  %v549_v60 = vld [vmem:[%s6331_s1 + $0x6b0] sm:$0xff]  ;;  %v651_v61 = vld [vmem:[%s6331_s1 + $0x9e0] sm:$0xff] }
  0x8e   : > { %987 = vmatpush.msrb.mxu0 %v344_v0  ;;  %1006 = vmatpush.msrb.mxu1 %v446_v1  ;;  %v351_v0 = vld [vmem:[%s6331_s1 + $0x80] sm:$0xff]  ;;  %v453_v1 = vld [vmem:[%s6331_s1 + $0x3b0] sm:$0xff] }
  0x8f   : > { %1027 = vmatpush.msrb.mxu2 %v536_v2  ;;  %1046 = vmatpush.msrb.mxu3 %v638_v3  ;;  %v543_v2 = vld [vmem:[%s6331_s1 + $0x680] sm:$0xff]  ;;  %v645_v3 = vld [vmem:[%s6331_s1 + $0x9b0] sm:$0xff] }
  0x90   : > { %988 = vmatpush.msrb.mxu0 %v338_v6  ;;  %1007 = vmatpush.msrb.mxu1 %v440_v7  ;;  %v345_v6 = vld [vmem:[%s6331_s1 + $0x50] sm:$0xff]  ;;  %v447_v7 = vld [vmem:[%s6331_s1 + $0x380] sm:$0xff] }
  0x91   : > { %1028 = vmatpush.msrb.mxu2 %v530_v8  ;;  %1047 = vmatpush.msrb.mxu3 %v632_v9  ;;  %v537_v8 = vld [vmem:[%s6331_s1 + $0x650] sm:$0xff]  ;;  %v639_v9 = vld [vmem:[%s6331_s1 + $0x980] sm:$0xff] }
  0x92   : > { %1029 = vmatmul.f32.vlgmr.msrb.gmra.mxu2 %v3341_v63  ;;  %1053 = vmatpush.msra.mxu0 %v429_v10  ;;  %v339_v10 = vld [vmem:[%s6331_s1 + $0x20] sm:$0xff] }
  0x93   : > { %1093 = vmatpush.msra.mxu2 %v621_v11  ;;  %1008 = vmatpush.msrb.mxu1 %v434_v12  ;;  %v441_v11 = vld [vmem:[%s6331_s1 + $0x350] sm:$0xff]  ;;  %v531_v12 = vld [vmem:[%s6331_s1 + $0x620] sm:$0xff] }
  0x94   : > { %1048 = vmatpush.msrb.mxu3 %v626_v13  ;;  %989 = vmatmul.f32.vlgmr.msrb.gmra.mxu0 %v3338_v62  ;;  %v633_v13 = vld [vmem:[%s6331_s1 + $0x950] sm:$0xff] }
  0x95   : > { %1049 = vmatmul.f32.vlgmr.msrb.gmra.mxu3 %v3361_v5  ;;  %1054 = vmatpush.msra.mxu0 %v423_v14  ;;  %v430_v14 = vld [vmem:[%s6331_s1 + $0x2f8] sm:$0xff] }
  0x96   : > { %1073 = vmatpush.msra.mxu1 %v525_v15  ;;  %1094 = vmatpush.msra.mxu2 %v615_v16  ;;  %v622_v15 = vld [vmem:[%s6331_s1 + $0x8f8] sm:$0xff]  ;;  %v435_v16 = vld [vmem:[%s6331_s1 + $0x320] sm:$0xff] }
  0x97   : > { %1113 = vmatpush.msra.mxu3 %v717_v17  ;;  %1009 = vmatmul.f32.vlgmr.msrb.gmra.mxu1 %v3358_v4  ;;  %v627_v17 = vld [vmem:[%s6331_s1 + $0x920] sm:$0xff] }
  0x98   : > { %1055 = vmatpush.msra.mxu0 %v417_v18  ;;  %1074 = vmatpush.msra.mxu1 %v519_v19  ;;  %v424_v18 = vld [vmem:[%s6331_s1 + $0x2c8] sm:$0xff]  ;;  %v526_v19 = vld [vmem:[%s6331_s1 + $0x5f8] sm:$0xff] }
  0x99   : > { %1095 = vmatpush.msra.mxu2 %v609_v20  ;;  %1114 = vmatpush.msra.mxu3 %v711_v21  ;;  %v616_v20 = vld [vmem:[%s6331_s1 + $0x8c8] sm:$0xff]  ;;  %v418_v21 = vld [vmem:[%s6331_s1 + $0x298] sm:$0xff] }
  0x9a   : > { %1056 = vmatpush.msra.mxu0 %v411_v22  ;;  %1075 = vmatpush.msra.mxu1 %v513_v23  ;;  %v520_v22 = vld [vmem:[%s6331_s1 + $0x5c8] sm:$0xff] }
  0x9b   : > { %1096 = vmatpush.msra.mxu2 %v603_v24  ;;  %1115 = vmatpush.msra.mxu3 %v705_v25  ;;  %v712_v23 = vld [vmem:[%s6331_s1 + $0xbc8] sm:$0xff]  ;;  %v514_v24 = vld [vmem:[%s6331_s1 + $0x598] sm:$0xff] }
  0x9c   : > { %1057 = vmatpush.msra.mxu0 %v405_v26  ;;  %1076 = vmatpush.msra.mxu1 %v507_v27  ;;  %v604_v25 = vld [vmem:[%s6331_s1 + $0x868] sm:$0xff]  ;;  %v706_v26 = vld [vmem:[%s6331_s1 + $0xb98] sm:$0xff] }
  0x9d   : > { %1097 = vmatpush.msra.mxu2 %v597_v28  ;;  %1116 = vmatpush.msra.mxu3 %v699_v29  ;;  %v508_v27 = vld [vmem:[%s6331_s1 + $0x568] sm:$0xff]  ;;  %v598_v28 = vld [vmem:[%s6331_s1 + $0x838] sm:$0xff] }
  0x9e   : > { %1058 = vmatpush.msra.mxu0 %v399_v30  ;;  %1077 = vmatpush.msra.mxu1 %v501_v31  ;;  %v700_v29 = vld [vmem:[%s6331_s1 + $0xb68] sm:$0xff]  ;;  %v502_v31 = vld [vmem:[%s6331_s1 + $0x538] sm:$0xff] }
  0x9f   : > { %1098 = vmatpush.msra.mxu2 %v591_v32  ;;  %1117 = vmatpush.msra.mxu3 %v693_v33  ;;  %v400_v30 = vld [vmem:[%s6331_s1 + $0x208] sm:$0xff]  ;;  %v694_v33 = vld [vmem:[%s6331_s1 + $0xb38] sm:$0xff] }
  0xa0   : > { %1059 = vmatpush.msra.mxu0 %v393_v34  ;;  %1078 = vmatpush.msra.mxu1 %v495_v35  ;;  %v592_v32 = vld [vmem:[%s6331_s1 + $0x808] sm:$0xff]  ;;  %v394_v34 = vld [vmem:[%s6331_s1 + $0x1d8] sm:$0xff] }
  0xa1   : > { %1099 = vmatpush.msra.mxu2 %v585_v36  ;;  %1118 = vmatpush.msra.mxu3 %v687_v37  ;;  %v496_v35 = vld [vmem:[%s6331_s1 + $0x508] sm:$0xff]  ;;  %v586_v36 = vld [vmem:[%s6331_s1 + $0x7d8] sm:$0xff] }
  0xa2   : > { %1060 = vmatpush.msra.mxu0 %v387_v38  ;;  %1079 = vmatpush.msra.mxu1 %v489_v39  ;;  %v688_v37 = vld [vmem:[%s6331_s1 + $0xb08] sm:$0xff]  ;;  %v490_v39 = vld [vmem:[%s6331_s1 + $0x4d8] sm:$0xff] }
  0xa3   : > { %1100 = vmatpush.msra.mxu2 %v579_v40  ;;  %1119 = vmatpush.msra.mxu3 %v681_v41  ;;  %v388_v38 = vld [vmem:[%s6331_s1 + $0x1a8] sm:$0xff]  ;;  %v682_v41 = vld [vmem:[%s6331_s1 + $0xad8] sm:$0xff] }
  0xa4   : > { %1061 = vmatpush.msra.mxu0 %v381_v42  ;;  %1080 = vmatpush.msra.mxu1 %v483_v43  ;;  %v580_v40 = vld [vmem:[%s6331_s1 + $0x7a8] sm:$0xff]  ;;  %v382_v42 = vld [vmem:[%s6331_s1 + $0x178] sm:$0xff] }
  0xa5   : > { %1101 = vmatpush.msra.mxu2 %v573_v44  ;;  %1120 = vmatpush.msra.mxu3 %v675_v45  ;;  %v484_v43 = vld [vmem:[%s6331_s1 + $0x4a8] sm:$0xff]  ;;  %v574_v44 = vld [vmem:[%s6331_s1 + $0x778] sm:$0xff] }
  0xa6   : > { %1062 = vmatpush.msra.mxu0 %v375_v46  ;;  %1081 = vmatpush.msra.mxu1 %v477_v47  ;;  %v676_v45 = vld [vmem:[%s6331_s1 + $0xaa8] sm:$0xff]  ;;  %v478_v47 = vld [vmem:[%s6331_s1 + $0x478] sm:$0xff] }
  0xa7   : > { %1102 = vmatpush.msra.mxu2 %v567_v48  ;;  %1121 = vmatpush.msra.mxu3 %v669_v49  ;;  %v376_v46 = vld [vmem:[%s6331_s1 + $0x148] sm:$0xff]  ;;  %v670_v49 = vld [vmem:[%s6331_s1 + $0xa78] sm:$0xff] }
  0xa8   : > { %1063 = vmatpush.msra.mxu0 %v369_v50  ;;  %1082 = vmatpush.msra.mxu1 %v471_v51  ;;  %v568_v48 = vld [vmem:[%s6331_s1 + $0x748] sm:$0xff]  ;;  %v370_v50 = vld [vmem:[%s6331_s1 + $0x118] sm:$0xff] }
  0xa9   : > { %1103 = vmatpush.msra.mxu2 %v561_v52  ;;  %1122 = vmatpush.msra.mxu3 %v663_v53  ;;  %v472_v51 = vld [vmem:[%s6331_s1 + $0x448] sm:$0xff]  ;;  %v562_v52 = vld [vmem:[%s6331_s1 + $0x718] sm:$0xff] }
  0xaa   : > { %1064 = vmatpush.msra.mxu0 %v363_v54  ;;  %1083 = vmatpush.msra.mxu1 %v465_v55  ;;  %v664_v53 = vld [vmem:[%s6331_s1 + $0xa48] sm:$0xff]  ;;  %v466_v55 = vld [vmem:[%s6331_s1 + $0x418] sm:$0xff] }
  0xab   : > { %1104 = vmatpush.msra.mxu2 %v555_v56  ;;  %1123 = vmatpush.msra.mxu3 %v657_v57  ;;  %v364_v54 = vld [vmem:[%s6331_s1 + $0xe8] sm:$0xff]  ;;  %v658_v57 = vld [vmem:[%s6331_s1 + $0xa18] sm:$0xff] }
  0xac   : > { %1065 = vmatpush.msra.mxu0 %v357_v58  ;;  %1084 = vmatpush.msra.mxu1 %v459_v59  ;;  %v556_v56 = vld [vmem:[%s6331_s1 + $0x6e8] sm:$0xff]  ;;  %v358_v58 = vld [vmem:[%s6331_s1 + $0xb8] sm:$0xff] }
  0xad   : > { %1105 = vmatpush.msra.mxu2 %v549_v60  ;;  %1124 = vmatpush.msra.mxu3 %v651_v61  ;;  %v460_v59 = vld [vmem:[%s6331_s1 + $0x3e8] sm:$0xff]  ;;  %v550_v60 = vld [vmem:[%s6331_s1 + $0x6b8] sm:$0xff] }
  0xae   : > { %1066 = vmatpush.msra.mxu0 %v351_v0  ;;  %1085 = vmatpush.msra.mxu1 %v453_v1  ;;  %v652_v61 = vld [vmem:[%s6331_s1 + $0x9e8] sm:$0xff]  ;;  %v454_v1 = vld [vmem:[%s6331_s1 + $0x3b8] sm:$0xff] }
  0xaf   : > { %1106 = vmatpush.msra.mxu2 %v543_v2  ;;  %1125 = vmatpush.msra.mxu3 %v645_v3  ;;  %v352_v0 = vld [vmem:[%s6331_s1 + $0x88] sm:$0xff]  ;;  %v646_v3 = vld [vmem:[%s6331_s1 + $0x9b8] sm:$0xff] }
  0xb0   : > { %1067 = vmatpush.msra.mxu0 %v345_v6  ;;  %1086 = vmatpush.msra.mxu1 %v447_v7  ;;  %v544_v2 = vld [vmem:[%s6331_s1 + $0x688] sm:$0xff]  ;;  %v346_v6 = vld [vmem:[%s6331_s1 + $0x58] sm:$0xff] }
  0xb1   : > { %1107 = vmatpush.msra.mxu2 %v537_v8  ;;  %1126 = vmatpush.msra.mxu3 %v639_v9  ;;  %v448_v7 = vld [vmem:[%s6331_s1 + $0x388] sm:$0xff]  ;;  %v538_v8 = vld [vmem:[%s6331_s1 + $0x658] sm:$0xff] }
  0xb2   : > { %1068 = vmatpush.msra.mxu0 %v339_v10  ;;  %1087 = vmatpush.msra.mxu1 %v441_v11  ;;  %v640_v9 = vld [vmem:[%s6331_s1 + $0x988] sm:$0xff]  ;;  %v442_v11 = vld [vmem:[%s6331_s1 + $0x358] sm:$0xff] }
  0xb3   : > { %1108 = vmatpush.msra.mxu2 %v531_v12  ;;  %1127 = vmatpush.msra.mxu3 %v633_v13  ;;  %v340_v10 = vld [vmem:[%s6331_s1 + $0x28] sm:$0xff]  ;;  %v634_v13 = vld [vmem:[%s6331_s1 + $0x958] sm:$0xff] }
  0xb4   : > { %1109 = vmatmul.f32.vlgmr.msra.gmra.mxu2 %v3341_v63  ;;  %1133 = vmatpush.msrb.mxu0 %v430_v14  ;;  %v718_v63 = vld [vmem:[%s6331_s1 + $0xbf8] sm:$0xff]  ;;  %v532_v12 = vld [vmem:[%s6331_s1 + $0x628] sm:$0xff]  ;;  %v1309_v14 = vld [vmem:[%s6333_s3 + $0x2d0] sm:$0xff] }
  0xb5   : > { %1173 = vmatpush.msrb.mxu2 %v622_v15  ;;  %1088 = vmatpush.msra.mxu1 %v435_v16  ;;  %v1501_v15 = vld [vmem:[%s6333_s3 + $0x8d0] sm:$0xff]  ;;  %v436_v16 = vld [vmem:[%s6331_s1 + $0x328] sm:$0xff] }
  0xb6   : > { %1128 = vmatpush.msra.mxu3 %v627_v17  ;;  %1069 = vmatmul.f32.vlgmr.msra.gmra.mxu0 %v3338_v62  ;;  %v610_v62 = vld [vmem:[%s6331_s1 + $0x898] sm:$0xff]  ;;  %v628_v17 = vld [vmem:[%s6331_s1 + $0x928] sm:$0xff] }
  0xb7   : > { %1129 = vmatmul.f32.vlgmr.msra.gmra.mxu3 %v3361_v5  ;;  %1134 = vmatpush.msrb.mxu0 %v424_v18  ;;  %v412_v5 = vld [vmem:[%s6331_s1 + $0x268] sm:$0xff]  ;;  %v2871_v18 = vld [vmem:[%s3323_s12 + $0x10] sm:$0xff] }
  0xb8   : > { %1153 = vmatpush.msrb.mxu1 %v526_v19  ;;  %1174 = vmatpush.msrb.mxu2 %v616_v20  ;;  %v1303_v19 = vld [vmem:[%s6333_s3 + $0x2a0] sm:$0xff]  ;;  %v1405_v20 = vld [vmem:[%s6333_s3 + $0x5d0] sm:$0xff] }
  0xb9   : > { %1193 = vmatpush.msrb.mxu3 %v718_v63  ;;  %1089 = vmatmul.f32.vlgmr.msra.gmra.mxu1 %v3358_v4  ;;  %v406_v4 = vld [vmem:[%s6331_s1 + $0x238] sm:$0xff]  ;;  %v1495_v63 = vld [vmem:[%s6333_s3 + $0x8a0] sm:$0xff] }
  0xba   : > { %1135 = vmatpush.msrb.mxu0 %v418_v21  ;;  %1154 = vmatpush.msrb.mxu1 %v520_v22  ;;  %v2872_v21 = vld [vmem:[%s3323_s12] sm:$0xff]  ;;  %v1297_v22 = vld [vmem:[%s6333_s3 + $0x270] sm:$0xff] }
  0xbb   : > { %1175 = vmatpush.msrb.mxu2 %v610_v62  ;;  %1194 = vmatpush.msrb.mxu3 %v712_v23  ;;  %v2873_v62 = vld [vmem:[%s3323_s12 + $0x18] sm:$0xff]  ;;  %v1399_v23 = vld [vmem:[%s6333_s3 + $0x5a0] sm:$0xff] }
  0xbc   : > { %1136 = vmatpush.msrb.mxu0 %v412_v5  ;;  %1155 = vmatpush.msrb.mxu1 %v514_v24  ;;  %v1489_v5 = vld [vmem:[%s6333_s3 + $0x870] sm:$0xff] }
  0xbd   : > { %1176 = vmatpush.msrb.mxu2 %v604_v25  ;;  %1195 = vmatpush.msrb.mxu3 %v706_v26  ;;  %v1291_v25 = vld [vmem:[%s6333_s3 + $0x240] sm:$0xff]  ;;  %v1597_v26 = vld [vmem:[%s6333_s3 + $0xbd0] sm:$0xff] }
  0xbe   : > { %1137 = vmatpush.msrb.mxu0 %v406_v4  ;;  %1156 = vmatpush.msrb.mxu1 %v508_v27  ;;  %v2874_v4 = vld [vmem:[%s3323_s12 + $0x8] sm:$0xff]  ;;  %v1393_v27 = vld [vmem:[%s6333_s3 + $0x570] sm:$0xff] }
  0xbf   : > { %1177 = vmatpush.msrb.mxu2 %v598_v28  ;;  %1196 = vmatpush.msrb.mxu3 %v700_v29  ;;  %v1483_v28 = vld [vmem:[%s6333_s3 + $0x840] sm:$0xff]  ;;  %v1285_v29 = vld [vmem:[%s6333_s3 + $0x210] sm:$0xff] }
  0xc0   : > { %1138 = vmatpush.msrb.mxu0 %v400_v30  ;;  %1157 = vmatpush.msrb.mxu1 %v502_v31  ;;  %v1591_v30 = vld [vmem:[%s6333_s3 + $0xba0] sm:$0xff] }
  0xc1   : > { %1178 = vmatpush.msrb.mxu2 %v592_v32  ;;  %1197 = vmatpush.msrb.mxu3 %v694_v33  ;;  %v1387_v31 = vld [vmem:[%s6333_s3 + $0x540] sm:$0xff]  ;;  %v1477_v32 = vld [vmem:[%s6333_s3 + $0x810] sm:$0xff] }
  0xc2   : > { %1139 = vmatpush.msrb.mxu0 %v394_v34  ;;  %1158 = vmatpush.msrb.mxu1 %v496_v35  ;;  %v4198_v33 = vld [vmem:[%s6332_s2] sm:$0x3f] }
  0xc3   : > { %1179 = vmatpush.msrb.mxu2 %v586_v36  ;;  %1198 = vmatpush.msrb.mxu3 %v688_v37  ;;  %v1279_v35 = vld [vmem:[%s6333_s3 + $0x1e0] sm:$0xff]  ;;  %v1585_v36 = vld [vmem:[%s6333_s3 + $0xb70] sm:$0xff] }
  0xc4   : > { %1140 = vmatpush.msrb.mxu0 %v388_v38  ;;  %1159 = vmatpush.msrb.mxu1 %v490_v39  ;;  %v1381_v37 = vld [vmem:[%s6333_s3 + $0x510] sm:$0xff]  ;;  %v1471_v38 = vld [vmem:[%s6333_s3 + $0x7e0] sm:$0xff] }
  0xc5   : > { %1180 = vmatpush.msrb.mxu2 %v580_v40  ;;  %1199 = vmatpush.msrb.mxu3 %v682_v41  ;;  %v1273_v39 = vld [vmem:[%s6333_s3 + $0x1b0] sm:$0xff]  ;;  %v1579_v40 = vld [vmem:[%s6333_s3 + $0xb40] sm:$0xff]  ;;  %v721_v41 = vperm.slane %v4198_v33, 0 }
  0xc6   : > { %1141 = vmatpush.msrb.mxu0 %v382_v42  ;;  %1160 = vmatpush.msrb.mxu1 %v484_v43  ;;  %v1375_v42 = vld [vmem:[%s6333_s3 + $0x4e0] sm:$0xff]  ;;  %v1465_v43 = vld [vmem:[%s6333_s3 + $0x7b0] sm:$0xff] }
  0xc7   : > { %1181 = vmatpush.msrb.mxu2 %v574_v44  ;;  %1200 = vmatpush.msrb.mxu3 %v676_v45  ;;  %v722_v44 = vperm.slane %v4198_v33, 1 }
  0xc8   : > { %1142 = vmatpush.msrb.mxu0 %v376_v46  ;;  %1161 = vmatpush.msrb.mxu1 %v478_v47  ;;  %v1267_v46 = vld [vmem:[%s6333_s3 + $0x180] sm:$0xff] }
  0xc9   : > { %1182 = vmatpush.msrb.mxu2 %v568_v48  ;;  %1201 = vmatpush.msrb.mxu3 %v670_v49  ;;  %v750_v24 = vpop.f32.mrf.mxu0  ;;  %v1573_v48 = vld [vmem:[%s6333_s3 + $0xb10] sm:$0xff] }
  0xca   : > { %1143 = vmatpush.msrb.mxu0 %v370_v50  ;;  %1162 = vmatpush.msrb.mxu1 %v472_v51  ;;  %v1369_v49 = vld [vmem:[%s6333_s3 + $0x4b0] sm:$0xff]  ;;  %v1459_v50 = vld [vmem:[%s6333_s3 + $0x780] sm:$0xff] }
  0xcb   : > { %1183 = vmatpush.msrb.mxu2 %v562_v52  ;;  %1202 = vmatpush.msrb.mxu3 %v664_v53  ;;  %v1261_v51 = vld [vmem:[%s6333_s3 + $0x150] sm:$0xff]  ;;  %v1567_v52 = vld [vmem:[%s6333_s3 + $0xae0] sm:$0xff]  ;;  %v751_v53 = vadd.f32 %v750_v24, %v721_v41 }
  0xcc   : > { %1144 = vmatpush.msrb.mxu0 %v364_v54  ;;  %1163 = vmatpush.msrb.mxu1 %v466_v55  ;;  %v770_v34 = vpop.f32.mrf.mxu1  ;;  %v1363_v54 = vld [vmem:[%s6333_s3 + $0x480] sm:$0xff]  ;;  %v1453_v55 = vld [vmem:[%s6333_s3 + $0x750] sm:$0xff] }
  0xcd   : > { %1184 = vmatpush.msrb.mxu2 %v556_v56  ;;  %1203 = vmatpush.msrb.mxu3 %v658_v57  ;;  %v1225_v24 = vld [vmem:[%s6333_s3 + $0x30] sm:$0xff]  ;;  %v1315_v41 = vld [vmem:[%s6333_s3 + $0x300] sm:$0xff] }
  0xce   : > { %1145 = vmatpush.msrb.mxu0 %v358_v58  ;;  %1164 = vmatpush.msrb.mxu1 %v460_v59  ;;  %v1255_v58 = vld [vmem:[%s6333_s3 + $0x120] sm:$0xff] }
  0xcf   : > { %1185 = vmatpush.msrb.mxu2 %v550_v60  ;;  %1204 = vmatpush.msrb.mxu3 %v652_v61  ;;  %v790_v45 = vpop.f32.mrf.mxu2  ;;  %v1561_v60 = vld [vmem:[%s6333_s3 + $0xab0] sm:$0xff] }
  0xd0   : > { %1146 = vmatpush.msrb.mxu0 %v352_v0  ;;  %1165 = vmatpush.msrb.mxu1 %v454_v1  ;;  %v1357_v61 = vld [vmem:[%s6333_s3 + $0x450] sm:$0xff]  ;;  %v1447_v0 = vld [vmem:[%s6333_s3 + $0x720] sm:$0xff] }
  0xd1   : > { %1186 = vmatpush.msrb.mxu2 %v544_v2  ;;  %1205 = vmatpush.msrb.mxu3 %v646_v3  ;;  %v1249_v1 = vld [vmem:[%s6333_s3 + $0xf0] sm:$0xff]  ;;  %v1555_v2 = vld [vmem:[%s6333_s3 + $0xa80] sm:$0xff]  ;;  %v771_v3 = vadd.f32 %v770_v34, %v751_v53  ;;  %v1406_v53 = vld [vmem:[%s6333_s3 + $0x5d8] sm:$0xff] }
  0xd2   : > { %1147 = vmatpush.msrb.mxu0 %v346_v6  ;;  %1166 = vmatpush.msrb.mxu1 %v448_v7  ;;  %v810_v57 = vpop.f32.mrf.mxu3  ;;  %v1351_v6 = vld [vmem:[%s6333_s3 + $0x420] sm:$0xff]  ;;  %v1441_v7 = vld [vmem:[%s6333_s3 + $0x6f0] sm:$0xff] }
  0xd3   : > { %1187 = vmatpush.msrb.mxu2 %v538_v8  ;;  %1206 = vmatpush.msrb.mxu3 %v640_v9  ;;  %v1243_v9 = vld [vmem:[%s6333_s3 + $0xc0] sm:$0xff]  ;;  %v1321_v34 = vld [vmem:[%s6333_s3 + $0x330] sm:$0xff] }
  0xd4   : > { %1148 = vmatpush.msrb.mxu0 %v340_v10  ;;  %1167 = vmatpush.msrb.mxu1 %v442_v11  ;;  %v1549_v11 = vld [vmem:[%s6333_s3 + $0xa50] sm:$0xff] }
  0xd5   : > { %1188 = vmatpush.msrb.mxu2 %v532_v12  ;;  %1207 = vmatpush.msrb.mxu3 %v634_v13  ;;  %v1345_v12 = vld [vmem:[%s6333_s3 + $0x3f0] sm:$0xff]  ;;  %v1435_v13 = vld [vmem:[%s6333_s3 + $0x6c0] sm:$0xff] }
  0xd6   : > { %1189 = vmatmul.f32.vlgmr.msrb.gmra.mxu2 %v2871_v18  ;;  %1809 = vmatpush.msra.mxu0 %v1309_v14  ;;  %v1237_v14 = vld [vmem:[%s6333_s3 + $0x90] sm:$0xff]  ;;  %v1339_v18 = vld [vmem:[%s6333_s3 + $0x3c0] sm:$0xff] }
  0xd7   : > { %1849 = vmatpush.msra.mxu2 %v1501_v15  ;;  %1168 = vmatpush.msrb.mxu1 %v436_v16  ;;  %v1543_v15 = vld [vmem:[%s6333_s3 + $0xa20] sm:$0xff]  ;;  %v723_v16 = vperm.slane %v4198_v33, 2 }
  0xd8   : > { %1208 = vmatpush.msrb.mxu3 %v628_v17  ;;  %1149 = vmatmul.f32.vlgmr.msrb.gmra.mxu0 %v2872_v21  ;;  %v791_v17 = vadd.f32 %v790_v45, %v771_v3  ;;  %v1382_v3 = vld [vmem:[%s6333_s3 + $0x518] sm:$0xff] }
  0xd9   : > { %1209 = vmatmul.f32.vlgmr.msrb.gmra.mxu3 %v2873_v62  ;;  %1810 = vmatpush.msra.mxu0 %v1303_v19  ;;  %v1429_v19 = vld [vmem:[%s6333_s3 + $0x690] sm:$0xff] }
  0xda   : > { %1829 = vmatpush.msra.mxu1 %v1405_v20  ;;  %1850 = vmatpush.msra.mxu2 %v1495_v63  ;;  %v1231_v63 = vld [vmem:[%s6333_s3 + $0x60] sm:$0xff]  ;;  %v1333_v62 = vld [vmem:[%s6333_s3 + $0x390] sm:$0xff] }
  0xdb   : > { %1169 = vmatmul.f32.vlgmr.msrb.gmra.mxu1 %v2874_v4  ;;  %1811 = vmatpush.msra.mxu0 %v1297_v22  ;;  %v1537_v22 = vld [vmem:[%s6333_s3 + $0x9f0] sm:$0xff]  ;;  %v811_v4 = vadd.f32 %v810_v57, %v791_v17  ;;  %v1364_v17 = vld [vmem:[%s6333_s3 + $0x488] sm:$0xff] }
  0xdc   : > { %1830 = vmatpush.msra.mxu1 %v1399_v23  ;;  %1851 = vmatpush.msra.mxu2 %v1489_v5  ;;  %v1423_v23 = vld [vmem:[%s6333_s3 + $0x660] sm:$0xff]  ;;  %v1681_v57 = vld [vmem:[%s6333_s3 + $0xe70] sm:$0xff] }
  0xdd   : > { %1812 = vmatpush.msra.mxu0 %v1291_v25  ;;  %1869 = vmatpush.msra.mxu3 %v1597_v26  ;;  %v1531_v26 = vld [vmem:[%s6333_s3 + $0x9c0] sm:$0xff] }
  0xde   : > { %1831 = vmatpush.msra.mxu1 %v1393_v27  ;;  %1852 = vmatpush.msra.mxu2 %v1483_v28  ;;  %v1327_v28 = vld [vmem:[%s6333_s3 + $0x360] sm:$0xff] }
  0xdf   : > { %1813 = vmatpush.msra.mxu0 %v1285_v29  ;;  %1870 = vmatpush.msra.mxu3 %v1591_v30  ;;  %v1417_v29 = vld [vmem:[%s6333_s3 + $0x630] sm:$0xff]  ;;  %v1219_v30 = vld [vmem:[%s6333_s3] sm:$0xff] }
  0xe0   : > { %1832 = vmatpush.msra.mxu1 %v1387_v31  ;;  %1853 = vmatpush.msra.mxu2 %v1477_v32  ;;  %v1525_v32 = vld [vmem:[%s6333_s3 + $0x990] sm:$0xff] }
  0xe1   : > { %1814 = vmatpush.msra.mxu0 %v1279_v35  ;;  %1871 = vmatpush.msra.mxu3 %v1585_v36  ;;  %v830_v47 = vpop.f32.mrf.mxu0  ;;  %v1411_v35 = vld [vmem:[%s6333_s3 + $0x600] sm:$0xff] }
  0xe2   : > { %1833 = vmatpush.msra.mxu1 %v1381_v37  ;;  %1854 = vmatpush.msra.mxu2 %v1471_v38  ;;  %v831_v56 = vadd.f32 %v830_v47, %v722_v44  ;;  %v1310_v38 = vld [vmem:[%s6333_s3 + $0x2d8] sm:$0xff]  ;;  %v1304_v44 = vld [vmem:[%s6333_s3 + $0x2a8] sm:$0xff]  ;;  %v1513_v47 = vld [vmem:[%s6333_s3 + $0x930] sm:$0xff] }
  0xe3   : > { %1815 = vmatpush.msra.mxu0 %v1273_v39  ;;  %1872 = vmatpush.msra.mxu3 %v1579_v40  ;;  %v4338_v39 = vmax.f32 %v811_v4, 0.0  ;;  %v1346_v4 = vld [vmem:[%s6333_s3 + $0x3f8] sm:$0xff] }
  0xe4   : > { %1834 = vmatpush.msra.mxu1 %v1375_v42  ;;  %1855 = vmatpush.msra.mxu2 %v1465_v43  ;;  %v850_v59 = vpop.f32.mrf.mxu1  ;;  %v1519_v43 = vld [vmem:[%s6333_s3 + $0x960] sm:$0xff] }
  0xe5   : > { %1816 = vmatpush.msra.mxu0 %v1267_v46  ;;  %1873 = vmatpush.msra.mxu3 %v1573_v48  ;;  %v851_v8 = vadd.f32 %v850_v59, %v831_v56  ;;  %v870_v10 = vpop.f32.mrf.mxu2  ;;  %v1693_v48 = vld [vmem:[%s6333_s3 + $0xed0] sm:$0xff]  ;;  %v1400_v56 = vld [vmem:[%s6333_s3 + $0x5a8] sm:$0xff]  ;;  %v1394_v59 = vld [vmem:[%s6333_s3 + $0x578] sm:$0xff] }
  0xe6   : > { %1835 = vmatpush.msra.mxu1 %v1369_v49  ;;  %1856 = vmatpush.msra.mxu2 %v1459_v50  ;;  %v1298_v49 = vld [vmem:[%s6333_s3 + $0x278] sm:$0xff] }
  0xe7   : > { %1817 = vmatpush.msra.mxu0 %v1261_v51  ;;  %1874 = vmatpush.msra.mxu3 %v1567_v52  ;;  %v871_v20 = vadd.f32 %v870_v10, %v851_v8  ;;  %v1507_v51 = vld [vmem:[%s6333_s3 + $0x900] sm:$0xff]  ;;  %v1292_v52 = vld [vmem:[%s6333_s3 + $0x248] sm:$0xff]  ;;  %v1262_v8 = vld [vmem:[%s6333_s3 + $0x158] sm:$0xff] }
  0xe8   : > { %1836 = vmatpush.msra.mxu1 %v1363_v54  ;;  %1857 = vmatpush.msra.mxu2 %v1453_v55  ;;  %v890_v21 = vpop.f32.mrf.mxu3  ;;  %v1687_v54 = vld [vmem:[%s6333_s3 + $0xea0] sm:$0xff]  ;;  %v1286_v55 = vld [vmem:[%s6333_s3 + $0x218] sm:$0xff]  ;;  %v1657_v10 = vld [vmem:[%s6333_s3 + $0xdb0] sm:$0xff] }
  0xe9   : > { %1818 = vmatpush.msra.mxu0 %v1255_v58  ;;  %1875 = vmatpush.msra.mxu3 %v1561_v60  ;;  %v891_v27 = vadd.f32 %v890_v21, %v871_v20  ;;  %v1280_v58 = vld [vmem:[%s6333_s3 + $0x1e8] sm:$0xff]  ;;  %v1675_v60 = vld [vmem:[%s6333_s3 + $0xe40] sm:$0xff] }
  0xea   : > { %1837 = vmatpush.msra.mxu1 %v1357_v61  ;;  %1858 = vmatpush.msra.mxu2 %v1447_v0  ;;  %v1274_v61 = vld [vmem:[%s6333_s3 + $0x1b8] sm:$0xff]  ;;  %v1388_v0 = vld [vmem:[%s6333_s3 + $0x548] sm:$0xff]  ;;  %v1639_v21 = vld [vmem:[%s6333_s3 + $0xd20] sm:$0xff] }
  0xeb   : > { %1819 = vmatpush.msra.mxu0 %v1249_v1  ;;  %1876 = vmatpush.msra.mxu3 %v1555_v2  ;;  %v4340_v40 = vmax.f32 %v891_v27, 0.0  ;;  %v1669_v1 = vld [vmem:[%s6333_s3 + $0xe10] sm:$0xff]  ;;  %v1268_v2 = vld [vmem:[%s6333_s3 + $0x188] sm:$0xff]  ;;  %v1627_v27 = vld [vmem:[%s6333_s3 + $0xcc0] sm:$0xff] }
  0xec   : > { %1838 = vmatpush.msra.mxu1 %v1351_v6  ;;  %1859 = vmatpush.msra.mxu2 %v1441_v7  ;;  %v1663_v6 = vld [vmem:[%s6333_s3 + $0xde0] sm:$0xff]  ;;  %v1789_v7 = vld [vmem:[%s6333_s3 + $0x11d0] sm:$0xff]  ;;  %v1244_v20 = vld [vmem:[%s6333_s3 + $0xc8] sm:$0xff] }
  0xed   : > { %1820 = vmatpush.msra.mxu0 %v1243_v9  ;;  %1877 = vmatpush.msra.mxu3 %v1549_v11  ;;  %v1376_v9 = vld [vmem:[%s6333_s3 + $0x4e8] sm:$0xff]  ;;  %v1783_v11 = vld [vmem:[%s6333_s3 + $0x11a0] sm:$0xff] }
  0xee   : > { %1839 = vmatpush.msra.mxu1 %v1345_v12  ;;  %1860 = vmatpush.msra.mxu2 %v1435_v13  ;;  %v1256_v12 = vld [vmem:[%s6333_s3 + $0x128] sm:$0xff]  ;;  %v1370_v13 = vld [vmem:[%s6333_s3 + $0x4b8] sm:$0xff] }
  0xef   : > { %1821 = vmatpush.msra.mxu0 %v1237_v14  ;;  %1878 = vmatpush.msra.mxu3 %v1543_v15  ;;  %v910_v5 = vpop.f32.mrf.mxu0  ;;  %v1651_v14 = vld [vmem:[%s6333_s3 + $0xd80] sm:$0xff]  ;;  %v1777_v15 = vld [vmem:[%s6333_s3 + $0x1170] sm:$0xff] }
  0xf0   : > { %1840 = vmatpush.msra.mxu1 %v1339_v18  ;;  %1861 = vmatpush.msra.mxu2 %v1429_v19  ;;  %v911_v25 = vadd.f32 %v910_v5, %v723_v16  ;;  %v1250_v16 = vld [vmem:[%s6333_s3 + $0xf8] sm:$0xff]  ;;  %v1645_v18 = vld [vmem:[%s6333_s3 + $0xd50] sm:$0xff]  ;;  %v1771_v19 = vld [vmem:[%s6333_s3 + $0x1140] sm:$0xff] }
  0xf1   : > { %1822 = vmatpush.msra.mxu0 %v1231_v63  ;;  %1879 = vmatpush.msra.mxu3 %v1537_v22  ;;  %v1358_v63 = vld [vmem:[%s6333_s3 + $0x458] sm:$0xff]  ;;  %v1765_v22 = vld [vmem:[%s6333_s3 + $0x1110] sm:$0xff] }
  0xf2   : > { %1841 = vmatpush.msra.mxu1 %v1333_v62  ;;  %1862 = vmatpush.msra.mxu2 %v1423_v23  ;;  %v930_v31 = vpop.f32.mrf.mxu1  ;;  %v1238_v62 = vld [vmem:[%s6333_s3 + $0x98] sm:$0xff]  ;;  %v1352_v23 = vld [vmem:[%s6333_s3 + $0x428] sm:$0xff]  ;;  %v1633_v5 = vld [vmem:[%s6333_s3 + $0xcf0] sm:$0xff] }
  0xf3   : > { %1823 = vmatpush.msra.mxu0 %v1225_v24  ;;  %v931_v36 = vadd.f32 %v930_v31, %v911_v25  ;;  %1880 = vmatpush.msra.mxu3 %v1531_v26  ;;  %v950_v37 = vpop.f32.mrf.mxu2  ;;  %v1759_v24 = vld [vmem:[%s6333_s3 + $0x10e0] sm:$0xff]  ;;  %v1232_v25 = vld [vmem:[%s6333_s3 + $0x68] sm:$0xff]  ;;  %v724_v26 = vperm.slane %v4198_v33, 3 }
  0xf4   : > { %1842 = vmatpush.msra.mxu1 %v1327_v28  ;;  %1863 = vmatpush.msra.mxu2 %v1417_v29  ;;  %v1753_v28 = vld [vmem:[%s6333_s3 + $0x10b0] sm:$0xff]  ;;  %v1226_v29 = vld [vmem:[%s6333_s3 + $0x38] sm:$0xff] }
  0xf5   : > { %1824 = vmatpush.msra.mxu0 %v1219_v30  ;;  %v951_v42 = vadd.f32 %v950_v37, %v931_v36  ;;  %1881 = vmatpush.msra.mxu3 %v1525_v32  ;;  %v1340_v30 = vld [vmem:[%s6333_s3 + $0x3c8] sm:$0xff]  ;;  %v1621_v32 = vld [vmem:[%s6333_s3 + $0xc90] sm:$0xff]  ;;  %v1334_v37 = vld [vmem:[%s6333_s3 + $0x398] sm:$0xff] }
  0xf6   : > { %1843 = vmatpush.msra.mxu1 %v1321_v34  ;;  %1864 = vmatpush.msra.mxu2 %v1411_v35  ;;  %v970_v45 = vpop.f32.mrf.mxu3  ;;  %v1747_v34 = vld [vmem:[%s6333_s3 + $0x1080] sm:$0xff]  ;;  %v1220_v35 = vld [vmem:[%s6333_s3 + $0x8] sm:$0xff] }
  0xf7   : > { %1825 = vmatmul.f32.vlgmr.msra.gmra.mxu0 %v4338_v39  ;;  %v971_v46 = vadd.f32 %v970_v45, %v951_v42  ;;  %1882 = vmatpush.msra.mxu3 %v1519_v43  ;;  %v1694_v42 = vld [vmem:[%s6333_s3 + $0xed8] sm:$0xff] }
  0xf8   : > { %1929 = vmatpush.msrb.mxu2 %v1310_v38  ;;  %1844 = vmatpush.msra.mxu1 %v1315_v41  ;;  %v1615_v38 = vld [vmem:[%s6333_s3 + $0xc60] sm:$0xff]  ;;  %v1741_v41 = vld [vmem:[%s6333_s3 + $0x1050] sm:$0xff] }
  0xf9   : > { %1845 = vmatmul.f32.vlgmr.msra.gmra.mxu1 %v4340_v40  ;;  %v4362_v50 = vmax.f32 %v971_v46, 0.0  ;;  %1883 = vmatpush.msra.mxu3 %v1513_v47  ;;  %v1609_v47 = vld [vmem:[%s6333_s3 + $0xc30] sm:$0xff] }
  0xfa   : > { %1930 = vmatpush.msrb.mxu2 %v1304_v44  ;;  %1889 = vmatpush.msrb.mxu0 %v1693_v48  ;;  %v1328_v44 = vld [vmem:[%s6333_s3 + $0x368] sm:$0xff] }
  0xfb   : > { %1884 = vmatpush.msra.mxu3 %v1507_v51  ;;  %1865 = vmatmul.f32.vlgmr.msra.gmra.mxu2 %v4362_v50  ;;  %v1688_v48 = vld [vmem:[%s6333_s3 + $0xea8] sm:$0xff]  ;;  %v1735_v51 = vld [vmem:[%s6333_s3 + $0x1020] sm:$0xff] }
  0xfc   : > { %1931 = vmatpush.msrb.mxu2 %v1298_v49  ;;  %1890 = vmatpush.msrb.mxu0 %v1687_v54  ;;  %v1322_v49 = vld [vmem:[%s6333_s3 + $0x338] sm:$0xff] }
  0xfd   : > { %1949 = vmatpush.msrb.mxu3 %v1406_v53  ;;  %1909 = vmatpush.msrb.mxu1 %v1789_v7  ;;  %v1603_v53 = vld [vmem:[%s6333_s3 + $0xc00] sm:$0xff]  ;;  %v1682_v54 = vld [vmem:[%s6333_s3 + $0xe78] sm:$0xff]  ;;  %v1784_v7 = vld [vmem:[%s6333_s3 + $0x11a8] sm:$0xff] }
  0xfe   : > { %1932 = vmatpush.msrb.mxu2 %v1292_v52  ;;  %1891 = vmatpush.msrb.mxu0 %v1681_v57  ;;  %v1729_v57 = vld [vmem:[%s6333_s3 + $0xff0] sm:$0xff] }
  0xff   : > { %1950 = vmatpush.msrb.mxu3 %v1400_v56  ;;  %1910 = vmatpush.msrb.mxu1 %v1783_v11  ;;  %v1316_v56 = vld [vmem:[%s6333_s3 + $0x308] sm:$0xff]  ;;  %v1778_v11 = vld [vmem:[%s6333_s3 + $0x1178] sm:$0xff] }
 0x100   : > { %1933 = vmatpush.msrb.mxu2 %v1286_v55  ;;  %1892 = vmatpush.msrb.mxu0 %v1675_v60  ;;  %v1676_v60 = vld [vmem:[%s6333_s3 + $0xe48] sm:$0xff] }
 0x101   : > { %1951 = vmatpush.msrb.mxu3 %v1394_v59  ;;  %1911 = vmatpush.msrb.mxu1 %v1777_v15  ;;  %v1502_v59 = vld [vmem:[%s6333_s3 + $0x8d8] sm:$0xff]  ;;  %v1772_v15 = vld [vmem:[%s6333_s3 + $0x1148] sm:$0xff] }
 0x102   : > { %1934 = vmatpush.msrb.mxu2 %v1280_v58  ;;  %1893 = vmatpush.msrb.mxu0 %v1669_v1  ;;  %v1790_v1 = vld [vmem:[%s6333_s3 + $0x11d8] sm:$0xff] }
 0x103   : > { %1952 = vmatpush.msrb.mxu3 %v1388_v0  ;;  %1912 = vmatpush.msrb.mxu1 %v1771_v19  ;;  %v1472_v19 = vld [vmem:[%s6333_s3 + $0x7e8] sm:$0xff] }
 0x104   : > { %1935 = vmatpush.msrb.mxu2 %v1274_v61  ;;  %1894 = vmatpush.msrb.mxu0 %v1663_v6  ;;  %v1723_v61 = vld [vmem:[%s6333_s3 + $0xfc0] sm:$0xff]  ;;  %v1717_v6 = vld [vmem:[%s6333_s3 + $0xf90] sm:$0xff] }
 0x105   : > { %1953 = vmatpush.msrb.mxu3 %v1382_v3  ;;  %1913 = vmatpush.msrb.mxu1 %v1765_v22  ;;  %v1670_v3 = vld [vmem:[%s6333_s3 + $0xe18] sm:$0xff] }
 0x106   : > { %1936 = vmatpush.msrb.mxu2 %v1268_v2  ;;  %1895 = vmatpush.msrb.mxu0 %v1657_v10  ;;  %v1496_v2 = vld [vmem:[%s6333_s3 + $0x8a8] sm:$0xff]  ;;  %v1711_v10 = vld [vmem:[%s6333_s3 + $0xf60] sm:$0xff]  ;;  %v1466_v22 = vld [vmem:[%s6333_s3 + $0x7b8] sm:$0xff] }
 0x107   : > { %1954 = vmatpush.msrb.mxu3 %v1376_v9  ;;  %1914 = vmatpush.msrb.mxu1 %v1759_v24  ;;  %v1664_v9 = vld [vmem:[%s6333_s3 + $0xde8] sm:$0xff] }
 0x108   : > { %1937 = vmatpush.msrb.mxu2 %v1262_v8  ;;  %1896 = vmatpush.msrb.mxu0 %v1651_v14  ;;  %v1490_v8 = vld [vmem:[%s6333_s3 + $0x878] sm:$0xff]  ;;  %v1705_v14 = vld [vmem:[%s6333_s3 + $0xf30] sm:$0xff]  ;;  %v1460_v24 = vld [vmem:[%s6333_s3 + $0x788] sm:$0xff] }
 0x109   : > { %1955 = vmatpush.msrb.mxu3 %v1370_v13  ;;  %1915 = vmatpush.msrb.mxu1 %v1753_v28  ;;  %v1658_v13 = vld [vmem:[%s6333_s3 + $0xdb8] sm:$0xff]  ;;  %v1628_v28 = vld [vmem:[%s6333_s3 + $0xcc8] sm:$0xff] }
 0x10a   : > { %1938 = vmatpush.msrb.mxu2 %v1256_v12  ;;  %1897 = vmatpush.msrb.mxu0 %v1645_v18  ;;  %v1484_v12 = vld [vmem:[%s6333_s3 + $0x848] sm:$0xff]  ;;  %v1766_v18 = vld [vmem:[%s6333_s3 + $0x1118] sm:$0xff] }
 0x10b   : > { %1956 = vmatpush.msrb.mxu3 %v1364_v17  ;;  %1916 = vmatpush.msrb.mxu1 %v1747_v34  ;;  %v1652_v17 = vld [vmem:[%s6333_s3 + $0xd88] sm:$0xff] }
 0x10c   : > { %1939 = vmatpush.msrb.mxu2 %v1250_v16  ;;  %1898 = vmatpush.msrb.mxu0 %v1639_v21  ;;  %v1478_v16 = vld [vmem:[%s6333_s3 + $0x818] sm:$0xff]  ;;  %v1760_v21 = vld [vmem:[%s6333_s3 + $0x10e8] sm:$0xff] }
 0x10d   : > { %1957 = vmatpush.msrb.mxu3 %v1358_v63  ;;  %1917 = vmatpush.msrb.mxu1 %v1741_v41  ;;  %v1699_v63 = vld [vmem:[%s6333_s3 + $0xf00] sm:$0xff]  ;;  %v1580_v34 = vld [vmem:[%s6333_s3 + $0xb48] sm:$0xff]  ;;  %v1730_v41 = vld [vmem:[%s6333_s3 + $0xff8] sm:$0xff] }
 0x10e   : > { %1940 = vmatpush.msrb.mxu2 %v1244_v20  ;;  %1899 = vmatpush.msrb.mxu0 %v1633_v5  ;;  %v1646_v20 = vld [vmem:[%s6333_s3 + $0xd58] sm:$0xff] }
 0x10f   : > { %1958 = vmatpush.msrb.mxu3 %v1352_v23  ;;  %1918 = vmatpush.msrb.mxu1 %v1735_v51  ;;  %v1598_v23 = vld [vmem:[%s6333_s3 + $0xbd8] sm:$0xff]  ;;  %v1503_v51 = vld [vmem:[%s6333_s3 + $0x8e0] sm:$0xff] }
 0x110   : > { %1941 = vmatpush.msrb.mxu2 %v1238_v62  ;;  %1900 = vmatpush.msrb.mxu0 %v1627_v27  ;;  %v1640_v62 = vld [vmem:[%s6333_s3 + $0xd28] sm:$0xff]  ;;  %v1754_v5 = vld [vmem:[%s6333_s3 + $0x10b8] sm:$0xff] }
 0x111   : > { %v990_v31 = vpop.f32.mrf.mxu0  ;;  %1959 = vmatpush.msrb.mxu3 %v1346_v4  ;;  %1919 = vmatpush.msrb.mxu1 %v1729_v57  ;;  %v1748_v4 = vld [vmem:[%s6333_s3 + $0x1088] sm:$0xff]  ;;  %v1454_v27 = vld [vmem:[%s6333_s3 + $0x758] sm:$0xff]  ;;  %v1497_v57 = vld [vmem:[%s6333_s3 + $0x8b0] sm:$0xff] }
 0x112   : > { %1942 = vmatpush.msrb.mxu2 %v1232_v25  ;;  %v991_v36 = vadd.f32 %v990_v31, %v724_v26  ;;  %1901 = vmatpush.msrb.mxu0 %v1621_v32  ;;  %v1634_v25 = vld [vmem:[%s6333_s3 + $0xcf8] sm:$0xff]  ;;  %v1592_v26 = vld [vmem:[%s6333_s3 + $0xba8] sm:$0xff] }
 0x113   : > { %1960 = vmatpush.msrb.mxu3 %v1340_v30  ;;  %1920 = vmatpush.msrb.mxu1 %v1723_v61  ;;  %v1742_v30 = vld [vmem:[%s6333_s3 + $0x1058] sm:$0xff]  ;;  %v1448_v31 = vld [vmem:[%s6333_s3 + $0x728] sm:$0xff] }
 0x114   : > { %1943 = vmatpush.msrb.mxu2 %v1226_v29  ;;  %v1010_v43 = vpop.f32.mrf.mxu1  ;;  %1902 = vmatpush.msrb.mxu0 %v1615_v38  ;;  %v1586_v29 = vld [vmem:[%s6333_s3 + $0xb78] sm:$0xff] }
 0x115   : > { %v1011_v45 = vadd.f32 %v1010_v43, %v991_v36  ;;  %v1030_v46 = vpop.f32.mrf.mxu2  ;;  %1961 = vmatpush.msrb.mxu3 %v1334_v37  ;;  %1921 = vmatpush.msrb.mxu1 %v1717_v6  ;;  %v1622_v32 = vld [vmem:[%s6333_s3 + $0xc98] sm:$0xff]  ;;  %v1616_v37 = vld [vmem:[%s6333_s3 + $0xc68] sm:$0xff] }
 0x116   : > { %1944 = vmatpush.msrb.mxu2 %v1220_v35  ;;  %1903 = vmatpush.msrb.mxu0 %v1609_v47  ;;  %v1736_v35 = vld [vmem:[%s6333_s3 + $0x1028] sm:$0xff]  ;;  %v1442_v36 = vld [vmem:[%s6333_s3 + $0x6f8] sm:$0xff] }
 0x117   : > { %1945 = vmatmul.f32.vlgmr.msrb.gmra.mxu2 %v4338_v39  ;;  %v1031_v52 = vadd.f32 %v1030_v46, %v1011_v45  ;;  %1962 = vmatpush.msrb.mxu3 %v1328_v44  ;;  %v1574_v38 = vld [vmem:[%s6333_s3 + $0xb18] sm:$0xff]  ;;  %v725_v44 = vperm.slane %v4198_v33, 4  ;;  %v1568_v45 = vld [vmem:[%s6333_s3 + $0xae8] sm:$0xff] }
 0x118   : > { %2009 = vmatpush.msra.mxu2 %v1694_v42  ;;  %v1050_v55 = vpop.f32.mrf.mxu3  ;;  %1904 = vmatpush.msrb.mxu0 %v1603_v53  ;;  %v1436_v42 = vld [vmem:[%s6333_s3 + $0x6c8] sm:$0xff]  ;;  %v1610_v43 = vld [vmem:[%s6333_s3 + $0xc38] sm:$0xff] }
 0x119   : > { %v1051_v58 = vadd.f32 %v1050_v55, %v1031_v52  ;;  %1963 = vmatpush.msrb.mxu3 %v1322_v49  ;;  %1922 = vmatpush.msrb.mxu1 %v1711_v10  ;;  %v1724_v46 = vld [vmem:[%s6333_s3 + $0xfc8] sm:$0xff]  ;;  %v1430_v47 = vld [vmem:[%s6333_s3 + $0x698] sm:$0xff] }
 0x11a   : > { %2010 = vmatpush.msra.mxu2 %v1688_v48  ;;  %1969 = vmatpush.msra.mxu0 %v1502_v59  ;;  %v1604_v48 = vld [vmem:[%s6333_s3 + $0xc08] sm:$0xff]  ;;  %v1562_v49 = vld [vmem:[%s6333_s3 + $0xab8] sm:$0xff] }
 0x11b   : > { %v4553_v0 = vmax.f32 %v1051_v58, 0.0  ;;  %1964 = vmatpush.msrb.mxu3 %v1316_v56  ;;  %1923 = vmatpush.msrb.mxu1 %v1705_v14  ;;  %v1718_v53 = vld [vmem:[%s6333_s3 + $0xf98] sm:$0xff]  ;;  %v1424_v55 = vld [vmem:[%s6333_s3 + $0x668] sm:$0xff] }
 0x11c   : > { %2011 = vmatpush.msra.mxu2 %v1682_v54  ;;  %1970 = vmatpush.msra.mxu0 %v1496_v2  ;;  %v1556_v56 = vld [vmem:[%s6333_s3 + $0xa88] sm:$0xff]  ;;  %v1550_v61 = vld [vmem:[%s6333_s3 + $0xa58] sm:$0xff] }
 0x11d   : > { %1885 = vmatmul.f32.vlgmr.msra.gmra.mxu3 %v4553_v0  ;;  %1924 = vmatpush.msrb.mxu1 %v1699_v63  ;;  %v1712_v58 = vld [vmem:[%s6333_s3 + $0xf68] sm:$0xff]  ;;  %v1706_v6 = vld [vmem:[%s6333_s3 + $0xf38] sm:$0xff]  ;;  %v1587_v63 = vld [vmem:[%s6333_s3 + $0xb80] sm:$0xff] }
 0x11e   : > { %2012 = vmatpush.msra.mxu2 %v1676_v60  ;;  %2029 = vmatpush.msra.mxu3 %v1790_v1  ;;  %v1418_v60 = vld [vmem:[%s6333_s3 + $0x638] sm:$0xff]  ;;  %v1491_v1 = vld [vmem:[%s6333_s3 + $0x880] sm:$0xff] }
 0x11f   : > { %1971 = vmatpush.msra.mxu0 %v1490_v8  ;;  %1989 = vmatpush.msra.mxu1 %v1598_v23  ;;  %v1544_v8 = vld [vmem:[%s6333_s3 + $0xa28] sm:$0xff]  ;;  %v1538_v14 = vld [vmem:[%s6333_s3 + $0x9f8] sm:$0xff] }
 0x120   : > { %2013 = vmatpush.msra.mxu2 %v1670_v3  ;;  %2030 = vmatpush.msra.mxu3 %v1784_v7  ;;  %v1412_v7 = vld [vmem:[%s6333_s3 + $0x608] sm:$0xff] }
 0x121   : > { %1972 = vmatpush.msra.mxu0 %v1484_v12  ;;  %1990 = vmatpush.msra.mxu1 %v1592_v26  ;;  %v1532_v23 = vld [vmem:[%s6333_s3 + $0x9c8] sm:$0xff]  ;;  %v1526_v26 = vld [vmem:[%s6333_s3 + $0x998] sm:$0xff] }
 0x122   : > { %2014 = vmatpush.msra.mxu2 %v1664_v9  ;;  %2031 = vmatpush.msra.mxu3 %v1778_v11  ;;  %v1485_v9 = vld [vmem:[%s6333_s3 + $0x850] sm:$0xff]  ;;  %v1700_v11 = vld [vmem:[%s6333_s3 + $0xf08] sm:$0xff] }
 0x123   : > { %1973 = vmatpush.msra.mxu0 %v1478_v16  ;;  %1991 = vmatpush.msra.mxu1 %v1586_v29  ;;  %v1449_v29 = vld [vmem:[%s6333_s3 + $0x730] sm:$0xff] }
 0x124   : > { %2015 = vmatpush.msra.mxu2 %v1658_v13  ;;  %2032 = vmatpush.msra.mxu3 %v1772_v15  ;;  %v1599_v13 = vld [vmem:[%s6333_s3 + $0xbe0] sm:$0xff] }
 0x125   : > { %1965 = vmatmul.f32.vlgmr.msrb.gmra.mxu3 %v4340_v40  ;;  %1974 = vmatpush.msra.mxu0 %v1472_v19  ;;  %v1479_v15 = vld [vmem:[%s6333_s3 + $0x820] sm:$0xff]  ;;  %v1473_v19 = vld [vmem:[%s6333_s3 + $0x7f0] sm:$0xff] }
 0x126   : > { %2016 = vmatpush.msra.mxu2 %v1652_v17  ;;  %2033 = vmatpush.msra.mxu3 %v1766_v18  ;;  %v1593_v17 = vld [vmem:[%s6333_s3 + $0xbb0] sm:$0xff] }
 0x127   : > { %1975 = vmatpush.msra.mxu0 %v1466_v22  ;;  %1992 = vmatpush.msra.mxu1 %v1580_v34  ;;  %v1305_v22 = vld [vmem:[%s6333_s3 + $0x2b0] sm:$0xff]  ;;  %v1443_v34 = vld [vmem:[%s6333_s3 + $0x700] sm:$0xff] }
 0x128   : > { %2017 = vmatpush.msra.mxu2 %v1646_v20  ;;  %2034 = vmatpush.msra.mxu3 %v1760_v21  ;;  %v1311_v20 = vld [vmem:[%s6333_s3 + $0x2e0] sm:$0xff] }
 0x129   : > { %1976 = vmatpush.msra.mxu0 %v1460_v24  ;;  %1993 = vmatpush.msra.mxu1 %v1574_v38  ;;  %v1467_v21 = vld [vmem:[%s6333_s3 + $0x7c0] sm:$0xff]  ;;  %v1437_v38 = vld [vmem:[%s6333_s3 + $0x6d0] sm:$0xff] }
 0x12a   : > { %2018 = vmatpush.msra.mxu2 %v1640_v62  ;;  %2035 = vmatpush.msra.mxu3 %v1754_v5  ;;  %v1581_v62 = vld [vmem:[%s6333_s3 + $0xb50] sm:$0xff]  ;;  %v1299_v24 = vld [vmem:[%s6333_s3 + $0x280] sm:$0xff] }
 0x12b   : > { %1977 = vmatpush.msra.mxu0 %v1454_v27  ;;  %1994 = vmatpush.msra.mxu1 %v1568_v45  ;;  %v1461_v5 = vld [vmem:[%s6333_s3 + $0x790] sm:$0xff] }
 0x12c   : > { %2019 = vmatpush.msra.mxu2 %v1634_v25  ;;  %2036 = vmatpush.msra.mxu3 %v1748_v4  ;;  %v1575_v25 = vld [vmem:[%s6333_s3 + $0xb20] sm:$0xff]  ;;  %v1293_v27 = vld [vmem:[%s6333_s3 + $0x250] sm:$0xff] }
 0x12d   : > { %1978 = vmatpush.msra.mxu0 %v1448_v31  ;;  %1995 = vmatpush.msra.mxu1 %v1562_v49  ;;  %v1455_v4 = vld [vmem:[%s6333_s3 + $0x760] sm:$0xff]  ;;  %v1269_v45 = vld [vmem:[%s6333_s3 + $0x190] sm:$0xff] }
 0x12e   : > { %2020 = vmatpush.msra.mxu2 %v1628_v28  ;;  %2037 = vmatpush.msra.mxu3 %v1742_v30  ;;  %v1569_v28 = vld [vmem:[%s6333_s3 + $0xaf0] sm:$0xff]  ;;  %v1287_v30 = vld [vmem:[%s6333_s3 + $0x220] sm:$0xff] }
 0x12f   : > { %1979 = vmatpush.msra.mxu0 %v1442_v36  ;;  %1996 = vmatpush.msra.mxu1 %v1556_v56  ;;  %v1563_v31 = vld [vmem:[%s6333_s3 + $0xac0] sm:$0xff]  ;;  %v1557_v36 = vld [vmem:[%s6333_s3 + $0xa90] sm:$0xff]  ;;  %v726_v56 = vperm.slane %v4198_v33, 5  ;;  %v1306_v33 = vld [vmem:[%s6333_s3 + $0x2b8] sm:$0xff] }
 0x130   : > { %2021 = vmatpush.msra.mxu2 %v1622_v32  ;;  %2038 = vmatpush.msra.mxu3 %v1736_v35  ;;  %v1520_v32 = vld [vmem:[%s6333_s3 + $0x968] sm:$0xff]  ;;  %v1281_v35 = vld [vmem:[%s6333_s3 + $0x1f0] sm:$0xff]  ;;  %v1539_v49 = vld [vmem:[%s6333_s3 + $0xa00] sm:$0xff] }
 0x131   : > { %1980 = vmatpush.msra.mxu0 %v1436_v42  ;;  %1997 = vmatpush.msra.mxu1 %v1550_v61  ;;  %v1551_v42 = vld [vmem:[%s6333_s3 + $0xa60] sm:$0xff] }
 0x132   : > { %2022 = vmatpush.msra.mxu2 %v1616_v37  ;;  %2039 = vmatpush.msra.mxu3 %v1730_v41  ;;  %v1514_v37 = vld [vmem:[%s6333_s3 + $0x938] sm:$0xff]  ;;  %v1275_v41 = vld [vmem:[%s6333_s3 + $0x1c0] sm:$0xff] }
 0x133   : > { %v1070_v52 = vpop.f32.mrf.mxu0  ;;  %1981 = vmatpush.msra.mxu0 %v1430_v47  ;;  %1998 = vmatpush.msra.mxu1 %v1544_v8  ;;  %v1425_v47 = vld [vmem:[%s6333_s3 + $0x670] sm:$0xff] }
 0x134   : > { %2023 = vmatpush.msra.mxu2 %v1610_v43  ;;  %v1071_v54 = vadd.f32 %v1070_v52, %v725_v44  ;;  %2040 = vmatpush.msra.mxu3 %v1724_v46  ;;  %v1508_v43 = vld [vmem:[%s6333_s3 + $0x908] sm:$0xff]  ;;  %v1431_v44 = vld [vmem:[%s6333_s3 + $0x6a0] sm:$0xff]  ;;  %v1545_v46 = vld [vmem:[%s6333_s3 + $0xa30] sm:$0xff] }
 0x135   : > { %1982 = vmatpush.msra.mxu0 %v1424_v55  ;;  %1999 = vmatpush.msra.mxu1 %v1538_v14  ;;  %v1257_v52 = vld [vmem:[%s6333_s3 + $0x130] sm:$0xff]  ;;  %v1251_v55 = vld [vmem:[%s6333_s3 + $0x100] sm:$0xff] }
 0x136   : > { %2024 = vmatpush.msra.mxu2 %v1604_v48  ;;  %v1090_v59 = vpop.f32.mrf.mxu1  ;;  %2041 = vmatpush.msra.mxu3 %v1718_v53  ;;  %v1263_v48 = vld [vmem:[%s6333_s3 + $0x160] sm:$0xff]  ;;  %v1533_v53 = vld [vmem:[%s6333_s3 + $0x9d0] sm:$0xff] }
 0x137   : > { %v1091_v2 = vadd.f32 %v1090_v59, %v1071_v54  ;;  %v1110_v3 = vpop.f32.mrf.mxu2  ;;  %1983 = vmatpush.msra.mxu0 %v1418_v60  ;;  %2000 = vmatpush.msra.mxu1 %v1532_v23  ;;  %v1413_v54 = vld [vmem:[%s6333_s3 + $0x610] sm:$0xff]  ;;  %v1408_v23 = vld [vmem:[%s6333_s3 + $0x5e8] sm:$0xff] }
 0x138   : > { %2089 = vmatpush.msrb.mxu2 %v1503_v51  ;;  %2042 = vmatpush.msra.mxu3 %v1712_v58  ;;  %v1419_v51 = vld [vmem:[%s6333_s3 + $0x640] sm:$0xff]  ;;  %v1312_v58 = vld [vmem:[%s6333_s3 + $0x2e8] sm:$0xff]  ;;  %v1245_v59 = vld [vmem:[%s6333_s3 + $0xd0] sm:$0xff] }
 0x139   : > { %v1111_v10 = vadd.f32 %v1110_v3, %v1091_v2  ;;  %1984 = vmatpush.msra.mxu0 %v1412_v7  ;;  %2001 = vmatpush.msra.mxu1 %v1526_v26  ;;  %v1521_v60 = vld [vmem:[%s6333_s3 + $0x970] sm:$0xff]  ;;  %v1515_v3 = vld [vmem:[%s6333_s3 + $0x940] sm:$0xff]  ;;  %v1402_v26 = vld [vmem:[%s6333_s3 + $0x5b8] sm:$0xff] }
 0x13a   : > { %2090 = vmatpush.msrb.mxu2 %v1497_v57  ;;  %v1130_v12 = vpop.f32.mrf.mxu3  ;;  %2043 = vmatpush.msra.mxu3 %v1706_v6  ;;  %v1527_v57 = vld [vmem:[%s6333_s3 + $0x9a0] sm:$0xff]  ;;  %v1300_v6 = vld [vmem:[%s6333_s3 + $0x288] sm:$0xff]  ;;  %v1233_v7 = vld [vmem:[%s6333_s3 + $0x70] sm:$0xff] }
 0x13b   : > { %v1131_v16 = vadd.f32 %v1130_v12, %v1111_v10  ;;  %2002 = vmatpush.msra.mxu1 %v1520_v32  ;;  %v1389_v32 = vld [vmem:[%s6333_s3 + $0x550] sm:$0xff] }
 0x13c   : > { %2091 = vmatpush.msrb.mxu2 %v1491_v1  ;;  %2044 = vmatpush.msra.mxu3 %v1700_v11  ;;  %v1239_v1 = vld [vmem:[%s6333_s3 + $0xa0] sm:$0xff]  ;;  %v1294_v11 = vld [vmem:[%s6333_s3 + $0x258] sm:$0xff] }
 0x13d   : > { %v4753_v18 = vmax.f32 %v1131_v16, 0.0  ;;  %2003 = vmatpush.msra.mxu1 %v1514_v37  ;;  %v1221_v16 = vld [vmem:[%s6333_s3 + $0x10] sm:$0xff]  ;;  %v1671_v37 = vld [vmem:[%s6333_s3 + $0xe20] sm:$0xff] }
 0x13e   : > { %2092 = vmatpush.msrb.mxu2 %v1485_v9  ;;  %2109 = vmatpush.msrb.mxu3 %v1599_v13  ;;  %v1509_v9 = vld [vmem:[%s6333_s3 + $0x910] sm:$0xff]  ;;  %v1227_v13 = vld [vmem:[%s6333_s3 + $0x40] sm:$0xff] }
 0x13f   : > { %1905 = vmatmul.f32.vlgmr.msrb.gmra.mxu0 %v4753_v18  ;;  %2025 = vmatmul.f32.vlgmr.msra.gmra.mxu2 %v4753_v18 }
 0x140   : > { %2093 = vmatpush.msrb.mxu2 %v1479_v15  ;;  %2110 = vmatpush.msrb.mxu3 %v1593_v17  ;;  %v1288_v15 = vld [vmem:[%s6333_s3 + $0x228] sm:$0xff] }
 0x141   : > { %2049 = vmatpush.msrb.mxu0 %v1311_v20  ;;  %2004 = vmatpush.msra.mxu1 %v1508_v43  ;;  %v1282_v20 = vld [vmem:[%s6333_s3 + $0x1f8] sm:$0xff]  ;;  %v1665_v43 = vld [vmem:[%s6333_s3 + $0xdf0] sm:$0xff] }
 0x142   : > { %2094 = vmatpush.msrb.mxu2 %v1473_v19  ;;  %2111 = vmatpush.msrb.mxu3 %v1587_v63  ;;  %v1695_v63 = vld [vmem:[%s6333_s3 + $0xee0] sm:$0xff] }
 0x143   : > { %2050 = vmatpush.msrb.mxu0 %v1305_v22  ;;  %v1276_v22 = vld [vmem:[%s6333_s3 + $0x1c8] sm:$0xff] }
 0x144   : > { %2095 = vmatpush.msrb.mxu2 %v1467_v21  ;;  %2112 = vmatpush.msrb.mxu3 %v1581_v62  ;;  %v1407_v62 = vld [vmem:[%s6333_s3 + $0x5e0] sm:$0xff] }
 0x145   : > { %2051 = vmatpush.msrb.mxu0 %v1299_v24  ;;  %v1270_v24 = vld [vmem:[%s6333_s3 + $0x198] sm:$0xff] }
 0x146   : > { %2096 = vmatpush.msrb.mxu2 %v1461_v5  ;;  %2113 = vmatpush.msrb.mxu3 %v1575_v25  ;;  %v1689_v5 = vld [vmem:[%s6333_s3 + $0xeb0] sm:$0xff] }
 0x147   : > { %2052 = vmatpush.msrb.mxu0 %v1293_v27  ;;  %v1401_v25 = vld [vmem:[%s6333_s3 + $0x5b0] sm:$0xff]  ;;  %v1264_v27 = vld [vmem:[%s6333_s3 + $0x168] sm:$0xff] }
 0x148   : > { %2097 = vmatpush.msrb.mxu2 %v1455_v4  ;;  %1985 = vmatmul.f32.vlgmr.msra.gmra.mxu0 %v4362_v50  ;;  %v1683_v4 = vld [vmem:[%s6333_s3 + $0xe80] sm:$0xff] }
 0x149   : > { %2114 = vmatpush.msrb.mxu3 %v1569_v28  ;;  %2053 = vmatpush.msrb.mxu0 %v1287_v30  ;;  %v1395_v28 = vld [vmem:[%s6333_s3 + $0x580] sm:$0xff]  ;;  %v1677_v30 = vld [vmem:[%s6333_s3 + $0xe50] sm:$0xff] }
 0x14a   : > { %2098 = vmatpush.msrb.mxu2 %v1449_v29  ;;  %v1396_v29 = vld [vmem:[%s6333_s3 + $0x588] sm:$0xff] }
 0x14b   : > { %2115 = vmatpush.msrb.mxu3 %v1563_v31  ;;  %2054 = vmatpush.msrb.mxu0 %v1281_v35  ;;  %v1258_v31 = vld [vmem:[%s6333_s3 + $0x138] sm:$0xff]  ;;  %v1252_v35 = vld [vmem:[%s6333_s3 + $0x108] sm:$0xff] }
 0x14c   : > { %2099 = vmatpush.msrb.mxu2 %v1443_v34  ;;  %v1390_v34 = vld [vmem:[%s6333_s3 + $0x558] sm:$0xff] }
 0x14d   : > { %2116 = vmatpush.msrb.mxu3 %v1557_v36  ;;  %2055 = vmatpush.msrb.mxu0 %v1275_v41  ;;  %v1383_v36 = vld [vmem:[%s6333_s3 + $0x520] sm:$0xff]  ;;  %v1384_v41 = vld [vmem:[%s6333_s3 + $0x528] sm:$0xff] }
 0x14e   : > { %2100 = vmatpush.msrb.mxu2 %v1437_v38  ;;  %v1246_v38 = vld [vmem:[%s6333_s3 + $0xd8] sm:$0xff] }
 0x14f   : > { %2117 = vmatpush.msrb.mxu3 %v1551_v42  ;;  %2056 = vmatpush.msrb.mxu0 %v1269_v45  ;;  %v1377_v42 = vld [vmem:[%s6333_s3 + $0x4f0] sm:$0xff]  ;;  %v1378_v45 = vld [vmem:[%s6333_s3 + $0x4f8] sm:$0xff] }
 0x150   : > { %2101 = vmatpush.msrb.mxu2 %v1431_v44  ;;  %v1240_v44 = vld [vmem:[%s6333_s3 + $0xa8] sm:$0xff] }
 0x151   : > { %2118 = vmatpush.msrb.mxu3 %v1545_v46  ;;  %2057 = vmatpush.msrb.mxu0 %v1263_v48  ;;  %v1371_v46 = vld [vmem:[%s6333_s3 + $0x4c0] sm:$0xff]  ;;  %v1234_v48 = vld [vmem:[%s6333_s3 + $0x78] sm:$0xff] }
 0x152   : > { %2102 = vmatpush.msrb.mxu2 %v1425_v47  ;;  %v1659_v47 = vld [vmem:[%s6333_s3 + $0xdc0] sm:$0xff] }
 0x153   : > { %2119 = vmatpush.msrb.mxu3 %v1539_v49  ;;  %2058 = vmatpush.msrb.mxu0 %v1257_v52  ;;  %v1372_v49 = vld [vmem:[%s6333_s3 + $0x4c8] sm:$0xff]  ;;  %v1653_v52 = vld [vmem:[%s6333_s3 + $0xd90] sm:$0xff] }
 0x154   : > { %2103 = vmatpush.msrb.mxu2 %v1419_v51  ;;  %v1365_v51 = vld [vmem:[%s6333_s3 + $0x490] sm:$0xff] }
 0x155   : > { %2120 = vmatpush.msrb.mxu3 %v1533_v53  ;;  %2059 = vmatpush.msrb.mxu0 %v1251_v55  ;;  %v1150_v61 = vpop.f32.mrf.mxu0  ;;  %v1228_v53 = vld [vmem:[%s6333_s3 + $0x48] sm:$0xff]  ;;  %v1359_v55 = vld [vmem:[%s6333_s3 + $0x460] sm:$0xff] }
 0x156   : > { %2104 = vmatpush.msrb.mxu2 %v1413_v54  ;;  %v1151_v2 = vadd.f32 %v1150_v61, %v726_v56  ;;  %v1366_v54 = vld [vmem:[%s6333_s3 + $0x498] sm:$0xff]  ;;  %v1647_v56 = vld [vmem:[%s6333_s3 + $0xd60] sm:$0xff] }
 0x157   : > { %2105 = vmatmul.f32.vlgmr.msrb.gmra.mxu2 %v4362_v50  ;;  %2121 = vmatpush.msrb.mxu3 %v1527_v57  ;;  %v1222_v57 = vld [vmem:[%s6333_s3 + $0x18] sm:$0xff] }
 0x158   : > { %2169 = vmatpush.msra.mxu2 %v1312_v58  ;;  %2060 = vmatpush.msrb.mxu0 %v1245_v59  ;;  %v1170_v8 = vpop.f32.mrf.mxu1  ;;  %v1360_v58 = vld [vmem:[%s6333_s3 + $0x468] sm:$0xff]  ;;  %v1353_v59 = vld [vmem:[%s6333_s3 + $0x430] sm:$0xff]  ;;  %v1354_v61 = vld [vmem:[%s6333_s3 + $0x438] sm:$0xff] }
 0x159   : > { %2122 = vmatpush.msrb.mxu3 %v1521_v60  ;;  %v1171_v10 = vadd.f32 %v1170_v8, %v1151_v2  ;;  %v1190_v12 = vpop.f32.mrf.mxu2  ;;  %v1696_v60 = vld [vmem:[%s6333_s3 + $0xee8] sm:$0xff]  ;;  %v1690_v2 = vld [vmem:[%s6333_s3 + $0xeb8] sm:$0xff] }
 0x15a   : > { %2170 = vmatpush.msra.mxu2 %v1306_v33  ;;  %2061 = vmatpush.msrb.mxu0 %v1239_v1  ;;  %v1641_v33 = vld [vmem:[%s6333_s3 + $0xd30] sm:$0xff]  ;;  %v1347_v1 = vld [vmem:[%s6333_s3 + $0x400] sm:$0xff]  ;;  %v1684_v8 = vld [vmem:[%s6333_s3 + $0xe88] sm:$0xff] }
 0x15b   : > { %2123 = vmatpush.msrb.mxu3 %v1515_v3  ;;  %v1191_v14 = vadd.f32 %v1190_v12, %v1171_v10  ;;  %v1635_v3 = vld [vmem:[%s6333_s3 + $0xd00] sm:$0xff]  ;;  %v1342_v10 = vld [vmem:[%s6333_s3 + $0x3d8] sm:$0xff] }
 0x15c   : > { %2171 = vmatpush.msra.mxu2 %v1300_v6  ;;  %2062 = vmatpush.msrb.mxu0 %v1233_v7  ;;  %v1210_v17 = vpop.f32.mrf.mxu3  ;;  %v1348_v6 = vld [vmem:[%s6333_s3 + $0x408] sm:$0xff]  ;;  %v1341_v7 = vld [vmem:[%s6333_s3 + $0x3d0] sm:$0xff]  ;;  %v1678_v12 = vld [vmem:[%s6333_s3 + $0xe58] sm:$0xff] }
 0x15d   : > { %2124 = vmatpush.msrb.mxu3 %v1509_v9  ;;  %v1211_v19 = vadd.f32 %v1210_v17, %v1191_v14  ;;  %v1629_v9 = vld [vmem:[%s6333_s3 + $0xcd0] sm:$0xff]  ;;  %v1336_v14 = vld [vmem:[%s6333_s3 + $0x3a8] sm:$0xff] }
 0x15e   : > { %2172 = vmatpush.msra.mxu2 %v1294_v11  ;;  %2063 = vmatpush.msrb.mxu0 %v1227_v13  ;;  %v1335_v11 = vld [vmem:[%s6333_s3 + $0x3a0] sm:$0xff]  ;;  %v1617_v17 = vld [vmem:[%s6333_s3 + $0xc70] sm:$0xff] }
 0x15f   : > { %v4919_v21 = vmax.f32 %v1211_v19, 0.0  ;;  %v1623_v13 = vld [vmem:[%s6333_s3 + $0xca0] sm:$0xff]  ;;  %v1330_v19 = vld [vmem:[%s6333_s3 + $0x378] sm:$0xff] }
 0x160   : > { %2173 = vmatpush.msra.mxu2 %v1288_v15  ;;  %2064 = vmatpush.msrb.mxu0 %v1221_v16  ;;  %v1329_v15 = vld [vmem:[%s6333_s3 + $0x370] sm:$0xff]  ;;  %v1672_v16 = vld [vmem:[%s6333_s3 + $0xe28] sm:$0xff] }
 0x161   : > { %2065 = vmatmul.f32.vlgmr.msrb.gmra.mxu0 %v4338_v39  ;;  %1925 = vmatmul.f32.vlgmr.msrb.gmra.mxu1 %v4919_v21 }
 0x162   : > { %2174 = vmatpush.msra.mxu2 %v1282_v20  ;;  %2129 = vmatpush.msra.mxu0 %v1695_v63  ;;  %v1323_v20 = vld [vmem:[%s6333_s3 + $0x340] sm:$0xff]  ;;  %v1666_v63 = vld [vmem:[%s6333_s3 + $0xdf8] sm:$0xff] }
 0x163   : > { %2045 = vmatmul.f32.vlgmr.msra.gmra.mxu3 %v4919_v21  ;;  %2069 = vmatpush.msrb.mxu1 %v1407_v62  ;;  %v1324_v62 = vld [vmem:[%s6333_s3 + $0x348] sm:$0xff] }
 0x164   : > { %2175 = vmatpush.msra.mxu2 %v1276_v22  ;;  %2189 = vmatpush.msra.mxu3 %v1408_v23  ;;  %v1611_v22 = vld [vmem:[%s6333_s3 + $0xc40] sm:$0xff]  ;;  %v1317_v23 = vld [vmem:[%s6333_s3 + $0x310] sm:$0xff] }
 0x165   : > { %2130 = vmatpush.msra.mxu0 %v1689_v5  ;;  %2070 = vmatpush.msrb.mxu1 %v1401_v25  ;;  %v1660_v5 = vld [vmem:[%s6333_s3 + $0xdc8] sm:$0xff]  ;;  %v1318_v25 = vld [vmem:[%s6333_s3 + $0x318] sm:$0xff] }
 0x166   : > { %2176 = vmatpush.msra.mxu2 %v1270_v24  ;;  %2190 = vmatpush.msra.mxu3 %v1402_v26  ;;  %v1605_v24 = vld [vmem:[%s6333_s3 + $0xc10] sm:$0xff]  ;;  %v1791_v26 = vld [vmem:[%s6333_s3 + $0x11e0] sm:$0xff] }
 0x167   : > { %2131 = vmatpush.msra.mxu0 %v1683_v4  ;;  %2071 = vmatpush.msrb.mxu1 %v1395_v28  ;;  %v1504_v4 = vld [vmem:[%s6333_s3 + $0x8e8] sm:$0xff] }
 0x168   : > { %2177 = vmatpush.msra.mxu2 %v1264_v27  ;;  %2191 = vmatpush.msra.mxu3 %v1396_v29  ;;  %v1654_v27 = vld [vmem:[%s6333_s3 + $0xd98] sm:$0xff]  ;;  %v1792_v28 = vld [vmem:[%s6333_s3 + $0x11e8] sm:$0xff]  ;;  %v1785_v29 = vld [vmem:[%s6333_s3 + $0x11b0] sm:$0xff] }
 0x169   : > { %2132 = vmatpush.msra.mxu0 %v1677_v30  ;;  %2072 = vmatpush.msrb.mxu1 %v1389_v32  ;;  %v1498_v30 = vld [vmem:[%s6333_s3 + $0x8b8] sm:$0xff] }
 0x16a   : > { %2178 = vmatpush.msra.mxu2 %v1258_v31  ;;  %2192 = vmatpush.msra.mxu3 %v1390_v34  ;;  %v1648_v31 = vld [vmem:[%s6333_s3 + $0xd68] sm:$0xff]  ;;  %v1786_v32 = vld [vmem:[%s6333_s3 + $0x11b8] sm:$0xff]  ;;  %v1779_v34 = vld [vmem:[%s6333_s3 + $0x1180] sm:$0xff] }
 0x16b   : > { %2005 = vmatmul.f32.vlgmr.msra.gmra.mxu1 %v4553_v0  ;;  %2125 = vmatmul.f32.vlgmr.msrb.gmra.mxu3 %v4553_v0 }
 0x16c   : > { %2179 = vmatpush.msra.mxu2 %v1252_v35  ;;  %2073 = vmatpush.msrb.mxu1 %v1383_v36  ;;  %v1492_v35 = vld [vmem:[%s6333_s3 + $0x888] sm:$0xff]  ;;  %v1642_v36 = vld [vmem:[%s6333_s3 + $0xd38] sm:$0xff] }
 0x16d   : > { %2133 = vmatpush.msra.mxu0 %v1671_v37  ;;  %2193 = vmatpush.msra.mxu3 %v1384_v41  ;;  %v1780_v37 = vld [vmem:[%s6333_s3 + $0x1188] sm:$0xff]  ;;  %v1486_v41 = vld [vmem:[%s6333_s3 + $0x858] sm:$0xff] }
 0x16e   : > { %2180 = vmatpush.msra.mxu2 %v1246_v38  ;;  %2074 = vmatpush.msrb.mxu1 %v1377_v42  ;;  %v1773_v38 = vld [vmem:[%s6333_s3 + $0x1150] sm:$0xff]  ;;  %v1636_v42 = vld [vmem:[%s6333_s3 + $0xd08] sm:$0xff] }
 0x16f   : > { %2134 = vmatpush.msra.mxu0 %v1665_v43  ;;  %2194 = vmatpush.msra.mxu3 %v1378_v45  ;;  %v1774_v43 = vld [vmem:[%s6333_s3 + $0x1158] sm:$0xff]  ;;  %v1480_v45 = vld [vmem:[%s6333_s3 + $0x828] sm:$0xff] }
 0x170   : > { %2181 = vmatpush.msra.mxu2 %v1240_v44  ;;  %2075 = vmatpush.msrb.mxu1 %v1371_v46  ;;  %v1767_v44 = vld [vmem:[%s6333_s3 + $0x1120] sm:$0xff]  ;;  %v1630_v46 = vld [vmem:[%s6333_s3 + $0xcd8] sm:$0xff] }
 0x171   : > { %2135 = vmatpush.msra.mxu0 %v1659_v47  ;;  %2195 = vmatpush.msra.mxu3 %v1372_v49  ;;  %v1768_v47 = vld [vmem:[%s6333_s3 + $0x1128] sm:$0xff]  ;;  %v1474_v49 = vld [vmem:[%s6333_s3 + $0x7f8] sm:$0xff] }
 0x172   : > { %2182 = vmatpush.msra.mxu2 %v1234_v48  ;;  %2076 = vmatpush.msrb.mxu1 %v1365_v51  ;;  %v1761_v48 = vld [vmem:[%s6333_s3 + $0x10f0] sm:$0xff]  ;;  %v1624_v51 = vld [vmem:[%s6333_s3 + $0xca8] sm:$0xff] }
 0x173   : > { %2136 = vmatpush.msra.mxu0 %v1653_v52  ;;  %2196 = vmatpush.msra.mxu3 %v1366_v54  ;;  %v1762_v52 = vld [vmem:[%s6333_s3 + $0x10f8] sm:$0xff]  ;;  %v1468_v54 = vld [vmem:[%s6333_s3 + $0x7c8] sm:$0xff] }
 0x174   : > { %2183 = vmatpush.msra.mxu2 %v1228_v53  ;;  %2077 = vmatpush.msrb.mxu1 %v1359_v55  ;;  %v1755_v53 = vld [vmem:[%s6333_s3 + $0x10c0] sm:$0xff]  ;;  %v1618_v55 = vld [vmem:[%s6333_s3 + $0xc78] sm:$0xff] }
 0x175   : > { %2137 = vmatpush.msra.mxu0 %v1647_v56  ;;  %2197 = vmatpush.msra.mxu3 %v1360_v58  ;;  %v1756_v56 = vld [vmem:[%s6333_s3 + $0x10c8] sm:$0xff]  ;;  %v1462_v58 = vld [vmem:[%s6333_s3 + $0x798] sm:$0xff] }
 0x176   : > { %2184 = vmatpush.msra.mxu2 %v1222_v57  ;;  %2078 = vmatpush.msrb.mxu1 %v1353_v59  ;;  %v1749_v57 = vld [vmem:[%s6333_s3 + $0x1090] sm:$0xff]  ;;  %v1612_v59 = vld [vmem:[%s6333_s3 + $0xc48] sm:$0xff] }
 0x177   : > { %2185 = vmatmul.f32.vlgmr.msra.gmra.mxu2 %v4338_v39  ;;  %2138 = vmatpush.msra.mxu0 %v1641_v33  ;;  %v1743_v33 = vld [vmem:[%s6333_s3 + $0x1060] sm:$0xff] }
 0x178   : > { %2249 = vmatpush.msrb.mxu2 %v1696_v60  ;;  %2198 = vmatpush.msra.mxu3 %v1354_v61  ;;  %v1750_v60 = vld [vmem:[%s6333_s3 + $0x1098] sm:$0xff]  ;;  %v1456_v61 = vld [vmem:[%s6333_s3 + $0x768] sm:$0xff] }
 0x179   : > { %2079 = vmatpush.msrb.mxu1 %v1347_v1  ;;  %2139 = vmatpush.msra.mxu0 %v1635_v3  ;;  %v1606_v1 = vld [vmem:[%s6333_s3 + $0xc18] sm:$0xff]  ;;  %v1737_v3 = vld [vmem:[%s6333_s3 + $0x1030] sm:$0xff] }
 0x17a   : > { %2250 = vmatpush.msrb.mxu2 %v1690_v2  ;;  %2199 = vmatpush.msra.mxu3 %v1348_v6  ;;  %v1744_v2 = vld [vmem:[%s6333_s3 + $0x1068] sm:$0xff]  ;;  %v1505_v6 = vld [vmem:[%s6333_s3 + $0x8f0] sm:$0xff] }
 0x17b   : > { %2080 = vmatpush.msrb.mxu1 %v1341_v7  ;;  %2140 = vmatpush.msra.mxu0 %v1629_v9  ;;  %v1450_v7 = vld [vmem:[%s6333_s3 + $0x738] sm:$0xff]  ;;  %v1731_v9 = vld [vmem:[%s6333_s3 + $0x1000] sm:$0xff] }
 0x17c   : > { %2251 = vmatpush.msrb.mxu2 %v1684_v8  ;;  %2200 = vmatpush.msra.mxu3 %v1342_v10  ;;  %v1738_v8 = vld [vmem:[%s6333_s3 + $0x1038] sm:$0xff]  ;;  %v1499_v10 = vld [vmem:[%s6333_s3 + $0x8c0] sm:$0xff] }
 0x17d   : > { %2081 = vmatpush.msrb.mxu1 %v1335_v11  ;;  %2141 = vmatpush.msra.mxu0 %v1623_v13  ;;  %v1444_v11 = vld [vmem:[%s6333_s3 + $0x708] sm:$0xff]  ;;  %v1725_v13 = vld [vmem:[%s6333_s3 + $0xfd0] sm:$0xff] }
 0x17e   : > { %2252 = vmatpush.msrb.mxu2 %v1678_v12  ;;  %2201 = vmatpush.msra.mxu3 %v1336_v14  ;;  %v1732_v12 = vld [vmem:[%s6333_s3 + $0x1008] sm:$0xff]  ;;  %v1493_v14 = vld [vmem:[%s6333_s3 + $0x890] sm:$0xff] }
 0x17f   : > { %2082 = vmatpush.msrb.mxu1 %v1329_v15  ;;  %2142 = vmatpush.msra.mxu0 %v1617_v17  ;;  %v1438_v15 = vld [vmem:[%s6333_s3 + $0x6d8] sm:$0xff]  ;;  %v1719_v17 = vld [vmem:[%s6333_s3 + $0xfa0] sm:$0xff] }
 0x180   : > { %2253 = vmatpush.msrb.mxu2 %v1672_v16  ;;  %2202 = vmatpush.msra.mxu3 %v1330_v19  ;;  %v1726_v16 = vld [vmem:[%s6333_s3 + $0xfd8] sm:$0xff]  ;;  %v1487_v19 = vld [vmem:[%s6333_s3 + $0x860] sm:$0xff] }
 0x181   : > { %2083 = vmatpush.msrb.mxu1 %v1323_v20  ;;  %2143 = vmatpush.msra.mxu0 %v1611_v22  ;;  %v1432_v20 = vld [vmem:[%s6333_s3 + $0x6a8] sm:$0xff]  ;;  %v1713_v22 = vld [vmem:[%s6333_s3 + $0xf70] sm:$0xff] }
 0x182   : > { %2254 = vmatpush.msrb.mxu2 %v1666_v63  ;;  %2203 = vmatpush.msra.mxu3 %v1324_v62  ;;  %v1720_v63 = vld [vmem:[%s6333_s3 + $0xfa8] sm:$0xff]  ;;  %v1481_v62 = vld [vmem:[%s6333_s3 + $0x830] sm:$0xff] }
 0x183   : > { %2084 = vmatpush.msrb.mxu1 %v1317_v23  ;;  %2144 = vmatpush.msra.mxu0 %v1605_v24  ;;  %v1426_v23 = vld [vmem:[%s6333_s3 + $0x678] sm:$0xff]  ;;  %v1707_v24 = vld [vmem:[%s6333_s3 + $0xf40] sm:$0xff] }
 0x184   : > { %2255 = vmatpush.msrb.mxu2 %v1660_v5  ;;  %2204 = vmatpush.msra.mxu3 %v1318_v25  ;;  %v1714_v5 = vld [vmem:[%s6333_s3 + $0xf78] sm:$0xff]  ;;  %v1475_v25 = vld [vmem:[%s6333_s3 + $0x800] sm:$0xff] }
 0x185   : > { %2085 = vmatmul.f32.vlgmr.msrb.gmra.mxu1 %v4340_v40  ;;  %2145 = vmatmul.f32.vlgmr.msra.gmra.mxu0 %v4753_v18 }
 0x186   : > { %2149 = vmatpush.msra.mxu1 %v1791_v26  ;;  %2205 = vmatmul.f32.vlgmr.msra.gmra.mxu3 %v4340_v40  ;;  %v1420_v26 = vld [vmem:[%s6333_s3 + $0x648] sm:$0xff] }
 0x187   : > { %2209 = vmatpush.msrb.mxu0 %v1504_v4  ;;  %2256 = vmatpush.msrb.mxu2 %v1654_v27  ;;  %v1708_v4 = vld [vmem:[%s6333_s3 + $0xf48] sm:$0xff]  ;;  %v1701_v27 = vld [vmem:[%s6333_s3 + $0xf10] sm:$0xff] }
 0x188   : > { %2269 = vmatpush.msrb.mxu3 %v1792_v28  ;;  %2150 = vmatpush.msra.mxu1 %v1785_v29  ;;  %v1469_v28 = vld [vmem:[%s6333_s3 + $0x7d0] sm:$0xff]  ;;  %v1414_v29 = vld [vmem:[%s6333_s3 + $0x618] sm:$0xff] }
 0x189   : > { %2210 = vmatpush.msrb.mxu0 %v1498_v30  ;;  %2257 = vmatpush.msrb.mxu2 %v1648_v31  ;;  %v1702_v30 = vld [vmem:[%s6333_s3 + $0xf18] sm:$0xff]  ;;  %v1600_v31 = vld [vmem:[%s6333_s3 + $0xbe8] sm:$0xff] }
 0x18a   : > { %2270 = vmatpush.msrb.mxu3 %v1786_v32  ;;  %2151 = vmatpush.msra.mxu1 %v1779_v34  ;;  %v1313_v32 = vld [vmem:[%s6333_s3 + $0x2f0] sm:$0xff]  ;;  %v1463_v34 = vld [vmem:[%s6333_s3 + $0x7a0] sm:$0xff] }
 0x18b   : > { %2211 = vmatpush.msrb.mxu0 %v1492_v35  ;;  %2258 = vmatpush.msrb.mxu2 %v1642_v36  ;;  %v1601_v35 = vld [vmem:[%s6333_s3 + $0xbf0] sm:$0xff]  ;;  %v1594_v36 = vld [vmem:[%s6333_s3 + $0xbb8] sm:$0xff] }
 0x18c   : > { %2271 = vmatpush.msrb.mxu3 %v1780_v37  ;;  %2152 = vmatpush.msra.mxu1 %v1773_v38  ;;  %v1307_v37 = vld [vmem:[%s6333_s3 + $0x2c0] sm:$0xff]  ;;  %v1457_v38 = vld [vmem:[%s6333_s3 + $0x770] sm:$0xff] }
 0x18d   : > { %2212 = vmatpush.msrb.mxu0 %v1486_v41  ;;  %2259 = vmatpush.msrb.mxu2 %v1636_v42  ;;  %v1595_v41 = vld [vmem:[%s6333_s3 + $0xbc0] sm:$0xff]  ;;  %v1588_v42 = vld [vmem:[%s6333_s3 + $0xb88] sm:$0xff] }
 0x18e   : > { %2272 = vmatpush.msrb.mxu3 %v1774_v43  ;;  %2153 = vmatpush.msra.mxu1 %v1767_v44  ;;  %v1301_v43 = vld [vmem:[%s6333_s3 + $0x290] sm:$0xff]  ;;  %v1451_v44 = vld [vmem:[%s6333_s3 + $0x740] sm:$0xff] }
 0x18f   : > { %2213 = vmatpush.msrb.mxu0 %v1480_v45  ;;  %2260 = vmatpush.msrb.mxu2 %v1630_v46  ;;  %v1589_v45 = vld [vmem:[%s6333_s3 + $0xb90] sm:$0xff]  ;;  %v1582_v46 = vld [vmem:[%s6333_s3 + $0xb58] sm:$0xff] }
 0x190   : > { %2273 = vmatpush.msrb.mxu3 %v1768_v47  ;;  %2154 = vmatpush.msra.mxu1 %v1761_v48  ;;  %v1295_v47 = vld [vmem:[%s6333_s3 + $0x260] sm:$0xff]  ;;  %v1445_v48 = vld [vmem:[%s6333_s3 + $0x710] sm:$0xff] }
 0x191   : > { %2214 = vmatpush.msrb.mxu0 %v1474_v49  ;;  %2261 = vmatpush.msrb.mxu2 %v1624_v51  ;;  %v1583_v49 = vld [vmem:[%s6333_s3 + $0xb60] sm:$0xff]  ;;  %v1576_v51 = vld [vmem:[%s6333_s3 + $0xb28] sm:$0xff] }
 0x192   : > { %2274 = vmatpush.msrb.mxu3 %v1762_v52  ;;  %2155 = vmatpush.msra.mxu1 %v1755_v53  ;;  %v1289_v52 = vld [vmem:[%s6333_s3 + $0x230] sm:$0xff]  ;;  %v1439_v53 = vld [vmem:[%s6333_s3 + $0x6e0] sm:$0xff] }
 0x193   : > { %2215 = vmatpush.msrb.mxu0 %v1468_v54  ;;  %2262 = vmatpush.msrb.mxu2 %v1618_v55  ;;  %v1577_v54 = vld [vmem:[%s6333_s3 + $0xb30] sm:$0xff]  ;;  %v1570_v55 = vld [vmem:[%s6333_s3 + $0xaf8] sm:$0xff] }
 0x194   : > { %2275 = vmatpush.msrb.mxu3 %v1756_v56  ;;  %2156 = vmatpush.msra.mxu1 %v1749_v57  ;;  %v1283_v56 = vld [vmem:[%s6333_s3 + $0x200] sm:$0xff]  ;;  %v1433_v57 = vld [vmem:[%s6333_s3 + $0x6b0] sm:$0xff] }
 0x195   : > { %2216 = vmatpush.msrb.mxu0 %v1462_v58  ;;  %2263 = vmatpush.msrb.mxu2 %v1612_v59  ;;  %v1571_v58 = vld [vmem:[%s6333_s3 + $0xb00] sm:$0xff]  ;;  %v1564_v59 = vld [vmem:[%s6333_s3 + $0xac8] sm:$0xff] }
 0x196   : > { %2276 = vmatpush.msrb.mxu3 %v1750_v60  ;;  %2157 = vmatpush.msra.mxu1 %v1743_v33  ;;  %v1277_v60 = vld [vmem:[%s6333_s3 + $0x1d0] sm:$0xff]  ;;  %v1427_v33 = vld [vmem:[%s6333_s3 + $0x680] sm:$0xff] }
 0x197   : > { %2217 = vmatpush.msrb.mxu0 %v1456_v61  ;;  %2264 = vmatpush.msrb.mxu2 %v1606_v1  ;;  %v1565_v61 = vld [vmem:[%s6333_s3 + $0xad0] sm:$0xff]  ;;  %v1558_v1 = vld [vmem:[%s6333_s3 + $0xa98] sm:$0xff] }
 0x198   : > { %2277 = vmatpush.msrb.mxu3 %v1744_v2  ;;  %2265 = vmatmul.f32.vlgmr.msrb.gmra.mxu2 %v4753_v18  ;;  %v1271_v2 = vld [vmem:[%s6333_s3 + $0x1a0] sm:$0xff] }
 0x199   : > { %2158 = vmatpush.msra.mxu1 %v1737_v3  ;;  %2329 = vmatpush.msra.mxu2 %v1505_v6  ;;  %v1421_v3 = vld [vmem:[%s6333_s3 + $0x650] sm:$0xff]  ;;  %v1559_v6 = vld [vmem:[%s6333_s3 + $0xaa0] sm:$0xff] }
 0x19a   : > { %2218 = vmatpush.msrb.mxu0 %v1450_v7  ;;  %2278 = vmatpush.msrb.mxu3 %v1738_v8  ;;  %v1552_v7 = vld [vmem:[%s6333_s3 + $0xa68] sm:$0xff]  ;;  %v1265_v8 = vld [vmem:[%s6333_s3 + $0x170] sm:$0xff] }
 0x19b   : > { %2159 = vmatpush.msra.mxu1 %v1731_v9  ;;  %2330 = vmatpush.msra.mxu2 %v1499_v10  ;;  %v1415_v9 = vld [vmem:[%s6333_s3 + $0x620] sm:$0xff]  ;;  %v1553_v10 = vld [vmem:[%s6333_s3 + $0xa70] sm:$0xff] }
 0x19c   : > { %2219 = vmatpush.msrb.mxu0 %v1444_v11  ;;  %2279 = vmatpush.msrb.mxu3 %v1732_v12  ;;  %v1546_v11 = vld [vmem:[%s6333_s3 + $0xa38] sm:$0xff] }
 0x19d   : > { %2160 = vmatpush.msra.mxu1 %v1725_v13  ;;  %2331 = vmatpush.msra.mxu2 %v1493_v14  ;;  %v1314_v12 = vld [vmem:[%s6333_s3 + $0x2f8] sm:$0xff]  ;;  %v1259_v13 = vld [vmem:[%s6333_s3 + $0x140] sm:$0xff] }
 0x19e   : > { %2220 = vmatpush.msrb.mxu0 %v1438_v15  ;;  %2280 = vmatpush.msrb.mxu3 %v1726_v16  ;;  %v1547_v14 = vld [vmem:[%s6333_s3 + $0xa40] sm:$0xff]  ;;  %v1540_v15 = vld [vmem:[%s6333_s3 + $0xa08] sm:$0xff] }
 0x19f   : > { %2161 = vmatpush.msra.mxu1 %v1719_v17  ;;  %2332 = vmatpush.msra.mxu2 %v1487_v19  ;;  %v1308_v16 = vld [vmem:[%s6333_s3 + $0x2c8] sm:$0xff]  ;;  %v1253_v17 = vld [vmem:[%s6333_s3 + $0x110] sm:$0xff] }
 0x1a0   : > { %2221 = vmatpush.msrb.mxu0 %v1432_v20  ;;  %2281 = vmatpush.msrb.mxu3 %v1720_v63  ;;  %v1541_v19 = vld [vmem:[%s6333_s3 + $0xa10] sm:$0xff]  ;;  %v1534_v20 = vld [vmem:[%s6333_s3 + $0x9d8] sm:$0xff] }
 0x1a1   : > { %2162 = vmatpush.msra.mxu1 %v1713_v22  ;;  %2333 = vmatpush.msra.mxu2 %v1481_v62  ;;  %v1302_v63 = vld [vmem:[%s6333_s3 + $0x298] sm:$0xff]  ;;  %v1247_v22 = vld [vmem:[%s6333_s3 + $0xe0] sm:$0xff] }
 0x1a2   : > { %2222 = vmatpush.msrb.mxu0 %v1426_v23  ;;  %2282 = vmatpush.msrb.mxu3 %v1714_v5  ;;  %v1535_v62 = vld [vmem:[%s6333_s3 + $0x9e0] sm:$0xff]  ;;  %v1528_v23 = vld [vmem:[%s6333_s3 + $0x9a8] sm:$0xff] }
 0x1a3   : > { %2163 = vmatpush.msra.mxu1 %v1707_v24  ;;  %2334 = vmatpush.msra.mxu2 %v1475_v25  ;;  %v1296_v5 = vld [vmem:[%s6333_s3 + $0x268] sm:$0xff]  ;;  %v1241_v24 = vld [vmem:[%s6333_s3 + $0xb0] sm:$0xff] }
 0x1a4   : > { %2223 = vmatpush.msrb.mxu0 %v1420_v26  ;;  %2283 = vmatpush.msrb.mxu3 %v1708_v4  ;;  %v1529_v25 = vld [vmem:[%s6333_s3 + $0x9b0] sm:$0xff]  ;;  %v1522_v26 = vld [vmem:[%s6333_s3 + $0x978] sm:$0xff] }
 0x1a5   : > { %2164 = vmatpush.msra.mxu1 %v1701_v27  ;;  %2335 = vmatpush.msra.mxu2 %v1469_v28  ;;  %v1290_v4 = vld [vmem:[%s6333_s3 + $0x238] sm:$0xff]  ;;  %v1235_v27 = vld [vmem:[%s6333_s3 + $0x80] sm:$0xff] }
 0x1a6   : > { %2224 = vmatpush.msrb.mxu0 %v1414_v29  ;;  %2284 = vmatpush.msrb.mxu3 %v1702_v30  ;;  %v1523_v28 = vld [vmem:[%s6333_s3 + $0x980] sm:$0xff]  ;;  %v1516_v29 = vld [vmem:[%s6333_s3 + $0x948] sm:$0xff] }
 0x1a7   : > { %2165 = vmatmul.f32.vlgmr.msra.gmra.mxu1 %v4919_v21  ;;  %2225 = vmatmul.f32.vlgmr.msrb.gmra.mxu0 %v4362_v50  ;;  %v1284_v30 = vld [vmem:[%s6333_s3 + $0x208] sm:$0xff] }
 0x1a8   : > { %2229 = vmatpush.msrb.mxu1 %v1600_v31  ;;  %2285 = vmatmul.f32.vlgmr.msrb.gmra.mxu3 %v4919_v21  ;;  %v1229_v31 = vld [vmem:[%s6333_s3 + $0x50] sm:$0xff] }
 0x1a9   : > { %2289 = vmatpush.msra.mxu0 %v1313_v32  ;;  %2336 = vmatpush.msra.mxu2 %v1463_v34  ;;  %v1517_v32 = vld [vmem:[%s6333_s3 + $0x950] sm:$0xff]  ;;  %v1510_v34 = vld [vmem:[%s6333_s3 + $0x918] sm:$0xff] }
 0x1aa   : > { %2349 = vmatpush.msra.mxu3 %v1601_v35  ;;  %2230 = vmatpush.msrb.mxu1 %v1594_v36  ;;  %v1278_v35 = vld [vmem:[%s6333_s3 + $0x1d8] sm:$0xff]  ;;  %v1223_v36 = vld [vmem:[%s6333_s3 + $0x20] sm:$0xff] }
 0x1ab   : > { %2290 = vmatpush.msra.mxu0 %v1307_v37  ;;  %2337 = vmatpush.msra.mxu2 %v1457_v38  ;;  %v1511_v37 = vld [vmem:[%s6333_s3 + $0x920] sm:$0xff]  ;;  %v1409_v38 = vld [vmem:[%s6333_s3 + $0x5f0] sm:$0xff] }
 0x1ac   : > { %2350 = vmatpush.msra.mxu3 %v1595_v41  ;;  %2231 = vmatpush.msrb.mxu1 %v1588_v42  ;;  %v1697_v41 = vld [vmem:[%s6333_s3 + $0xef0] sm:$0xff]  ;;  %v1272_v42 = vld [vmem:[%s6333_s3 + $0x1a8] sm:$0xff] }
 0x1ad   : > { %2291 = vmatpush.msra.mxu0 %v1301_v43  ;;  %2338 = vmatpush.msra.mxu2 %v1451_v44  ;;  %v1410_v43 = vld [vmem:[%s6333_s3 + $0x5f8] sm:$0xff]  ;;  %v1403_v44 = vld [vmem:[%s6333_s3 + $0x5c0] sm:$0xff] }
 0x1ae   : > { %2351 = vmatpush.msra.mxu3 %v1589_v45  ;;  %2232 = vmatpush.msrb.mxu1 %v1582_v46  ;;  %v1691_v45 = vld [vmem:[%s6333_s3 + $0xec0] sm:$0xff]  ;;  %v1266_v46 = vld [vmem:[%s6333_s3 + $0x178] sm:$0xff] }
 0x1af   : > { %2292 = vmatpush.msra.mxu0 %v1295_v47  ;;  %2339 = vmatpush.msra.mxu2 %v1445_v48  ;;  %v1404_v47 = vld [vmem:[%s6333_s3 + $0x5c8] sm:$0xff]  ;;  %v1397_v48 = vld [vmem:[%s6333_s3 + $0x590] sm:$0xff] }
 0x1b0   : > { %2352 = vmatpush.msra.mxu3 %v1583_v49  ;;  %2233 = vmatpush.msrb.mxu1 %v1576_v51  ;;  %v1685_v49 = vld [vmem:[%s6333_s3 + $0xe90] sm:$0xff]  ;;  %v1260_v51 = vld [vmem:[%s6333_s3 + $0x148] sm:$0xff] }
 0x1b1   : > { %2293 = vmatpush.msra.mxu0 %v1289_v52  ;;  %2340 = vmatpush.msra.mxu2 %v1439_v53  ;;  %v1398_v52 = vld [vmem:[%s6333_s3 + $0x598] sm:$0xff]  ;;  %v1391_v53 = vld [vmem:[%s6333_s3 + $0x560] sm:$0xff] }
 0x1b2   : > { %2353 = vmatpush.msra.mxu3 %v1577_v54  ;;  %2234 = vmatpush.msrb.mxu1 %v1570_v55  ;;  %v1679_v54 = vld [vmem:[%s6333_s3 + $0xe60] sm:$0xff]  ;;  %v1254_v55 = vld [vmem:[%s6333_s3 + $0x118] sm:$0xff] }
 0x1b3   : > { %2294 = vmatpush.msra.mxu0 %v1283_v56  ;;  %2341 = vmatpush.msra.mxu2 %v1433_v57  ;;  %v1392_v56 = vld [vmem:[%s6333_s3 + $0x568] sm:$0xff]  ;;  %v1385_v57 = vld [vmem:[%s6333_s3 + $0x530] sm:$0xff] }
 0x1b4   : > { %2354 = vmatpush.msra.mxu3 %v1571_v58  ;;  %2235 = vmatpush.msrb.mxu1 %v1564_v59  ;;  %v1673_v58 = vld [vmem:[%s6333_s3 + $0xe30] sm:$0xff]  ;;  %v1248_v59 = vld [vmem:[%s6333_s3 + $0xe8] sm:$0xff] }
 0x1b5   : > { %2295 = vmatpush.msra.mxu0 %v1277_v60  ;;  %2342 = vmatpush.msra.mxu2 %v1427_v33  ;;  %v1386_v60 = vld [vmem:[%s6333_s3 + $0x538] sm:$0xff]  ;;  %v1379_v33 = vld [vmem:[%s6333_s3 + $0x500] sm:$0xff] }
 0x1b6   : > { %2355 = vmatpush.msra.mxu3 %v1565_v61  ;;  %2236 = vmatpush.msrb.mxu1 %v1558_v1  ;;  %v1667_v61 = vld [vmem:[%s6333_s3 + $0xe00] sm:$0xff]  ;;  %v1242_v1 = vld [vmem:[%s6333_s3 + $0xb8] sm:$0xff] }
 0x1b7   : > { %2296 = vmatpush.msra.mxu0 %v1271_v2  ;;  %2343 = vmatpush.msra.mxu2 %v1421_v3  ;;  %v1380_v2 = vld [vmem:[%s6333_s3 + $0x508] sm:$0xff]  ;;  %v1373_v3 = vld [vmem:[%s6333_s3 + $0x4d0] sm:$0xff] }
 0x1b8   : > { %2356 = vmatpush.msra.mxu3 %v1559_v6  ;;  %2237 = vmatpush.msrb.mxu1 %v1552_v7  ;;  %v1661_v6 = vld [vmem:[%s6333_s3 + $0xdd0] sm:$0xff]  ;;  %v1236_v7 = vld [vmem:[%s6333_s3 + $0x88] sm:$0xff] }
 0x1b9   : > { %2297 = vmatpush.msra.mxu0 %v1265_v8  ;;  %2344 = vmatpush.msra.mxu2 %v1415_v9  ;;  %v1374_v8 = vld [vmem:[%s6333_s3 + $0x4d8] sm:$0xff]  ;;  %v1367_v9 = vld [vmem:[%s6333_s3 + $0x4a0] sm:$0xff] }
 0x1ba   : > { %2357 = vmatpush.msra.mxu3 %v1553_v10  ;;  %2345 = vmatmul.f32.vlgmr.msra.gmra.mxu2 %v4362_v50  ;;  %v1655_v10 = vld [vmem:[%s6333_s3 + $0xda0] sm:$0xff] }
 0x1bb   : > { %2238 = vmatpush.msrb.mxu1 %v1546_v11  ;;  %2409 = vmatpush.msrb.mxu2 %v1314_v12  ;;  %v1230_v11 = vld [vmem:[%s6333_s3 + $0x58] sm:$0xff]  ;;  %v1368_v12 = vld [vmem:[%s6333_s3 + $0x4a8] sm:$0xff] }
 0x1bc   : > { %2298 = vmatpush.msra.mxu0 %v1259_v13  ;;  %2358 = vmatpush.msra.mxu3 %v1547_v14  ;;  %v1361_v13 = vld [vmem:[%s6333_s3 + $0x470] sm:$0xff] }
 0x1bd   : > { %2239 = vmatpush.msrb.mxu1 %v1540_v15  ;;  %2410 = vmatpush.msrb.mxu2 %v1308_v16  ;;  %v1649_v14 = vld [vmem:[%s6333_s3 + $0xd70] sm:$0xff]  ;;  %v1224_v15 = vld [vmem:[%s6333_s3 + $0x28] sm:$0xff]  ;;  %v1362_v16 = vld [vmem:[%s6333_s3 + $0x478] sm:$0xff] }
 0x1be   : > { %2299 = vmatpush.msra.mxu0 %v1253_v17  ;;  %2359 = vmatpush.msra.mxu3 %v1541_v19  ;;  %v1355_v17 = vld [vmem:[%s6333_s3 + $0x440] sm:$0xff]  ;;  %v1698_v19 = vld [vmem:[%s6333_s3 + $0xef8] sm:$0xff] }
 0x1bf   : > { %2240 = vmatpush.msrb.mxu1 %v1534_v20  ;;  %2411 = vmatpush.msrb.mxu2 %v1302_v63  ;;  %v1643_v20 = vld [vmem:[%s6333_s3 + $0xd40] sm:$0xff]  ;;  %v1356_v63 = vld [vmem:[%s6333_s3 + $0x448] sm:$0xff] }
 0x1c0   : > { %2300 = vmatpush.msra.mxu0 %v1247_v22  ;;  %2360 = vmatpush.msra.mxu3 %v1535_v62  ;;  %v1349_v22 = vld [vmem:[%s6333_s3 + $0x410] sm:$0xff]  ;;  %v1692_v62 = vld [vmem:[%s6333_s3 + $0xec8] sm:$0xff] }
 0x1c1   : > { %2241 = vmatpush.msrb.mxu1 %v1528_v23  ;;  %2412 = vmatpush.msrb.mxu2 %v1296_v5  ;;  %v1637_v23 = vld [vmem:[%s6333_s3 + $0xd10] sm:$0xff]  ;;  %v1350_v5 = vld [vmem:[%s6333_s3 + $0x418] sm:$0xff] }
 0x1c2   : > { %2301 = vmatpush.msra.mxu0 %v1241_v24  ;;  %2361 = vmatpush.msra.mxu3 %v1529_v25  ;;  %v1343_v24 = vld [vmem:[%s6333_s3 + $0x3e0] sm:$0xff] }
 0x1c3   : > { %2242 = vmatpush.msrb.mxu1 %v1522_v26  ;;  %2413 = vmatpush.msrb.mxu2 %v1290_v4  ;;  %v1631_v25 = vld [vmem:[%s6333_s3 + $0xce0] sm:$0xff]  ;;  %v1344_v26 = vld [vmem:[%s6333_s3 + $0x3e8] sm:$0xff]  ;;  %v1337_v4 = vld [vmem:[%s6333_s3 + $0x3b0] sm:$0xff] }
 0x1c4   : > { %2302 = vmatpush.msra.mxu0 %v1235_v27  ;;  %2362 = vmatpush.msra.mxu3 %v1523_v28  ;;  %v1680_v27 = vld [vmem:[%s6333_s3 + $0xe68] sm:$0xff]  ;;  %v1625_v28 = vld [vmem:[%s6333_s3 + $0xcb0] sm:$0xff] }
 0x1c5   : > { %2243 = vmatpush.msrb.mxu1 %v1516_v29  ;;  %2414 = vmatpush.msrb.mxu2 %v1284_v30  ;;  %v1338_v29 = vld [vmem:[%s6333_s3 + $0x3b8] sm:$0xff]  ;;  %v1331_v30 = vld [vmem:[%s6333_s3 + $0x380] sm:$0xff] }
 0x1c6   : > { %2303 = vmatpush.msra.mxu0 %v1229_v31  ;;  %2363 = vmatpush.msra.mxu3 %v1517_v32  ;;  %v1674_v31 = vld [vmem:[%s6333_s3 + $0xe38] sm:$0xff]  ;;  %v1619_v32 = vld [vmem:[%s6333_s3 + $0xc80] sm:$0xff] }
 0x1c7   : > { %2244 = vmatpush.msrb.mxu1 %v1510_v34  ;;  %2415 = vmatpush.msrb.mxu2 %v1278_v35  ;;  %v1332_v34 = vld [vmem:[%s6333_s3 + $0x388] sm:$0xff]  ;;  %v1325_v35 = vld [vmem:[%s6333_s3 + $0x350] sm:$0xff] }
 0x1c8   : > { %2304 = vmatpush.msra.mxu0 %v1223_v36  ;;  %2364 = vmatpush.msra.mxu3 %v1511_v37  ;;  %v1668_v36 = vld [vmem:[%s6333_s3 + $0xe08] sm:$0xff]  ;;  %v1613_v37 = vld [vmem:[%s6333_s3 + $0xc50] sm:$0xff] }
 0x1c9   : > { %2245 = vmatmul.f32.vlgmr.msrb.gmra.mxu1 %v4553_v0  ;;  %2305 = vmatmul.f32.vlgmr.msra.gmra.mxu0 %v4338_v39 }
 0x1ca   : > { %2309 = vmatpush.msra.mxu1 %v1409_v38  ;;  %2365 = vmatmul.f32.vlgmr.msra.gmra.mxu3 %v4553_v0  ;;  %v1326_v38 = vld [vmem:[%s6333_s3 + $0x358] sm:$0xff] }
 0x1cb   : > { %2369 = vmatpush.msrb.mxu0 %v1697_v41  ;;  %2416 = vmatpush.msrb.mxu2 %v1272_v42  ;;  %v1319_v41 = vld [vmem:[%s6333_s3 + $0x320] sm:$0xff]  ;;  %v1662_v42 = vld [vmem:[%s6333_s3 + $0xdd8] sm:$0xff] }
 0x1cc   : > { %2429 = vmatpush.msrb.mxu3 %v1410_v43  ;;  %2310 = vmatpush.msra.mxu1 %v1403_v44  ;;  %v1607_v43 = vld [vmem:[%s6333_s3 + $0xc20] sm:$0xff]  ;;  %v1320_v44 = vld [vmem:[%s6333_s3 + $0x328] sm:$0xff] }
 0x1cd   : > { %2370 = vmatpush.msrb.mxu0 %v1691_v45  ;;  %2417 = vmatpush.msrb.mxu2 %v1266_v46  ;;  %v1793_v45 = vld [vmem:[%s6333_s3 + $0x11f0] sm:$0xff]  ;;  %v1506_v46 = vld [vmem:[%s6333_s3 + $0x8f8] sm:$0xff] }
 0x1ce   : > { %2430 = vmatpush.msrb.mxu3 %v1404_v47  ;;  %2311 = vmatpush.msra.mxu1 %v1397_v48  ;;  %v1656_v47 = vld [vmem:[%s6333_s3 + $0xda8] sm:$0xff]  ;;  %v1794_v48 = vld [vmem:[%s6333_s3 + $0x11f8] sm:$0xff] }
 0x1cf   : > { %2371 = vmatpush.msrb.mxu0 %v1685_v49  ;;  %2418 = vmatpush.msrb.mxu2 %v1260_v51  ;;  %v1787_v49 = vld [vmem:[%s6333_s3 + $0x11c0] sm:$0xff]  ;;  %v1500_v51 = vld [vmem:[%s6333_s3 + $0x8c8] sm:$0xff] }
 0x1d0   : > { %2431 = vmatpush.msrb.mxu3 %v1398_v52  ;;  %2312 = vmatpush.msra.mxu1 %v1391_v53  ;;  %v1650_v52 = vld [vmem:[%s6333_s3 + $0xd78] sm:$0xff]  ;;  %v1788_v53 = vld [vmem:[%s6333_s3 + $0x11c8] sm:$0xff] }
 0x1d1   : > { %2372 = vmatpush.msrb.mxu0 %v1679_v54  ;;  %2419 = vmatpush.msrb.mxu2 %v1254_v55  ;;  %v1781_v54 = vld [vmem:[%s6333_s3 + $0x1190] sm:$0xff]  ;;  %v1494_v55 = vld [vmem:[%s6333_s3 + $0x898] sm:$0xff] }
 0x1d2   : > { %2432 = vmatpush.msrb.mxu3 %v1392_v56  ;;  %2313 = vmatpush.msra.mxu1 %v1385_v57  ;;  %v1782_v56 = vld [vmem:[%s6333_s3 + $0x1198] sm:$0xff]  ;;  %v1775_v57 = vld [vmem:[%s6333_s3 + $0x1160] sm:$0xff] }
 0x1d3   : > { %2373 = vmatpush.msrb.mxu0 %v1673_v58  ;;  %2420 = vmatpush.msrb.mxu2 %v1248_v59  ;;  %v1488_v58 = vld [vmem:[%s6333_s3 + $0x868] sm:$0xff]  ;;  %v1638_v59 = vld [vmem:[%s6333_s3 + $0xd18] sm:$0xff] }
 0x1d4   : > { %2433 = vmatpush.msrb.mxu3 %v1386_v60  ;;  %2314 = vmatpush.msra.mxu1 %v1379_v33  ;;  %v1776_v60 = vld [vmem:[%s6333_s3 + $0x1168] sm:$0xff]  ;;  %v1769_v33 = vld [vmem:[%s6333_s3 + $0x1130] sm:$0xff] }
 0x1d5   : > { %2374 = vmatpush.msrb.mxu0 %v1667_v61  ;;  %2421 = vmatpush.msrb.mxu2 %v1242_v1  ;;  %v1482_v61 = vld [vmem:[%s6333_s3 + $0x838] sm:$0xff]  ;;  %v1632_v1 = vld [vmem:[%s6333_s3 + $0xce8] sm:$0xff] }
 0x1d6   : > { %2434 = vmatpush.msrb.mxu3 %v1380_v2  ;;  %2315 = vmatpush.msra.mxu1 %v1373_v3  ;;  %v1770_v2 = vld [vmem:[%s6333_s3 + $0x1138] sm:$0xff]  ;;  %v1763_v3 = vld [vmem:[%s6333_s3 + $0x1100] sm:$0xff] }
 0x1d7   : > { %2375 = vmatpush.msrb.mxu0 %v1661_v6  ;;  %2422 = vmatpush.msrb.mxu2 %v1236_v7  ;;  %v1476_v6 = vld [vmem:[%s6333_s3 + $0x808] sm:$0xff]  ;;  %v1626_v7 = vld [vmem:[%s6333_s3 + $0xcb8] sm:$0xff] }
 0x1d8   : > { %2435 = vmatpush.msrb.mxu3 %v1374_v8  ;;  %2316 = vmatpush.msra.mxu1 %v1367_v9  ;;  %v1764_v8 = vld [vmem:[%s6333_s3 + $0x1108] sm:$0xff]  ;;  %v1757_v9 = vld [vmem:[%s6333_s3 + $0x10d0] sm:$0xff] }
 0x1d9   : > { %2376 = vmatpush.msrb.mxu0 %v1655_v10  ;;  %2423 = vmatpush.msrb.mxu2 %v1230_v11  ;;  %v1470_v10 = vld [vmem:[%s6333_s3 + $0x7d8] sm:$0xff]  ;;  %v1620_v11 = vld [vmem:[%s6333_s3 + $0xc88] sm:$0xff] }
 0x1da   : > { %2436 = vmatpush.msrb.mxu3 %v1368_v12  ;;  %2317 = vmatpush.msra.mxu1 %v1361_v13  ;;  %v1758_v12 = vld [vmem:[%s6333_s3 + $0x10d8] sm:$0xff]  ;;  %v5794_v13 = vpop.f32.mrf.mxu0 }
 0x1db   : > { %2377 = vmatpush.msrb.mxu0 %v1649_v14  ;;  %2424 = vmatpush.msrb.mxu2 %v1224_v15  ;;  %v1751_v14 = vld [vmem:[%s6333_s3 + $0x10a0] sm:$0xff]  ;;  %v1464_v15 = vld [vmem:[%s6333_s3 + $0x7a8] sm:$0xff] }
 0x1dc   : > { %2437 = vmatpush.msrb.mxu3 %v1362_v16  ;;  %2425 = vmatmul.f32.vlgmr.msrb.gmra.mxu2 %v4338_v39  ;;  %v1686_v39 = vld [vmem:[%s6333_s3 + $0xe98] sm:$0xff] }
 0x1dd   : > { %2318 = vmatpush.msra.mxu1 %v1355_v17  ;;  %2489 = vmatpush.msra.mxu2 %v1698_v19  ;;  %v1614_v16 = vld [vmem:[%s6333_s3 + $0xc58] sm:$0xff]  ;;  %v1752_v17 = vld [vmem:[%s6333_s3 + $0x10a8] sm:$0xff]  ;;  %v5808_v19 = vpop.f32.mrf.mxu1 }
 0x1de   : > { %2378 = vmatpush.msrb.mxu0 %v1643_v20  ;;  %2438 = vmatpush.msrb.mxu3 %v1356_v63  ;;  %v1745_v20 = vld [vmem:[%s6333_s3 + $0x1070] sm:$0xff]  ;;  %v1458_v63 = vld [vmem:[%s6333_s3 + $0x778] sm:$0xff] }
 0x1df   : > { %2319 = vmatpush.msra.mxu1 %v1349_v22  ;;  %2490 = vmatpush.msra.mxu2 %v1692_v62  ;;  %v1608_v22 = vld [vmem:[%s6333_s3 + $0xc28] sm:$0xff]  ;;  %v1746_v62 = vld [vmem:[%s6333_s3 + $0x1078] sm:$0xff] }
 0x1e0   : > { %2379 = vmatpush.msrb.mxu0 %v1637_v23  ;;  %2439 = vmatpush.msrb.mxu3 %v1350_v5  ;;  %v1739_v23 = vld [vmem:[%s6333_s3 + $0x1040] sm:$0xff]  ;;  %v1452_v5 = vld [vmem:[%s6333_s3 + $0x748] sm:$0xff] }
 0x1e1   : > { %2320 = vmatpush.msra.mxu1 %v1343_v24  ;;  %2491 = vmatpush.msra.mxu2 %v1686_v39  ;;  %v1740_v24 = vld [vmem:[%s6333_s3 + $0x1048] sm:$0xff]  ;;  %v1733_v39 = vld [vmem:[%s6333_s3 + $0x1010] sm:$0xff] }
 0x1e2   : > { %2380 = vmatpush.msrb.mxu0 %v1631_v25  ;;  %2440 = vmatpush.msrb.mxu3 %v1344_v26  ;;  %v2582_v25 = vld [vmem:[%s6335_s5 + $0x178] sm:$0xff] }
 0x1e3   : > { %2321 = vmatpush.msra.mxu1 %v1337_v4  ;;  %2492 = vmatpush.msra.mxu2 %v1680_v27  ;;  %v1446_v26 = vld [vmem:[%s6333_s3 + $0x718] sm:$0xff]  ;;  %v5844_v27 = vpop.f32.mrf.mxu2 }
 0x1e4   : > { %2381 = vmatpush.msrb.mxu0 %v1625_v28  ;;  %2441 = vmatpush.msrb.mxu3 %v1338_v29  ;;  %v1734_v4 = vld [vmem:[%s6333_s3 + $0x1018] sm:$0xff]  ;;  %v5846_v28 = vpop.f32.mrf.mxu0  ;;  %v1727_v29 = vld [vmem:[%s6333_s3 + $0xfe0] sm:$0xff] }
 0x1e5   : > { %2322 = vmatpush.msra.mxu1 %v1331_v30  ;;  %2493 = vmatpush.msra.mxu2 %v1674_v31  ;;  %v1440_v30 = vld [vmem:[%s6333_s3 + $0x6e8] sm:$0xff] }
 0x1e6   : > { %2382 = vmatpush.msrb.mxu0 %v1619_v32  ;;  %2442 = vmatpush.msrb.mxu3 %v1332_v34  ;;  %v1728_v31 = vld [vmem:[%s6333_s3 + $0xfe8] sm:$0xff]  ;;  %v5860_v32 = vpop.f32.mrf.mxu3  ;;  %v5862_v34 = vpop.f32.mrf.mxu1 }
 0x1e7   : > { %2323 = vmatpush.msra.mxu1 %v1325_v35  ;;  %2494 = vmatpush.msra.mxu2 %v1668_v36  ;;  %v1721_v35 = vld [vmem:[%s6333_s3 + $0xfb0] sm:$0xff]  ;;  %v2580_v36 = vld [vmem:[%s6335_s5 + $0x168] sm:$0xff] }
 0x1e8   : > { %2383 = vmatpush.msrb.mxu0 %v1613_v37  ;;  %2443 = vmatpush.msrb.mxu3 %v1326_v38  ;;  %v1434_v37 = vld [vmem:[%s6333_s3 + $0x6b8] sm:$0xff] }
 0x1e9   : > { %2324 = vmatpush.msra.mxu1 %v1319_v41  ;;  %2495 = vmatpush.msra.mxu2 %v1662_v42  ;;  %v1722_v38 = vld [vmem:[%s6333_s3 + $0xfb8] sm:$0xff]  ;;  %v1715_v41 = vld [vmem:[%s6333_s3 + $0xf80] sm:$0xff] }
 0x1ea   : > { %2384 = vmatpush.msrb.mxu0 %v1607_v43  ;;  %2444 = vmatpush.msrb.mxu3 %v1320_v44  ;;  %v2579_v42 = vld [vmem:[%s6335_s5 + $0x160] sm:$0xff]  ;;  %v1428_v43 = vld [vmem:[%s6333_s3 + $0x688] sm:$0xff] }
 0x1eb   : > { %2325 = vmatmul.f32.vlgmr.msra.gmra.mxu1 %v4340_v40  ;;  %2385 = vmatmul.f32.vlgmr.msrb.gmra.mxu0 %v4753_v18  ;;  %v1716_v44 = vld [vmem:[%s6333_s3 + $0xf88] sm:$0xff] }
 0x1ec   : > { %2389 = vmatpush.msrb.mxu1 %v1793_v45  ;;  %2445 = vmatmul.f32.vlgmr.msrb.gmra.mxu3 %v4340_v40  ;;  %v1644_v40 = vld [vmem:[%s6333_s3 + $0xd48] sm:$0xff]  ;;  %v1709_v45 = vld [vmem:[%s6333_s3 + $0xf50] sm:$0xff] }
 0x1ed   : > { %2449 = vmatpush.msra.mxu0 %v1506_v46  ;;  %2496 = vmatpush.msra.mxu2 %v1656_v47  ;;  %v2578_v46 = vld [vmem:[%s6335_s5 + $0x158] sm:$0xff] }
 0x1ee   : > { %2509 = vmatpush.msra.mxu3 %v1794_v48  ;;  %2390 = vmatpush.msrb.mxu1 %v1787_v49  ;;  %v1422_v47 = vld [vmem:[%s6333_s3 + $0x658] sm:$0xff]  ;;  %v5900_v49 = vpop.f32.mrf.mxu2 }
 0x1ef   : > { %2450 = vmatpush.msra.mxu0 %v1500_v51  ;;  %2497 = vmatpush.msra.mxu2 %v1650_v52  ;;  %v1710_v48 = vld [vmem:[%s6333_s3 + $0xf58] sm:$0xff]  ;;  %v1703_v51 = vld [vmem:[%s6333_s3 + $0xf20] sm:$0xff]  ;;  %v2577_v52 = vld [vmem:[%s6335_s5 + $0x150] sm:$0xff] }
 0x1f0   : > { %2510 = vmatpush.msra.mxu3 %v1788_v53  ;;  %2391 = vmatpush.msrb.mxu1 %v1781_v54  ;;  %v1416_v53 = vld [vmem:[%s6333_s3 + $0x628] sm:$0xff] }
 0x1f1   : > { %2451 = vmatpush.msra.mxu0 %v1494_v55  ;;  %2498 = vmatpush.msra.mxu2 %v1644_v40  ;;  %v1704_v54 = vld [vmem:[%s6333_s3 + $0xf28] sm:$0xff]  ;;  %v5914_v55 = vpop.f32.mrf.mxu0  ;;  %v1602_v40 = vld [vmem:[%s6333_s3 + $0xbf8] sm:$0xff] }
 0x1f2   : > { %2511 = vmatpush.msra.mxu3 %v1782_v56  ;;  %2392 = vmatpush.msrb.mxu1 %v1775_v57  ;;  %v5919_v56 = vpop.f32.mrf.mxu3  ;;  %v5921_v57 = vpop.f32.mrf.mxu1 }
 0x1f3   : > { %2452 = vmatpush.msra.mxu0 %v1488_v58  ;;  %2499 = vmatpush.msra.mxu2 %v1638_v59  ;;  %v2550_v58 = vld [vmem:[%s6335_s5 + $0x78] sm:$0xff]  ;;  %v2576_v59 = vld [vmem:[%s6335_s5 + $0x148] sm:$0xff] }
 0x1f4   : > { %2512 = vmatpush.msra.mxu3 %v1776_v60  ;;  %2393 = vmatpush.msrb.mxu1 %v1769_v33  ;;  %v1596_v60 = vld [vmem:[%s6333_s3 + $0xbc8] sm:$0xff]  ;;  %v2549_v33 = vld [vmem:[%s6335_s5 + $0x70] sm:$0xff] }
 0x1f5   : > { %2453 = vmatpush.msra.mxu0 %v1482_v61  ;;  %2500 = vmatpush.msra.mxu2 %v1632_v1  ;;  %v2575_v61 = vld [vmem:[%s6335_s5 + $0x140] sm:$0xff] }
 0x1f6   : > { %2513 = vmatpush.msra.mxu3 %v1770_v2  ;;  %2394 = vmatpush.msrb.mxu1 %v1763_v3  ;;  %v5947_v1 = vld [vmem:[%s6334_s4] sm:$0x3f]  ;;  %v2548_v2 = vld [vmem:[%s6335_s5 + $0x68] sm:$0xff]  ;;  %v2574_v3 = vld [vmem:[%s6335_s5 + $0x138] sm:$0xff] }
 0x1f7   : > { %2454 = vmatpush.msra.mxu0 %v1476_v6  ;;  %2501 = vmatpush.msra.mxu2 %v1626_v7  ;;  %v1799_v6 = vperm.slane %v5947_v1, 2  ;;  %v1584_v7 = vld [vmem:[%s6333_s3 + $0xb68] sm:$0xff] }
 0x1f8   : > { %2514 = vmatpush.msra.mxu3 %v1764_v8  ;;  %2395 = vmatpush.msrb.mxu1 %v1757_v9  ;;  %v2547_v9 = vld [vmem:[%s6335_s5 + $0x60] sm:$0xff] }
 0x1f9   : > { %2455 = vmatpush.msra.mxu0 %v1470_v10  ;;  %2502 = vmatpush.msra.mxu2 %v1620_v11  ;;  %v2066_v8 = vpop.f32.mrf.mxu0  ;;  %v2573_v10 = vld [vmem:[%s6335_s5 + $0x130] sm:$0xff]  ;;  %v1578_v11 = vld [vmem:[%s6333_s3 + $0xb38] sm:$0xff] }
 0x1fa   : > { %2515 = vmatpush.msra.mxu3 %v1758_v12  ;;  %2396 = vmatpush.msrb.mxu1 %v1751_v14  ;;  %v5970_v12 = vpop.f32.mrf.mxu3 }
 0x1fb   : > { %2456 = vmatpush.msra.mxu0 %v1464_v15  ;;  %2503 = vmatpush.msra.mxu2 %v1614_v16  ;;  %v2546_v15 = vld [vmem:[%s6335_s5 + $0x58] sm:$0xff]  ;;  %v2572_v16 = vld [vmem:[%s6335_s5 + $0x128] sm:$0xff] }
 0x1fc   : > { %2516 = vmatpush.msra.mxu3 %v1752_v17  ;;  %2397 = vmatpush.msrb.mxu1 %v1745_v20  ;;  %v2067_v17 = vadd.f32 %v2066_v8, %v1799_v6  ;;  %v1572_v20 = vld [vmem:[%s6333_s3 + $0xb08] sm:$0xff]  ;;  %v2591_v6 = vld [vmem:[%s6335_s5 + $0x1c0] sm:$0xff]  ;;  %v1518_v8 = vld [vmem:[%s6333_s3 + $0x958] sm:$0xff] }
 0x1fd   : > { %2457 = vmatpush.msra.mxu0 %v1458_v63  ;;  %2504 = vmatpush.msra.mxu2 %v1608_v22  ;;  %v2545_v63 = vld [vmem:[%s6335_s5 + $0x50] sm:$0xff]  ;;  %v2571_v22 = vld [vmem:[%s6335_s5 + $0x120] sm:$0xff] }
 0x1fe   : > { %2517 = vmatpush.msra.mxu3 %v1746_v62  ;;  %2505 = vmatmul.f32.vlgmr.msra.gmra.mxu2 %v4753_v18  ;;  %v2581_v18 = vld [vmem:[%s6335_s5 + $0x170] sm:$0xff] }
 0x1ff   : > { %2398 = vmatpush.msrb.mxu1 %v1739_v23  ;;  %2458 = vmatpush.msra.mxu0 %v1452_v5  ;;  %v1566_v23 = vld [vmem:[%s6333_s3 + $0xad8] sm:$0xff] }
 0x200   : > { %2518 = vmatpush.msra.mxu3 %v1740_v24  ;;  %2675 = vmatpush.msrb.mxu2 %v2582_v25  ;;  %v2598_v5 = vld [vmem:[%s6335_s5 + $0x1f8] sm:$0xff]  ;;  %v1797_v24 = vperm.slane %v5947_v1, 0 }
 0x201   : > { %2399 = vmatpush.msrb.mxu1 %v1733_v39  ;;  %2459 = vmatpush.msra.mxu0 %v1446_v26  ;;  %v2544_v39 = vld [vmem:[%s6335_s5 + $0x48] sm:$0xff]  ;;  %v2570_v25 = vld [vmem:[%s6335_s5 + $0x118] sm:$0xff] }
 0x202   : > { %2519 = vmatpush.msra.mxu3 %v1734_v4  ;;  %2676 = vmatpush.msrb.mxu2 %v2581_v18  ;;  %v2086_v14 = vpop.f32.mrf.mxu1  ;;  %v1560_v26 = vld [vmem:[%s6333_s3 + $0xaa8] sm:$0xff]  ;;  %v2597_v4 = vld [vmem:[%s6335_s5 + $0x1f0] sm:$0xff]  ;;  %v2543_v18 = vld [vmem:[%s6335_s5 + $0x40] sm:$0xff] }
 0x203   : > { %2400 = vmatpush.msrb.mxu1 %v1727_v29  ;;  %2460 = vmatpush.msra.mxu0 %v1440_v30  ;;  %v2087_v62 = vadd.f32 %v2086_v14, %v2067_v17  ;;  %v2569_v30 = vld [vmem:[%s6335_s5 + $0x110] sm:$0xff]  ;;  %v1512_v14 = vld [vmem:[%s6333_s3 + $0x928] sm:$0xff] }
 0x204   : > { %2520 = vmatpush.msra.mxu3 %v1728_v31  ;;  %2677 = vmatpush.msrb.mxu2 %v2580_v36  ;;  %v2596_v36 = vld [vmem:[%s6335_s5 + $0x1e8] sm:$0xff] }
 0x205   : > { %2401 = vmatpush.msrb.mxu1 %v1721_v35  ;;  %2461 = vmatpush.msra.mxu0 %v1434_v37  ;;  %v1554_v35 = vld [vmem:[%s6333_s3 + $0xa78] sm:$0xff]  ;;  %v1827_v37 = vadd.f32 %v5794_v13, %v1797_v24  ;;  %v2595_v13 = vld [vmem:[%s6335_s5 + $0x1e0] sm:$0xff]  ;;  %v2588_v17 = vld [vmem:[%s6335_s5 + $0x1a8] sm:$0xff] }
 0x206   : > { %2521 = vmatpush.msra.mxu3 %v1722_v38  ;;  %2678 = vmatpush.msrb.mxu2 %v2579_v42  ;;  %v2542_v38 = vld [vmem:[%s6335_s5 + $0x38] sm:$0xff]  ;;  %v1548_v42 = vld [vmem:[%s6333_s3 + $0xa48] sm:$0xff] }
 0x207   : > { %2402 = vmatpush.msrb.mxu1 %v1715_v41  ;;  %2462 = vmatpush.msra.mxu0 %v1428_v43  ;;  %v2568_v41 = vld [vmem:[%s6335_s5 + $0x108] sm:$0xff]  ;;  %v2126_v43 = vpop.f32.mrf.mxu3 }
 0x208   : > { %2522 = vmatpush.msra.mxu3 %v1716_v44  ;;  %2679 = vmatpush.msrb.mxu2 %v2578_v46  ;;  %v2541_v44 = vld [vmem:[%s6335_s5 + $0x30] sm:$0xff]  ;;  %v2584_v24 = vld [vmem:[%s6335_s5 + $0x188] sm:$0xff] }
 0x209   : > { %2403 = vmatpush.msrb.mxu1 %v1709_v45  ;;  %2463 = vmatpush.msra.mxu0 %v1422_v47  ;;  %v2567_v45 = vld [vmem:[%s6335_s5 + $0x100] sm:$0xff]  ;;  %v1542_v47 = vld [vmem:[%s6333_s3 + $0xa18] sm:$0xff] }
 0x20a   : > { %2523 = vmatpush.msra.mxu3 %v1710_v48  ;;  %2680 = vmatpush.msrb.mxu2 %v2577_v52  ;;  %v2594_v48 = vld [vmem:[%s6335_s5 + $0x1d8] sm:$0xff]  ;;  %v2540_v52 = vld [vmem:[%s6335_s5 + $0x28] sm:$0xff] }
 0x20b   : > { %2404 = vmatpush.msrb.mxu1 %v1703_v51  ;;  %2464 = vmatpush.msra.mxu0 %v1416_v53  ;;  %v1847_v51 = vadd.f32 %v5808_v19, %v1827_v37  ;;  %v1536_v53 = vld [vmem:[%s6333_s3 + $0x9e8] sm:$0xff]  ;;  %v2539_v19 = vld [vmem:[%s6335_s5 + $0x20] sm:$0xff]  ;;  %v1800_v37 = vperm.slane %v5947_v1, 3 }
 0x20c   : > { %2524 = vmatpush.msra.mxu3 %v1704_v54  ;;  %2405 = vmatmul.f32.vlgmr.msrb.gmra.mxu1 %v4919_v21  ;;  %v2593_v54 = vld [vmem:[%s6335_s5 + $0x1d0] sm:$0xff] }
 0x20d   : > { %2465 = vmatmul.f32.vlgmr.msra.gmra.mxu0 %v4362_v50  ;;  %2469 = vmatpush.msra.mxu1 %v1602_v40  ;;  %v1590_v50 = vld [vmem:[%s6333_s3 + $0xb98] sm:$0xff]  ;;  %v1867_v40 = vadd.f32 %v5844_v27, %v1847_v51 }
 0x20e   : > { %2525 = vmatmul.f32.vlgmr.msra.gmra.mxu3 %v4919_v21  ;;  %2635 = vmatpush.msrb.mxu0 %v2550_v58  ;;  %v5949_v21 = vpop.f32.mrf.mxu2  ;;  %v2146_v58 = vpop.f32.mrf.mxu0  ;;  %v2538_v27 = vld [vmem:[%s6335_s5 + $0x18] sm:$0xff] }
 0x20f   : > { %2681 = vmatpush.msrb.mxu2 %v2576_v59  ;;  %2470 = vmatpush.msra.mxu1 %v1596_v60  ;;  %v1530_v60 = vld [vmem:[%s6333_s3 + $0x9b8] sm:$0xff] }
 0x210   : > { %2636 = vmatpush.msrb.mxu0 %v2549_v33  ;;  %2695 = vmatpush.msrb.mxu3 %v2598_v5  ;;  %v2592_v33 = vld [vmem:[%s6335_s5 + $0x1c8] sm:$0xff]  ;;  %v2563_v5 = vld [vmem:[%s6335_s5 + $0xe0] sm:$0xff] }
 0x211   : > { %2682 = vmatpush.msrb.mxu2 %v2575_v61  ;;  %2471 = vmatpush.msra.mxu1 %v1590_v50  ;;  %v1887_v61 = vadd.f32 %v5860_v32, %v1867_v40  ;;  %v2537_v32 = vld [vmem:[%s6335_s5 + $0x10] sm:$0xff] }
 0x212   : > { %2637 = vmatpush.msrb.mxu0 %v2548_v2  ;;  %2696 = vmatpush.msrb.mxu3 %v2597_v4  ;;  %v1524_v2 = vld [vmem:[%s6333_s3 + $0x988] sm:$0xff]  ;;  %v2561_v4 = vld [vmem:[%s6335_s5 + $0xd0] sm:$0xff] }
 0x213   : > { %2683 = vmatpush.msrb.mxu2 %v2574_v3  ;;  %2472 = vmatpush.msra.mxu1 %v1584_v7  ;;  %v1907_v7 = vadd.f32 %v5846_v28, %v1887_v61  ;;  %v2536_v28 = vld [vmem:[%s6335_s5 + $0x8] sm:$0xff] }
 0x214   : > { %2638 = vmatpush.msrb.mxu0 %v2547_v9  ;;  %2697 = vmatpush.msrb.mxu3 %v2596_v36  ;;  %v2612_v61 = vld [vmem:[%s6335_s5 + $0x268] sm:$0xff] }
 0x215   : > { %2684 = vmatpush.msrb.mxu2 %v2573_v10  ;;  %2473 = vmatpush.msra.mxu1 %v1578_v11  ;;  %v2590_v10 = vld [vmem:[%s6335_s5 + $0x1b8] sm:$0xff]  ;;  %v1927_v11 = vadd.f32 %v5862_v34, %v1907_v7  ;;  %v2535_v34 = vld [vmem:[%s6335_s5] sm:$0xff] }
 0x216   : > { %2639 = vmatpush.msrb.mxu0 %v2546_v15  ;;  %v2106_v29 = vpop.f32.mrf.mxu2  ;;  %2698 = vmatpush.msrb.mxu3 %v2595_v13  ;;  %v2589_v15 = vld [vmem:[%s6335_s5 + $0x1b0] sm:$0xff]  ;;  %v2606_v7 = vld [vmem:[%s6335_s5 + $0x238] sm:$0xff] }
 0x217   : > { %2685 = vmatpush.msrb.mxu2 %v2572_v16  ;;  %2474 = vmatpush.msra.mxu1 %v1572_v20  ;;  %v2107_v31 = vadd.f32 %v2106_v29, %v2087_v62  ;;  %v2566_v16 = vld [vmem:[%s6335_s5 + $0xf8] sm:$0xff]  ;;  %v2529_v20 = vmax.f32 %v1927_v11, 0.0  ;;  %v2560_v29 = vld [vmem:[%s6335_s5 + $0xc8] sm:$0xff]  ;;  %v2601_v11 = vld [vmem:[%s6335_s5 + $0x210] sm:$0xff] }
 0x218   : > { %2640 = vmatpush.msrb.mxu0 %v2545_v63  ;;  %2699 = vmatpush.msrb.mxu3 %v2594_v48  ;;  %v2565_v63 = vld [vmem:[%s6335_s5 + $0xf0] sm:$0xff]  ;;  %v2586_v62 = vld [vmem:[%s6335_s5 + $0x198] sm:$0xff] }
 0x219   : > { %2686 = vmatpush.msrb.mxu2 %v2571_v22  ;;  %2475 = vmatpush.msra.mxu1 %v1566_v23  ;;  %v2127_v46 = vadd.f32 %v2126_v43, %v2107_v31  ;;  %v2587_v22 = vld [vmem:[%s6335_s5 + $0x1a0] sm:$0xff]  ;;  %v2564_v23 = vld [vmem:[%s6335_s5 + $0xe8] sm:$0xff] }
 0x21a   : > { %2641 = vmatpush.msrb.mxu0 %v2544_v39  ;;  %2700 = vmatpush.msrb.mxu3 %v2593_v54  ;;  %v2562_v39 = vld [vmem:[%s6335_s5 + $0xd8] sm:$0xff]  ;;  %v2551_v54 = vld [vmem:[%s6335_s5 + $0x80] sm:$0xff] }
 0x21b   : > { %2687 = vmatpush.msrb.mxu2 %v2570_v25  ;;  %2476 = vmatpush.msra.mxu1 %v1560_v26  ;;  %v2147_v59 = vadd.f32 %v2146_v58, %v2127_v46  ;;  %v2583_v25 = vld [vmem:[%s6335_s5 + $0x180] sm:$0xff]  ;;  %v1798_v26 = vperm.slane %v5947_v1, 1 }
 0x21c   : > { %2642 = vmatpush.msrb.mxu0 %v2543_v18  ;;  %2701 = vmatpush.msrb.mxu3 %v2592_v33  ;;  %v2613_v33 = vld [vmem:[%s6335_s5 + $0x270] sm:$0xff] }
 0x21d   : > { %2688 = vmatpush.msrb.mxu2 %v2569_v30  ;;  %2477 = vmatpush.msra.mxu1 %v1554_v35  ;;  %v1947_v18 = vadd.f32 %v5900_v49, %v1798_v26  ;;  %v2559_v30 = vld [vmem:[%s6335_s5 + $0xc0] sm:$0xff]  ;;  %v2558_v35 = vld [vmem:[%s6335_s5 + $0xb8] sm:$0xff]  ;;  %v2557_v49 = vld [vmem:[%s6335_s5 + $0xb0] sm:$0xff] }
 0x21e   : > { %2643 = vmatpush.msrb.mxu0 %v2542_v38  ;;  %2702 = vmatpush.msrb.mxu3 %v2591_v6  ;;  %v2186_v38 = vpop.f32.mrf.mxu2  ;;  %v2607_v6 = vld [vmem:[%s6335_s5 + $0x240] sm:$0xff] }
 0x21f   : > { %2689 = vmatpush.msrb.mxu2 %v2568_v41  ;;  %2478 = vmatpush.msra.mxu1 %v1548_v42  ;;  %v1967_v31 = vadd.f32 %v5919_v56, %v1947_v18  ;;  %v2556_v56 = vld [vmem:[%s6335_s5 + $0xa8] sm:$0xff]  ;;  %v2206_v42 = vpop.f32.mrf.mxu3  ;;  %v2187_v13 = vadd.f32 %v2186_v38, %v1800_v37 }
 0x220   : > { %2644 = vmatpush.msrb.mxu0 %v2541_v44  ;;  %2703 = vmatpush.msrb.mxu3 %v2590_v10  ;;  %v2602_v10 = vld [vmem:[%s6335_s5 + $0x218] sm:$0xff]  ;;  %v2620_v18 = vld [vmem:[%s6335_s5 + $0x2a8] sm:$0xff] }
 0x221   : > { %2690 = vmatpush.msrb.mxu2 %v2567_v45  ;;  %2479 = vmatpush.msra.mxu1 %v1542_v47  ;;  %v1987_v36 = vadd.f32 %v5914_v55, %v1967_v31  ;;  %v2555_v55 = vld [vmem:[%s6335_s5 + $0xa0] sm:$0xff]  ;;  %v2207_v45 = vadd.f32 %v2206_v42, %v2187_v13  ;;  %v2553_v47 = vld [vmem:[%s6335_s5 + $0x90] sm:$0xff]  ;;  %v2616_v13 = vld [vmem:[%s6335_s5 + $0x288] sm:$0xff] }
 0x222   : > { %2645 = vmatpush.msrb.mxu0 %v2540_v52  ;;  %2704 = vmatpush.msrb.mxu3 %v2589_v15  ;;  %v2552_v52 = vld [vmem:[%s6335_s5 + $0x88] sm:$0xff]  ;;  %v2630_v15 = vld [vmem:[%s6335_s5 + $0x2f8] sm:$0xff]  ;;  %v2617_v42 = vld [vmem:[%s6335_s5 + $0x290] sm:$0xff] }
 0x223   : > { %2480 = vmatpush.msra.mxu1 %v1536_v53  ;;  %v2007_v41 = vadd.f32 %v5921_v57, %v1987_v36  ;;  %v2554_v57 = vld [vmem:[%s6335_s5 + $0x98] sm:$0xff] }
 0x224   : > { %v2166_v50 = vpop.f32.mrf.mxu1  ;;  %2646 = vmatpush.msrb.mxu0 %v2539_v19  ;;  %2705 = vmatpush.msrb.mxu3 %v2588_v17  ;;  %v2226_v43 = vpop.f32.mrf.mxu0  ;;  %v2627_v17 = vld [vmem:[%s6335_s5 + $0x2e0] sm:$0xff] }
 0x225   : > { %v2167_v3 = vadd.f32 %v2166_v50, %v2147_v59  ;;  %2481 = vmatpush.msra.mxu1 %v1530_v60  ;;  %v2027_v44 = vadd.f32 %v5949_v21, %v2007_v41  ;;  %v2227_v46 = vadd.f32 %v2226_v43, %v2207_v45  ;;  %v2610_v50 = vld [vmem:[%s6335_s5 + $0x258] sm:$0xff]  ;;  %v1802_v43 = vperm.slane %v5947_v1, 5 }
 0x226   : > { %2647 = vmatpush.msrb.mxu0 %v2538_v27  ;;  %2706 = vmatpush.msrb.mxu3 %v2587_v22  ;;  %v2266_v53 = vpop.f32.mrf.mxu2  ;;  %v2611_v27 = vld [vmem:[%s6335_s5 + $0x260] sm:$0xff]  ;;  %v2618_v41 = vld [vmem:[%s6335_s5 + $0x298] sm:$0xff] }
 0x227   : > { %v2531_v9 = vmax.f32 %v2167_v3, 0.0  ;;  %2482 = vmatpush.msra.mxu1 %v1524_v2  ;;  %v2047_v51 = vadd.f32 %v5970_v12, %v2027_v44  ;;  %v2614_v12 = vld [vmem:[%s6335_s5 + $0x278] sm:$0xff]  ;;  %v2609_v2 = vld [vmem:[%s6335_s5 + $0x250] sm:$0xff]  ;;  %v2608_v3 = vld [vmem:[%s6335_s5 + $0x248] sm:$0xff] }
 0x228   : > { %2648 = vmatpush.msrb.mxu0 %v2537_v32  ;;  %2707 = vmatpush.msrb.mxu3 %v2586_v62  ;;  %v2605_v32 = vld [vmem:[%s6335_s5 + $0x230] sm:$0xff] }
 0x229   : > { %2691 = vmatmul.f32.vlgmr.msrb.gmra.mxu2 %v2531_v9  ;;  %2483 = vmatpush.msra.mxu1 %v1518_v8  ;;  %v2530_v19 = vmax.f32 %v2047_v51, 0.0  ;;  %v2604_v8 = vld [vmem:[%s6335_s5 + $0x228] sm:$0xff]  ;;  %v2603_v9 = vld [vmem:[%s6335_s5 + $0x220] sm:$0xff]  ;;  %v2625_v62 = vld [vmem:[%s6335_s5 + $0x2d0] sm:$0xff] }
 0x22a   : > { %2649 = vmatpush.msrb.mxu0 %v2536_v28  ;;  %v2600_v28 = vld [vmem:[%s6335_s5 + $0x208] sm:$0xff] }
 0x22b   : > { %2484 = vmatpush.msra.mxu1 %v1512_v14  ;;  %v2286_v58 = vpop.f32.mrf.mxu3  ;;  %v2599_v14 = vld [vmem:[%s6335_s5 + $0x200] sm:$0xff] }
 0x22c   : > { %2650 = vmatpush.msrb.mxu0 %v2535_v34  ;;  %2485 = vmatmul.f32.vlgmr.msra.gmra.mxu1 %v4553_v0  ;;  %v2585_v0 = vld [vmem:[%s6335_s5 + $0x190] sm:$0xff] }
 0x22d   : > { %2651 = vmatmul.f32.vlgmr.msrb.gmra.mxu0 %v2529_v20  ;;  %2655 = vmatpush.msrb.mxu1 %v2566_v16  ;;  %v2629_v34 = vld [vmem:[%s6335_s5 + $0x2f0] sm:$0xff]  ;;  %v2628_v16 = vld [vmem:[%s6335_s5 + $0x2e8] sm:$0xff]  ;;  %v1801_v20 = vperm.slane %v5947_v1, 4 }
 0x22e   : > { %2708 = vmatpush.msrb.mxu3 %v2585_v0  ;;  %2715 = vmatpush.msra.mxu0 %v2614_v12  ;;  %v2770_v1 = vld [vmem:[%s6337_s7 + $0x70] sm:$0xff]  ;;  %v2767_v12 = vld [vmem:[%s6337_s7 + $0x58] sm:$0xff] }
 0x22f   : > { %2656 = vmatpush.msrb.mxu1 %v2565_v63  ;;  %v2626_v63 = vld [vmem:[%s6335_s5 + $0x2d8] sm:$0xff] }
 0x230   : > { %2709 = vmatpush.msrb.mxu3 %v2584_v24  ;;  %2716 = vmatpush.msra.mxu0 %v2613_v33  ;;  %v2766_v33 = vld [vmem:[%s6337_s7 + $0x50] sm:$0xff] }
 0x231   : > { %2657 = vmatpush.msrb.mxu1 %v2564_v23 }
 0x232   : > { %2710 = vmatpush.msrb.mxu3 %v2583_v25  ;;  %2717 = vmatpush.msra.mxu0 %v2612_v61  ;;  %v2622_v25 = vld [vmem:[%s6335_s5 + $0x2b8] sm:$0xff]  ;;  %v2765_v61 = vld [vmem:[%s6337_s7 + $0x48] sm:$0xff] }
 0x233   : > { %2658 = vmatpush.msrb.mxu1 %v2563_v5  ;;  %v2624_v5 = vld [vmem:[%s6335_s5 + $0x2c8] sm:$0xff] }
 0x234   : > { %2718 = vmatpush.msra.mxu0 %v2611_v27  ;;  %v2764_v27 = vld [vmem:[%s6337_s7 + $0x40] sm:$0xff] }
 0x235   : > { %2659 = vmatpush.msrb.mxu1 %v2562_v39  ;;  %v2623_v39 = vld [vmem:[%s6335_s5 + $0x2c0] sm:$0xff] }
 0x236   : > { %2719 = vmatpush.msra.mxu0 %v2610_v50  ;;  %v2763_v50 = vld [vmem:[%s6337_s7 + $0x38] sm:$0xff] }
 0x237   : > { %2660 = vmatpush.msrb.mxu1 %v2561_v4 }
 0x238   : > { %2720 = vmatpush.msra.mxu0 %v2609_v2  ;;  %v2762_v2 = vld [vmem:[%s6337_s7 + $0x30] sm:$0xff] }
 0x239   : > { %2661 = vmatpush.msrb.mxu1 %v2560_v29  ;;  %v2621_v29 = vld [vmem:[%s6335_s5 + $0x2b0] sm:$0xff] }
 0x23a   : > { %2721 = vmatpush.msra.mxu0 %v2608_v3  ;;  %v2761_v3 = vld [vmem:[%s6337_s7 + $0x28] sm:$0xff] }
 0x23b   : > { %2662 = vmatpush.msrb.mxu1 %v2559_v30 }
 0x23c   : > { %2722 = vmatpush.msra.mxu0 %v2607_v6  ;;  %v2760_v6 = vld [vmem:[%s6337_s7 + $0x20] sm:$0xff] }
 0x23d   : > { %2663 = vmatpush.msrb.mxu1 %v2558_v35  ;;  %v2346_v26 = vpop.f32.mrf.mxu2 }
 0x23e   : > { %2723 = vmatpush.msra.mxu0 %v2606_v7  ;;  %v2759_v7 = vld [vmem:[%s6337_s7 + $0x18] sm:$0xff] }
 0x23f   : > { %2664 = vmatpush.msrb.mxu1 %v2557_v49  ;;  %v2619_v49 = vld [vmem:[%s6335_s5 + $0x2a0] sm:$0xff] }
 0x240   : > { %2724 = vmatpush.msra.mxu0 %v2605_v32  ;;  %v2758_v32 = vld [vmem:[%s6337_s7 + $0x10] sm:$0xff] }
 0x241   : > { %2665 = vmatpush.msrb.mxu1 %v2556_v56 }
 0x242   : > { %2725 = vmatpush.msra.mxu0 %v2604_v8  ;;  %v2757_v8 = vld [vmem:[%s6337_s7 + $0x8] sm:$0xff] }
 0x243   : > { %2666 = vmatpush.msrb.mxu1 %v2555_v55  ;;  %v2615_v55 = vld [vmem:[%s6335_s5 + $0x280] sm:$0xff] }
 0x244   : > { %2726 = vmatpush.msra.mxu0 %v2603_v9  ;;  %v2756_v9 = vld [vmem:[%s6337_s7] sm:$0xff] }
 0x245   : > { %2667 = vmatpush.msrb.mxu1 %v2554_v57 }
 0x246   : > { %v2246_v48 = vpop.f32.mrf.mxu1  ;;  %2727 = vmatpush.msra.mxu0 %v2602_v10  ;;  %v2306_v22 = vpop.f32.mrf.mxu0  ;;  %v2869_v10 = vld [vmem:[%s6336_s6] ss:$0 sm:$0xff] }
 0x247   : > { %v2247_v21 = vadd.f32 %v2246_v48, %v2227_v46  ;;  %2668 = vmatpush.msrb.mxu1 %v2553_v47  ;;  %v2307_v0 = vadd.f32 %v2306_v22, %v1801_v20 }
 0x248   : > { %2728 = vmatpush.msra.mxu0 %v2601_v11 }
 0x249   : > { %v2267_v40 = vadd.f32 %v2266_v53, %v2247_v21  ;;  %2669 = vmatpush.msrb.mxu1 %v2552_v52 }
 0x24a   : > { %2729 = vmatpush.msra.mxu0 %v2600_v28 }
 0x24b   : > { %v2287_v59 = vadd.f32 %v2286_v58, %v2267_v40  ;;  %2670 = vmatpush.msrb.mxu1 %v2551_v54 }
 0x24c   : > { %2671 = vmatmul.f32.vlgmr.msrb.gmra.mxu1 %v2530_v19  ;;  %2730 = vmatpush.msra.mxu0 %v2599_v14  ;;  %v2771_v19 = vld [vmem:[%s6337_s7 + $0x78] sm:$0xff] }
 0x24d   : > { %v2532_v60 = vmax.f32 %v2287_v59, 0.0  ;;  %2735 = vmatpush.msra.mxu1 %v2630_v15  ;;  %v2366_v30 = vpop.f32.mrf.mxu3  ;;  %2776 = vmatpush.msra.mxu2 %v2771_v19  ;;  %v2769_v59 = vld [vmem:[%s6337_s7 + $0x68] sm:$0xff] }
 0x24f   : > { %2711 = vmatmul.f32.vlgmr.msrb.gmra.mxu3 %v2532_v60  ;;  %2736 = vmatpush.msra.mxu1 %v2629_v34  ;;  %v2768_v60 = vld [vmem:[%s6337_s7 + $0x60] sm:$0xff] }
 0x250   : > { %2777 = vmatpush.msra.mxu2 %v2770_v1 }
 0x251   : > { %2737 = vmatpush.msra.mxu1 %v2628_v16 }
 0x252   : > { %2778 = vmatpush.msra.mxu2 %v2769_v59 }
 0x253   : > { %2738 = vmatpush.msra.mxu1 %v2627_v17 }
 0x254   : > { %2779 = vmatpush.msra.mxu2 %v2768_v60 }
 0x255   : > { %2739 = vmatpush.msra.mxu1 %v2626_v63 }
 0x256   : > { %2780 = vmatpush.msra.mxu2 %v2767_v12 }
 0x257   : > { %2740 = vmatpush.msra.mxu1 %v2625_v62 }
 0x258   : > { %2781 = vmatpush.msra.mxu2 %v2766_v33 }
 0x259   : > { %2741 = vmatpush.msra.mxu1 %v2624_v5  ;;  %v2870_v5 = vld [vmem:[%s6338_s8] ss:$0 sm:$0xff] }
 0x25a   : > { %2782 = vmatpush.msra.mxu2 %v2765_v61 }
 0x25b   : > { %2742 = vmatpush.msra.mxu1 %v2623_v39 }
 0x25c   : > { %2783 = vmatpush.msra.mxu2 %v2764_v27 }
 0x25d   : > { %2743 = vmatpush.msra.mxu1 %v2622_v25 }
 0x25e   : > { %2784 = vmatpush.msra.mxu2 %v2763_v50 }
 0x25f   : > { %2744 = vmatpush.msra.mxu1 %v2621_v29  ;;  %v2426_v44 = vpop.f32.mrf.mxu2 }
 0x260   : > { %v2427_v57 = vadd.f32 %v2426_v44, %v1802_v43  ;;  %2785 = vmatpush.msra.mxu2 %v2762_v2 }
 0x261   : > { %2745 = vmatpush.msra.mxu1 %v2620_v18 }
 0x262   : > { %2786 = vmatpush.msra.mxu2 %v2761_v3 }
 0x263   : > { %2746 = vmatpush.msra.mxu1 %v2619_v49 }
 0x264   : > { %2787 = vmatpush.msra.mxu2 %v2760_v6 }
 0x265   : > { %2747 = vmatpush.msra.mxu1 %v2618_v41 }
 0x266   : > { %2788 = vmatpush.msra.mxu2 %v2759_v7 }
 0x267   : > { %2748 = vmatpush.msra.mxu1 %v2617_v42 }
 0x268   : > { %v2326_v23 = vpop.f32.mrf.mxu1  ;;  %v2386_v35 = vpop.f32.mrf.mxu0  ;;  %2789 = vmatpush.msra.mxu2 %v2758_v32 }
 0x269   : > { %v2327_v24 = vadd.f32 %v2326_v23, %v2307_v0  ;;  %2749 = vmatpush.msra.mxu1 %v2616_v13 }
 0x26a   : > { %2790 = vmatpush.msra.mxu2 %v2757_v8 }
 0x26b   : > { %v2347_v4 = vadd.f32 %v2346_v26, %v2327_v24  ;;  %2750 = vmatpush.msra.mxu1 %v2615_v55 }
 0x26c   : > { %2791 = vmatpush.msra.mxu2 %v2756_v9 }
 0x26d   : > { %v2367_v31 = vadd.f32 %v2366_v30, %v2347_v4 }
 0x26f   : > { %v2387_v36 = vadd.f32 %v2386_v35, %v2367_v31  ;;  %v2446_v45 = vpop.f32.mrf.mxu3 }
 0x270   : > { %v2447_v47 = vadd.f32 %v2446_v45, %v2427_v57 }
 0x281   : > { %v2506_v21 = vpop.f32.mrf.mxu2 }
 0x289   : > { %v2406_v37 = vpop.f32.mrf.mxu1 }
 0x28a   : > { %v2407_v38 = vadd.f32 %v2406_v37, %v2387_v36  ;;  %v2466_v46 = vpop.f32.mrf.mxu0 }
 0x28b   : > { %v2467_v48 = vadd.f32 %v2466_v46, %v2447_v47 }
 0x28c   : > { %v2533_v56 = vmax.f32 %v2407_v38, 0.0 }
 0x28e   : > { %2731 = vmatmul.f32.vlgmr.msra.gmra.mxu0 %v2533_v56 }
 0x291   : > { %v2526_v54 = vpop.f32.mrf.mxu3 }
 0x2a9   : > { %v2486_v51 = vpop.f32.mrf.mxu1 }
 0x2aa   : > { %v2487_v52 = vadd.f32 %v2486_v51, %v2467_v48  ;;  %v2652_v11 = vpop.f32.mrf.mxu0 }
 0x2ab   : > { %v2653_v14 = vadd.f32 %v2869_v10, %v2652_v11 }
 0x2ac   : > { %v2507_v53 = vadd.f32 %v2506_v21, %v2487_v52  ;;  %v2692_v34 = vpop.f32.mrf.mxu2 }
 0x2ae   : > { %v2527_v40 = vadd.f32 %v2526_v54, %v2507_v53 }
 0x2b0   : > { %v2534_v58 = vmax.f32 %v2527_v40, 0.0 }
 0x2b2   : > { %2751 = vmatmul.f32.vlgmr.msra.gmra.mxu1 %v2534_v58 }
 0x2c9   : > { %v2672_v28 = vpop.f32.mrf.mxu1 }
 0x2ca   : > { %v2673_v15 = vadd.f32 %v2672_v28, %v2653_v14 }
 0x2cc   : > { %v2693_v17 = vadd.f32 %v2692_v34, %v2673_v15 }
 0x2d2   : > { %v2712_v16 = vpop.f32.mrf.mxu3 }
 0x2d3   : > { %v2713_v63 = vadd.f32 %v2712_v16, %v2693_v17 }
 0x30b   : > { %v2732_v20 = vpop.f32.mrf.mxu0 }
 0x30c   : > { %v2733_v22 = vadd.f32 %v2732_v20, %v2713_v63 }
 0x32f   : > { %v2752_v62 = vpop.f32.mrf.mxu1 }
 0x330   : > { %v2753_v23 = vadd.f32 %v2752_v62, %v2733_v22 }
 0x332   : > { %v2755_v0 = vmax.f32 %v2753_v23, 0.0 }
 0x334   : > { %2792 = vmatmul.f32.vlgmr.msra.gmra.mxu2 %v2755_v0 }
 0x3b7   : > { %v2793_v24 = vpop.f32.mrf.mxu2 }
 0x3b8   : > { %v2794_v39 = vadd.f32 %v2870_v5, %v2793_v24 }
 0x3ba   : > { %2796 = vst [vmem:[%s330_s17] sm:$0xff] %v2794_v39 }
 0x3bb PF: > { %s19_s30 = sadd.s32 1, %s2881_s30  }
 0x3bc   : > { %p16_p4 = scmp.ge.s32.totalorder %s19_s30, 4  }
 0x3be   :  { %18 = sbr.rel (!%p16_p4) target bundleno = 1 (0x1), region = 86 }

</bundles_post_ra>
